<compile_context>
chip_gen: v7x
topology: tpu7x:2x2x1
jax: 0.10.0
libtpu: 0.0.40
codegen_flags: <defaults>
</compile_context>

<pallas_src>
import functools

import jax
import jax.numpy as jnp
from jax.experimental import pallas as pl
from jax.experimental.pallas import tpu as pltpu


# Row indices inside the packed per-layer vector slab.
(_V_BO_S, _V_LN1G, _V_LN1B, _V_BO_C, _V_LN2G, _V_LN2B,
 _V_B1, _V_B2, _V_LN3G, _V_LN3B) = range(10)
_VEC_ROWS = 16  # padded to a sublane multiple


# ----------------------------------------------------------------------------
# In-kernel helpers (traced inside the Pallas kernel body)
# ----------------------------------------------------------------------------
def _layer_norm(h, gamma, beta):
    """LayerNorm with PyTorch semantics (eps=1e-5, biased variance)."""
    mu = jnp.mean(h, axis=-1, keepdims=True)
    d = h - mu
    var = jnp.mean(d * d, axis=-1, keepdims=True)
    return d * jax.lax.rsqrt(var + 1e-5) * gamma + beta


def _block_diag_bias(mq, mk, q_seq, kv_seq, batch):
    """Additive score bias generated in-kernel: 0 within a batch element,
    -1e30 across elements.  Built from 2-D iotas + compares only (no integer
    division) so it lowers cleanly on all TPU generations."""
    r = jax.lax.broadcasted_iota(jnp.int32, (mq, mk), 0)
    c = jax.lax.broadcasted_iota(jnp.int32, (mq, mk), 1)
    same = jnp.zeros((mq, mk), dtype=jnp.bool_)
    for b in range(batch):  # tiny static unroll over batch
        in_r = (r >= b * q_seq) & (r < (b + 1) * q_seq)
        in_c = (c >= b * kv_seq) & (c < (b + 1) * kv_seq)
        same = same | (in_r & in_c)
    return jnp.where(same, 0.0, -1e30)


def _mha(q_all, k_all, v_all, wo, bo, bias, *, num_heads):
    """Multi-head attention on flattened (batch*seq, D) activations.

    `bias` is the additive block-diagonal (Mq, Mk) score bias so all batches
    are handled with lane-dense 2-D matmuls.  Per-head outputs are
    concatenated once and passed through a single output projection.
    """
    mq, d_model = q_all.shape
    dh = d_model // num_heads
    scale = 1.0 / float(dh) ** 0.5

    heads = []
    for h in range(num_heads):
        lo = h * dh
        q = q_all[:, lo:lo + dh]
        k = k_all[:, lo:lo + dh]
        v = v_all[:, lo:lo + dh]
        # s = q @ k.T (contract the last dims directly; no explicit transpose)
        s = jax.lax.dot_general(q, k, (((1,), (1,)), ((), ())),
                                preferred_element_type=jnp.float32)
        s = s * scale + bias
        s = s - jnp.max(s, axis=-1, keepdims=True)
        p = jnp.exp(s)
        p = p / jnp.sum(p, axis=-1, keepdims=True)   # exact divide (f32 parity)
        heads.append(jnp.dot(p, v, preferred_element_type=jnp.float32))
    o = jnp.concatenate(heads, axis=-1)              # (Mq, D), head-major lanes
    return jnp.dot(o, wo, preferred_element_type=jnp.float32) + bo


def _ffn(x, w1, b1, w2, b2):
    h = jnp.dot(x, w1, preferred_element_type=jnp.float32) + b1
    h = jnp.maximum(h, 0.0)                          # ReLU
    return jnp.dot(h, w2, preferred_element_type=jnp.float32) + b2


# ----------------------------------------------------------------------------
# One fused kernel: encoder layers, then decoder layers, all in VMEM
# ----------------------------------------------------------------------------
def _transformer_kernel(src_ref, trg_ref,
                        wqkv_ref, wo_s_ref, wq_c_ref, wkv_c_ref, wo_c_ref,
                        w1_ref, w2_ref, vec_ref, fnorm_ref,
                        out_ref, mem_ref, x_ref,
                        *, num_heads, num_enc, batch, s_src, s_trg):
    layer = pl.program_id(0)
    last = pl.num_programs(0) - 1

    d_model = src_ref.shape[1]
    e_dim = w1_ref.shape[1]
    m_src = src_ref.shape[0]
    m_trg = trg_ref.shape[0]

    def vrow(row, width):
        return vec_ref[row:row + 1, :width]          # (1, width) VMEM load

    bo_s = vrow(_V_BO_S, d_model)
    ln1_g, ln1_b = vrow(_V_LN1G, d_model), vrow(_V_LN1B, d_model)
    b1 = vrow(_V_B1, e_dim)
    b2 = vrow(_V_B2, d_model)
    ln3_g, ln3_b = vrow(_V_LN3G, d_model), vrow(_V_LN3B, d_model)

    @pl.when(layer == 0)
    def _seed_encoder():
        mem_ref[...] = src_ref[...]

    # ------------------------------ encoder phase ---------------------------
    @pl.when(layer < num_enc)
    def _encoder_layer():
        x = mem_ref[...]
        bias = _block_diag_bias(m_src, m_src, s_src, s_src, batch)

        qkv = jnp.dot(x, wqkv_ref[...], preferred_element_type=jnp.float32)
        attn = _mha(qkv[:, :d_model], qkv[:, d_model:2 * d_model],
                    qkv[:, 2 * d_model:],
                    wo_s_ref[...], bo_s, bias, num_heads=num_heads)
        x = _layer_norm(attn + x, ln1_g, ln1_b)

        ff = _ffn(x, w1_ref[...], b1, w2_ref[...], b2)
        x = _layer_norm(ff + x, ln3_g, ln3_b)

        @pl.when(layer < num_enc - 1)
        def _store_plain():
            mem_ref[...] = x

        @pl.when(layer == num_enc - 1)
        def _final_encoder_norm():
            # Final encoder LayerNorm; decoder consumes the normed memory.
            mem_ref[...] = _layer_norm(x, fnorm_ref[0:1, :], fnorm_ref[1:2, :])

    # ------------------------------ decoder phase ---------------------------
    @pl.when(layer >= num_enc)
    def _decoder_layer():
        @pl.when(layer == num_enc)
        def _seed_decoder():
            x_ref[...] = trg_ref[...]

        x = x_ref[...]
        mem = mem_ref[...]
        sbias = _block_diag_bias(m_trg, m_trg, s_trg, s_trg, batch)
        cbias = _block_diag_bias(m_trg, m_src, s_trg, s_src, batch)

        # self attention
        qkv = jnp.dot(x, wqkv_ref[...], preferred_element_type=jnp.float32)
        attn = _mha(qkv[:, :d_model], qkv[:, d_model:2 * d_model],
                    qkv[:, 2 * d_model:],
                    wo_s_ref[...], bo_s, sbias, num_heads=num_heads)
        x = _layer_norm(attn + x, ln1_g, ln1_b)

        # cross attention against the resident encoder memory
        q = jnp.dot(x, wq_c_ref[...], preferred_element_type=jnp.float32)
        kv = jnp.dot(mem, wkv_c_ref[...], preferred_element_type=jnp.float32)
        attn = _mha(q, kv[:, :d_model], kv[:, d_model:],
                    wo_c_ref[...], vrow(_V_BO_C, d_model), cbias,
                    num_heads=num_heads)
        x = _layer_norm(attn + x, vrow(_V_LN2G, d_model), vrow(_V_LN2B, d_model))

        # feed forward
        ff = _ffn(x, w1_ref[...], b1, w2_ref[...], b2)
        x = _layer_norm(ff + x, ln3_g, ln3_b)
        x_ref[...] = x

        @pl.when(layer == last)
        def _final_decoder_norm():
            out_ref[...] = _layer_norm(x, fnorm_ref[2:3, :], fnorm_ref[3:4, :])


# ----------------------------------------------------------------------------
# Wrapper: one pallas_call for the whole transformer forward pass
# ----------------------------------------------------------------------------
def transformer_forward(src, trg, params, *, num_heads):
    if src.shape[0] != trg.shape[0]:
        raise RuntimeError("The batch size of the src and trg must be the same.")
    if src.shape[2] != trg.shape[2]:
        raise RuntimeError("The number of features for the src and trg must be the same.")

    batch, s_src, d_model = src.shape
    s_trg = trg.shape[1]
    num_enc = int(params["num_encoder_layers"])
    num_layers = params["wqkv"].shape[0]
    num_dec = num_layers - num_enc
    assert num_enc >= 1 and num_dec >= 1, "need at least one encoder and one decoder layer"
    e_dim = params["w1"].shape[2]
    vw = params["vec"].shape[2]
    m_src, m_trg = batch * s_src, batch * s_trg

    src2d = src.reshape(m_src, d_model)
    trg2d = trg.reshape(m_trg, d_model)

    cm = lambda l: (0, 0)          # resident arrays (loaded once)
    lm = lambda l: (l, 0, 0)       # per-layer stacked weights

    grid_spec = pltpu.PrefetchScalarGridSpec(
        num_scalar_prefetch=0,
        grid=(num_layers,),
        in_specs=[
            pl.BlockSpec((m_src, d_model), cm),                        # src
            pl.BlockSpec((m_trg, d_model), cm),                        # trg
            pl.BlockSpec((pl.Squeezed(), d_model, 3 * d_model), lm),   # wqkv (self)
            pl.BlockSpec((pl.Squeezed(), d_model, d_model), lm),       # wo (self)
            pl.BlockSpec((pl.Squeezed(), d_model, d_model), lm),       # wq (cross)
            pl.BlockSpec((pl.Squeezed(), d_model, 2 * d_model), lm),   # wkv (cross)
            pl.BlockSpec((pl.Squeezed(), d_model, d_model), lm),       # wo (cross)
            pl.BlockSpec((pl.Squeezed(), d_model, e_dim), lm),         # w1
            pl.BlockSpec((pl.Squeezed(), e_dim, d_model), lm),         # w2
            pl.BlockSpec((pl.Squeezed(), _VEC_ROWS, vw), lm),          # packed vectors
            pl.BlockSpec((4, d_model), cm),                            # final norms
        ],
        out_specs=pl.BlockSpec((m_trg, d_model), cm),
        scratch_shapes=[
            pltpu.VMEM((m_src, d_model), jnp.float32),   # encoder memory
            pltpu.VMEM((m_trg, d_model), jnp.float32),   # decoder activation
        ],
    )

    out2d = pl.pallas_call(
        functools.partial(_transformer_kernel, num_heads=num_heads,
                          num_enc=num_enc, batch=batch,
                          s_src=s_src, s_trg=s_trg),
        out_shape=jax.ShapeDtypeStruct((m_trg, d_model), jnp.float32),
        grid_spec=grid_spec,
        compiler_params=pltpu.CompilerParams(
            dimension_semantics=("arbitrary",)),   # layer axis is sequential
    )(src2d, trg2d,
      params["wqkv"], params["wo_s"], params["wq_c"], params["wkv_c"],
      params["wo_c"], params["w1"], params["w2"], params["vec"],
      params["fnorm"])

    return out2d.reshape(batch, s_trg, d_model)


# ----------------------------------------------------------------------------
# Deterministic parameter init (xavier-uniform for matrices, zeros for biases,
# ones/zeros for LayerNorm — mirrors Transformer._reset_parameters).  Encoder
# layers come first in the stacks, decoder layers after; encoder layers carry
# zero cross-attention weights (unused by the encoder branch).
# ----------------------------------------------------------------------------
def _xavier(key, shape):
    fan_in, fan_out = shape
    limit = (6.0 / (fan_in + fan_out)) ** 0.5
    return jax.random.uniform(key, shape, jnp.float32, -limit, limit)


def init_transformer_params(key, *, num_encoder_layers, num_decoder_layers,
                            hidden_dim, expansion_dim):
    d, e = hidden_dim, expansion_dim
    vw = max(d, e)
    num_layers = num_encoder_layers + num_decoder_layers

    def make_vec():
        # All biases are zeros; LayerNorm gammas are ones (first d lanes).
        v = jnp.zeros((_VEC_ROWS, vw), jnp.float32)
        ones_row = jnp.zeros((vw,), jnp.float32).at[:d].set(1.0)
        v = v.at[_V_LN1G].set(ones_row)
        v = v.at[_V_LN2G].set(ones_row)
        v = v.at[_V_LN3G].set(ones_row)
        return v

    wqkv, wo_s, wq_c, wkv_c, wo_c, w1, w2, vec = [], [], [], [], [], [], [], []
    for i in range(num_layers):
        k = jax.random.fold_in(key, i)
        ks = jax.random.split(k, 10)
        is_dec = i >= num_encoder_layers
        wqkv.append(jnp.concatenate([_xavier(ks[0], (d, d)),
                                     _xavier(ks[1], (d, d)),
                                     _xavier(ks[2], (d, d))], axis=1))
        wo_s.append(_xavier(ks[3], (d, d)))
        if is_dec:
            wq_c.append(_xavier(ks[4], (d, d)))
            wkv_c.append(jnp.concatenate([_xavier(ks[5], (d, d)),
                                          _xavier(ks[6], (d, d))], axis=1))
            wo_c.append(_xavier(ks[7], (d, d)))
        else:
            wq_c.append(jnp.zeros((d, d), jnp.float32))
            wkv_c.append(jnp.zeros((d, 2 * d), jnp.float32))
            wo_c.append(jnp.zeros((d, d), jnp.float32))
        w1.append(_xavier(ks[8], (d, e)))
        w2.append(_xavier(ks[9], (e, d)))
        vec.append(make_vec())

    fnorm = jnp.stack([jnp.ones((d,), jnp.float32),    # encoder final gamma
                       jnp.zeros((d,), jnp.float32),   # encoder final beta
                       jnp.ones((d,), jnp.float32),    # decoder final gamma
                       jnp.zeros((d,), jnp.float32)],  # decoder final beta
                      axis=0)

    return {
        "num_encoder_layers": num_encoder_layers,
        "wqkv": jnp.stack(wqkv), "wo_s": jnp.stack(wo_s),
        "wq_c": jnp.stack(wq_c), "wkv_c": jnp.stack(wkv_c),
        "wo_c": jnp.stack(wo_c),
        "w1": jnp.stack(w1), "w2": jnp.stack(w2),
        "vec": jnp.stack(vec), "fnorm": fnorm,
    }


# ----------------------------------------------------------------------------
if __name__ == "__main__":
    # Small config: 2 encoder layers, 2 decoder layers, hidden=32, heads=4,
    # expansion=64, dropout=0.0, activation='relu'.
    B, S_SRC, S_TRG, D, H, E = 2, 8, 8, 32, 4, 64
    NUM_ENC, NUM_DEC = 2, 2

    root = jax.random.PRNGKey(0)
    k_params, k_src, k_trg = jax.random.split(root, 3)

    params = init_transformer_params(k_params,
                                     num_encoder_layers=NUM_ENC,
                                     num_decoder_layers=NUM_DEC,
                                     hidden_dim=D, expansion_dim=E)
    src = jax.random.normal(k_src, (B, S_SRC, D), jnp.float32)
    trg = jax.random.normal(k_trg, (B, S_TRG, D), jnp.float32)

    out = transformer_forward(src, trg, params, num_heads=H)
    out = jax.block_until_ready(out)

    assert out.shape == (B, S_TRG, D), out.shape
    assert bool(jnp.all(jnp.isfinite(out))), "non-finite output"
    print("KERNEL_OK")
</pallas_src>

<mosaic_0001>
module attributes {stable_mosaic.version = 11 : i64} {
  func.func @_transformer_kernel(%arg0: i32, %arg1: memref<16x32xf32, #tpu.memory_space<vmem>>, %arg2: memref<16x32xf32, #tpu.memory_space<vmem>>, %arg3: memref<1x32x96xf32, #tpu.memory_space<vmem>>, %arg4: memref<1x32x32xf32, #tpu.memory_space<vmem>>, %arg5: memref<1x32x32xf32, #tpu.memory_space<vmem>>, %arg6: memref<1x32x64xf32, #tpu.memory_space<vmem>>, %arg7: memref<1x32x32xf32, #tpu.memory_space<vmem>>, %arg8: memref<1x32x64xf32, #tpu.memory_space<vmem>>, %arg9: memref<1x64x32xf32, #tpu.memory_space<vmem>>, %arg10: memref<1x16x64xf32, #tpu.memory_space<vmem>>, %arg11: memref<4x32xf32, #tpu.memory_space<vmem>>, %arg12: memref<16x32xf32, #tpu.memory_space<vmem>>, %arg13: memref<16x32xf32, #tpu.memory_space<vmem>>, %arg14: memref<16x32xf32, #tpu.memory_space<vmem>>) attributes {dimension_semantics = [#tpu.dimension_semantics<arbitrary>], iteration_bounds = array<i64: 4>, scalar_prefetch = 0 : i64, scratch_operands = 2 : i64, tpu.core_type = #tpu.core_type<tc>, window_params = [{pipeline_mode = #tpu.pipeline_mode<synchronous>, transform_indices = @transform_0, window_bounds = array<i64: 16, 32>}, {pipeline_mode = #tpu.pipeline_mode<synchronous>, transform_indices = @transform_1, window_bounds = array<i64: 16, 32>}, {transform_indices = @transform_2, window_bounds = array<i64: 1, 32, 96>}, {transform_indices = @transform_3, window_bounds = array<i64: 1, 32, 32>}, {transform_indices = @transform_4, window_bounds = array<i64: 1, 32, 32>}, {transform_indices = @transform_5, window_bounds = array<i64: 1, 32, 64>}, {transform_indices = @transform_6, window_bounds = array<i64: 1, 32, 32>}, {transform_indices = @transform_7, window_bounds = array<i64: 1, 32, 64>}, {transform_indices = @transform_8, window_bounds = array<i64: 1, 64, 32>}, {transform_indices = @transform_9, window_bounds = array<i64: 1, 16, 64>}, {pipeline_mode = #tpu.pipeline_mode<synchronous>, transform_indices = @transform_10, window_bounds = array<i64: 4, 32>}, {pipeline_mode = #tpu.pipeline_mode<synchronous>, transform_indices = @transform_11, window_bounds = array<i64: 16, 32>}]} {
    %c0 = arith.constant 0 : index
    %c0_0 = arith.constant 0 : index
    %c0_1 = arith.constant 0 : index
    %0 = vector.load %arg10[%c0, %c0_0, %c0_1] : memref<1x16x64xf32, #tpu.memory_space<vmem>>, vector<1x1x32xf32>
    %1 = vector.shape_cast %0 : vector<1x1x32xf32> to vector<1x32xf32>
    %c0_2 = arith.constant 0 : index
    %c1 = arith.constant 1 : index
    %c0_3 = arith.constant 0 : index
    %2 = vector.load %arg10[%c0_2, %c1, %c0_3] : memref<1x16x64xf32, #tpu.memory_space<vmem>>, vector<1x1x32xf32>
    %3 = vector.shape_cast %2 : vector<1x1x32xf32> to vector<1x32xf32>
    %c0_4 = arith.constant 0 : index
    %c2 = arith.constant 2 : index
    %c0_5 = arith.constant 0 : index
    %4 = vector.load %arg10[%c0_4, %c2, %c0_5] : memref<1x16x64xf32, #tpu.memory_space<vmem>>, vector<1x1x32xf32>
    %5 = vector.shape_cast %4 : vector<1x1x32xf32> to vector<1x32xf32>
    %c0_6 = arith.constant 0 : index
    %c6 = arith.constant 6 : index
    %c0_7 = arith.constant 0 : index
    %6 = vector.load %arg10[%c0_6, %c6, %c0_7] : memref<1x16x64xf32, #tpu.memory_space<vmem>>, vector<1x1x64xf32>
    %7 = vector.shape_cast %6 : vector<1x1x64xf32> to vector<1x64xf32>
    %c0_8 = arith.constant 0 : index
    %c7 = arith.constant 7 : index
    %c0_9 = arith.constant 0 : index
    %8 = vector.load %arg10[%c0_8, %c7, %c0_9] : memref<1x16x64xf32, #tpu.memory_space<vmem>>, vector<1x1x32xf32>
    %9 = vector.shape_cast %8 : vector<1x1x32xf32> to vector<1x32xf32>
    %c0_10 = arith.constant 0 : index
    %c8 = arith.constant 8 : index
    %c0_11 = arith.constant 0 : index
    %10 = vector.load %arg10[%c0_10, %c8, %c0_11] : memref<1x16x64xf32, #tpu.memory_space<vmem>>, vector<1x1x32xf32>
    %11 = vector.shape_cast %10 : vector<1x1x32xf32> to vector<1x32xf32>
    %c0_12 = arith.constant 0 : index
    %c9 = arith.constant 9 : index
    %c0_13 = arith.constant 0 : index
    %12 = vector.load %arg10[%c0_12, %c9, %c0_13] : memref<1x16x64xf32, #tpu.memory_space<vmem>>, vector<1x1x32xf32>
    %13 = vector.shape_cast %12 : vector<1x1x32xf32> to vector<1x32xf32>
    %c0_i32 = arith.constant 0 : i32
    %14 = arith.cmpi eq, %arg0, %c0_i32 : i32
    %15 = arith.extui %14 : i1 to i32
    %c0_i32_14 = arith.constant 0 : i32
    %16 = arith.cmpi ne, %15, %c0_i32_14 : i32
    scf.if %16 {
      %c0_18 = arith.constant 0 : index
      %c0_19 = arith.constant 0 : index
      %23 = vector.load %arg1[%c0_18, %c0_19] : memref<16x32xf32, #tpu.memory_space<vmem>>, vector<16x32xf32>
      %c0_20 = arith.constant 0 : index
      %c0_21 = arith.constant 0 : index
      %24 = vector.load %arg13[%c0_20, %c0_21] : memref<16x32xf32, #tpu.memory_space<vmem>>, vector<16x32xf32>
      tpu.vector_store %arg13[%c0_20, %c0_21], %23 {strides = array<i32>} : memref<16x32xf32, #tpu.memory_space<vmem>>, vector<16x32xf32>,
    } else {
    }
    %c2_i32 = arith.constant 2 : i32
    %17 = arith.cmpi slt, %arg0, %c2_i32 : i32
    %18 = arith.extui %17 : i1 to i32
    %c0_i32_15 = arith.constant 0 : i32
    %19 = arith.cmpi ne, %18, %c0_i32_15 : i32
    scf.if %19 {
      %c0_18 = arith.constant 0 : index
      %c0_19 = arith.constant 0 : index
      %23 = vector.load %arg13[%c0_18, %c0_19] : memref<16x32xf32, #tpu.memory_space<vmem>>, vector<16x32xf32>
      %24 = tpu.iota {dimensions = array<i32: 0>} : vector<16x16xi32>
      %25 = tpu.iota {dimensions = array<i32: 1>} : vector<16x16xi32>
      %false = arith.constant false
      %26 = vector.broadcast %false : i1 to vector<16x16xi1>
      %c0_i32_20 = arith.constant 0 : i32
      %27 = vector.broadcast %c0_i32_20 : i32 to vector<16x16xi32>
      %28 = arith.cmpi sge, %24, %27 : vector<16x16xi32>
      %c8_i32 = arith.constant 8 : i32
      %29 = vector.broadcast %c8_i32 : i32 to vector<16x16xi32>
      %30 = arith.cmpi slt, %24, %29 : vector<16x16xi32>
      %31 = arith.andi %28, %30 : vector<16x16xi1>
      %c0_i32_21 = arith.constant 0 : i32
      %32 = vector.broadcast %c0_i32_21 : i32 to vector<16x16xi32>
      %33 = arith.cmpi sge, %25, %32 : vector<16x16xi32>
      %c8_i32_22 = arith.constant 8 : i32
      %34 = vector.broadcast %c8_i32_22 : i32 to vector<16x16xi32>
      %35 = arith.cmpi slt, %25, %34 : vector<16x16xi32>
      %36 = arith.andi %33, %35 : vector<16x16xi1>
      %37 = arith.andi %31, %36 : vector<16x16xi1>
      %38 = arith.ori %26, %37 : vector<16x16xi1>
      %c8_i32_23 = arith.constant 8 : i32
      %39 = vector.broadcast %c8_i32_23 : i32 to vector<16x16xi32>
      %40 = arith.cmpi sge, %24, %39 : vector<16x16xi32>
      %c16_i32 = arith.constant 16 : i32
      %41 = vector.broadcast %c16_i32 : i32 to vector<16x16xi32>
      %42 = arith.cmpi slt, %24, %41 : vector<16x16xi32>
      %43 = arith.andi %40, %42 : vector<16x16xi1>
      %c8_i32_24 = arith.constant 8 : i32
      %44 = vector.broadcast %c8_i32_24 : i32 to vector<16x16xi32>
      %45 = arith.cmpi sge, %25, %44 : vector<16x16xi32>
      %c16_i32_25 = arith.constant 16 : i32
      %46 = vector.broadcast %c16_i32_25 : i32 to vector<16x16xi32>
      %47 = arith.cmpi slt, %25, %46 : vector<16x16xi32>
      %48 = arith.andi %45, %47 : vector<16x16xi1>
      %49 = arith.andi %43, %48 : vector<16x16xi1>
      %50 = arith.ori %38, %49 : vector<16x16xi1>
      %cst = arith.constant 0.000000e+00 : f32
      %cst_26 = arith.constant -1.000000e+30 : f32
      %51 = vector.broadcast %cst : f32 to vector<16x16xf32>
      %52 = vector.broadcast %cst_26 : f32 to vector<16x16xf32>
      %53 = arith.select %50, %51, %52 : vector<16x16xi1>, vector<16x16xf32>
      %c0_27 = arith.constant 0 : index
      %c0_28 = arith.constant 0 : index
      %c0_29 = arith.constant 0 : index
      %54 = vector.load %arg3[%c0_27, %c0_28, %c0_29] : memref<1x32x96xf32, #tpu.memory_space<vmem>>, vector<1x32x96xf32>
      %55 = vector.shape_cast %54 : vector<1x32x96xf32> to vector<32x96xf32>
      %cst_30 = arith.constant dense<0.000000e+00> : vector<16x96xf32>
      %56 = tpu.matmul %23, %55, %cst_30 {dimension_numbers = #tpu.dot_dimension_numbers<[1], [0], [0], [1], [0, 0, 1, 1], [], []>} : vector<16x32xf32>, vector<32x96xf32>, vector<16x96xf32> -> vector<16x96xf32>
      %57 = vector.extract_strided_slice %56 {offsets = [0, 0], sizes = [16, 32], strides = [1, 1]} : vector<16x96xf32> to vector<16x32xf32>
      %58 = vector.extract_strided_slice %56 {offsets = [0, 32], sizes = [16, 32], strides = [1, 1]} : vector<16x96xf32> to vector<16x32xf32>
      %59 = vector.extract_strided_slice %56 {offsets = [0, 64], sizes = [16, 32], strides = [1, 1]} : vector<16x96xf32> to vector<16x32xf32>
      %c0_31 = arith.constant 0 : index
      %c0_32 = arith.constant 0 : index
      %c0_33 = arith.constant 0 : index
      %60 = vector.load %arg4[%c0_31, %c0_32, %c0_33] : memref<1x32x32xf32, #tpu.memory_space<vmem>>, vector<1x32x32xf32>
      %61 = vector.shape_cast %60 : vector<1x32x32xf32> to vector<32x32xf32>
      %62 = vector.extract_strided_slice %57 {offsets = [0, 0], sizes = [16, 8], strides = [1, 1]} : vector<16x32xf32> to vector<16x8xf32>
      %63 = vector.extract_strided_slice %58 {offsets = [0, 0], sizes = [16, 8], strides = [1, 1]} : vector<16x32xf32> to vector<16x8xf32>
      %64 = vector.extract_strided_slice %59 {offsets = [0, 0], sizes = [16, 8], strides = [1, 1]} : vector<16x32xf32> to vector<16x8xf32>
      %cst_34 = arith.constant dense<0.000000e+00> : vector<16x16xf32>
      %65 = tpu.matmul %62, %63, %cst_34 {dimension_numbers = #tpu.dot_dimension_numbers<[1], [1], [0], [0], [0, 0, 1, 0], [], []>} : vector<16x8xf32>, vector<16x8xf32>, vector<16x16xf32> -> vector<16x16xf32>
      %cst_35 = arith.constant 0.353553385 : f32
      %66 = vector.broadcast %cst_35 : f32 to vector<16x16xf32>
      %67 = arith.mulf %65, %66 : vector<16x16xf32>
      %68 = arith.addf %67, %53 : vector<16x16xf32>
      %cst_36 = arith.constant dense<0xFF800000> : vector<16xf32>
      %69 = vector.multi_reduction <maximumf>, %68, %cst_36 [1] : vector<16x16xf32> to vector<16xf32>
      %70 = vector.shape_cast %69 : vector<16xf32> to vector<16x1xf32>
      %71 = vector.broadcast %70 : vector<16x1xf32> to vector<16x16xf32>
      %72 = arith.subf %68, %71 : vector<16x16xf32>
      %73 = math.exp %72 : vector<16x16xf32>
      %cst_37 = arith.constant dense<0.000000e+00> : vector<16xf32>
      %74 = vector.multi_reduction <add>, %73, %cst_37 [1] : vector<16x16xf32> to vector<16xf32>
      %75 = vector.shape_cast %74 : vector<16xf32> to vector<16x1xf32>
      %76 = vector.broadcast %75 : vector<16x1xf32> to vector<16x16xf32>
      %77 = arith.divf %73, %76 : vector<16x16xf32>
      %cst_38 = arith.constant dense<0.000000e+00> : vector<16x8xf32>
      %78 = tpu.matmul %77, %64, %cst_38 {dimension_numbers = #tpu.dot_dimension_numbers<[1], [0], [0], [1], [0, 0, 1, 1], [], []>} : vector<16x16xf32>, vector<16x8xf32>, vector<16x8xf32> -> vector<16x8xf32>
      %79 = vector.extract_strided_slice %57 {offsets = [0, 8], sizes = [16, 8], strides = [1, 1]} : vector<16x32xf32> to vector<16x8xf32>
      %80 = vector.extract_strided_slice %58 {offsets = [0, 8], sizes = [16, 8], strides = [1, 1]} : vector<16x32xf32> to vector<16x8xf32>
      %81 = vector.extract_strided_slice %59 {offsets = [0, 8], sizes = [16, 8], strides = [1, 1]} : vector<16x32xf32> to vector<16x8xf32>
      %cst_39 = arith.constant dense<0.000000e+00> : vector<16x16xf32>
      %82 = tpu.matmul %79, %80, %cst_39 {dimension_numbers = #tpu.dot_dimension_numbers<[1], [1], [0], [0], [0, 0, 1, 0], [], []>} : vector<16x8xf32>, vector<16x8xf32>, vector<16x16xf32> -> vector<16x16xf32>
      %cst_40 = arith.constant 0.353553385 : f32
      %83 = vector.broadcast %cst_40 : f32 to vector<16x16xf32>
      %84 = arith.mulf %82, %83 : vector<16x16xf32>
      %85 = arith.addf %84, %53 : vector<16x16xf32>
      %cst_41 = arith.constant dense<0xFF800000> : vector<16xf32>
      %86 = vector.multi_reduction <maximumf>, %85, %cst_41 [1] : vector<16x16xf32> to vector<16xf32>
      %87 = vector.shape_cast %86 : vector<16xf32> to vector<16x1xf32>
      %88 = vector.broadcast %87 : vector<16x1xf32> to vector<16x16xf32>
      %89 = arith.subf %85, %88 : vector<16x16xf32>
      %90 = math.exp %89 : vector<16x16xf32>
      %cst_42 = arith.constant dense<0.000000e+00> : vector<16xf32>
      %91 = vector.multi_reduction <add>, %90, %cst_42 [1] : vector<16x16xf32> to vector<16xf32>
      %92 = vector.shape_cast %91 : vector<16xf32> to vector<16x1xf32>
      %93 = vector.broadcast %92 : vector<16x1xf32> to vector<16x16xf32>
      %94 = arith.divf %90, %93 : vector<16x16xf32>
      %cst_43 = arith.constant dense<0.000000e+00> : vector<16x8xf32>
      %95 = tpu.matmul %94, %81, %cst_43 {dimension_numbers = #tpu.dot_dimension_numbers<[1], [0], [0], [1], [0, 0, 1, 1], [], []>} : vector<16x16xf32>, vector<16x8xf32>, vector<16x8xf32> -> vector<16x8xf32>
      %96 = vector.extract_strided_slice %57 {offsets = [0, 16], sizes = [16, 8], strides = [1, 1]} : vector<16x32xf32> to vector<16x8xf32>
      %97 = vector.extract_strided_slice %58 {offsets = [0, 16], sizes = [16, 8], strides = [1, 1]} : vector<16x32xf32> to vector<16x8xf32>
      %98 = vector.extract_strided_slice %59 {offsets = [0, 16], sizes = [16, 8], strides = [1, 1]} : vector<16x32xf32> to vector<16x8xf32>
      %cst_44 = arith.constant dense<0.000000e+00> : vector<16x16xf32>
      %99 = tpu.matmul %96, %97, %cst_44 {dimension_numbers = #tpu.dot_dimension_numbers<[1], [1], [0], [0], [0, 0, 1, 0], [], []>} : vector<16x8xf32>, vector<16x8xf32>, vector<16x16xf32> -> vector<16x16xf32>
      %cst_45 = arith.constant 0.353553385 : f32
      %100 = vector.broadcast %cst_45 : f32 to vector<16x16xf32>
      %101 = arith.mulf %99, %100 : vector<16x16xf32>
      %102 = arith.addf %101, %53 : vector<16x16xf32>
      %cst_46 = arith.constant dense<0xFF800000> : vector<16xf32>
      %103 = vector.multi_reduction <maximumf>, %102, %cst_46 [1] : vector<16x16xf32> to vector<16xf32>
      %104 = vector.shape_cast %103 : vector<16xf32> to vector<16x1xf32>
      %105 = vector.broadcast %104 : vector<16x1xf32> to vector<16x16xf32>
      %106 = arith.subf %102, %105 : vector<16x16xf32>
      %107 = math.exp %106 : vector<16x16xf32>
      %cst_47 = arith.constant dense<0.000000e+00> : vector<16xf32>
      %108 = vector.multi_reduction <add>, %107, %cst_47 [1] : vector<16x16xf32> to vector<16xf32>
      %109 = vector.shape_cast %108 : vector<16xf32> to vector<16x1xf32>
      %110 = vector.broadcast %109 : vector<16x1xf32> to vector<16x16xf32>
      %111 = arith.divf %107, %110 : vector<16x16xf32>
      %cst_48 = arith.constant dense<0.000000e+00> : vector<16x8xf32>
      %112 = tpu.matmul %111, %98, %cst_48 {dimension_numbers = #tpu.dot_dimension_numbers<[1], [0], [0], [1], [0, 0, 1, 1], [], []>} : vector<16x16xf32>, vector<16x8xf32>, vector<16x8xf32> -> vector<16x8xf32>
      %113 = vector.extract_strided_slice %57 {offsets = [0, 24], sizes = [16, 8], strides = [1, 1]} : vector<16x32xf32> to vector<16x8xf32>
      %114 = vector.extract_strided_slice %58 {offsets = [0, 24], sizes = [16, 8], strides = [1, 1]} : vector<16x32xf32> to vector<16x8xf32>
      %115 = vector.extract_strided_slice %59 {offsets = [0, 24], sizes = [16, 8], strides = [1, 1]} : vector<16x32xf32> to vector<16x8xf32>
      %cst_49 = arith.constant dense<0.000000e+00> : vector<16x16xf32>
      %116 = tpu.matmul %113, %114, %cst_49 {dimension_numbers = #tpu.dot_dimension_numbers<[1], [1], [0], [0], [0, 0, 1, 0], [], []>} : vector<16x8xf32>, vector<16x8xf32>, vector<16x16xf32> -> vector<16x16xf32>
      %cst_50 = arith.constant 0.353553385 : f32
      %117 = vector.broadcast %cst_50 : f32 to vector<16x16xf32>
      %118 = arith.mulf %116, %117 : vector<16x16xf32>
      %119 = arith.addf %118, %53 : vector<16x16xf32>
      %cst_51 = arith.constant dense<0xFF800000> : vector<16xf32>
      %120 = vector.multi_reduction <maximumf>, %119, %cst_51 [1] : vector<16x16xf32> to vector<16xf32>
      %121 = vector.shape_cast %120 : vector<16xf32> to vector<16x1xf32>
      %122 = vector.broadcast %121 : vector<16x1xf32> to vector<16x16xf32>
      %123 = arith.subf %119, %122 : vector<16x16xf32>
      %124 = math.exp %123 : vector<16x16xf32>
      %cst_52 = arith.constant dense<0.000000e+00> : vector<16xf32>
      %125 = vector.multi_reduction <add>, %124, %cst_52 [1] : vector<16x16xf32> to vector<16xf32>
      %126 = vector.shape_cast %125 : vector<16xf32> to vector<16x1xf32>
      %127 = vector.broadcast %126 : vector<16x1xf32> to vector<16x16xf32>
      %128 = arith.divf %124, %127 : vector<16x16xf32>
      %cst_53 = arith.constant dense<0.000000e+00> : vector<16x8xf32>
      %129 = tpu.matmul %128, %115, %cst_53 {dimension_numbers = #tpu.dot_dimension_numbers<[1], [0], [0], [1], [0, 0, 1, 1], [], []>} : vector<16x16xf32>, vector<16x8xf32>, vector<16x8xf32> -> vector<16x8xf32>
      %130 = tpu.concatenate %78, %95, %112, %129 in 1 : vector<16x8xf32>, vector<16x8xf32>, vector<16x8xf32>, vector<16x8xf32> -> vector<16x32xf32>
      %cst_54 = arith.constant dense<0.000000e+00> : vector<16x32xf32>
      %131 = tpu.matmul %130, %61, %cst_54 {dimension_numbers = #tpu.dot_dimension_numbers<[1], [0], [0], [1], [0, 0, 1, 1], [], []>} : vector<16x32xf32>, vector<32x32xf32>, vector<16x32xf32> -> vector<16x32xf32>
      %132 = vector.broadcast %1 : vector<1x32xf32> to vector<16x32xf32>
      %133 = arith.addf %131, %132 : vector<16x32xf32>
      %134 = arith.addf %133, %23 : vector<16x32xf32>
      %cst_55 = arith.constant dense<0.000000e+00> : vector<16xf32>
      %135 = vector.multi_reduction <add>, %134, %cst_55 [1] : vector<16x32xf32> to vector<16xf32>
      %136 = vector.shape_cast %135 : vector<16xf32> to vector<16x1xf32>
      %cst_56 = arith.constant 3.200000e+01 : f32
      %137 = vector.broadcast %cst_56 : f32 to vector<16x1xf32>
      %138 = arith.divf %136, %137 : vector<16x1xf32>
      %139 = vector.broadcast %138 : vector<16x1xf32> to vector<16x32xf32>
      %140 = arith.subf %134, %139 : vector<16x32xf32>
      %141 = arith.mulf %140, %140 : vector<16x32xf32>
      %cst_57 = arith.constant dense<0.000000e+00> : vector<16xf32>
      %142 = vector.multi_reduction <add>, %141, %cst_57 [1] : vector<16x32xf32> to vector<16xf32>
      %143 = vector.shape_cast %142 : vector<16xf32> to vector<16x1xf32>
      %cst_58 = arith.constant 3.200000e+01 : f32
      %144 = vector.broadcast %cst_58 : f32 to vector<16x1xf32>
      %145 = arith.divf %143, %144 : vector<16x1xf32>
      %cst_59 = arith.constant 9.99999974E-6 : f32
      %146 = vector.broadcast %cst_59 : f32 to vector<16x1xf32>
      %147 = arith.addf %145, %146 : vector<16x1xf32>
      %148 = math.rsqrt %147 : vector<16x1xf32>
      %149 = vector.broadcast %148 : vector<16x1xf32> to vector<16x32xf32>
      %150 = arith.mulf %140, %149 : vector<16x32xf32>
      %151 = vector.broadcast %3 : vector<1x32xf32> to vector<16x32xf32>
      %152 = arith.mulf %150, %151 : vector<16x32xf32>
      %153 = vector.broadcast %5 : vector<1x32xf32> to vector<16x32xf32>
      %154 = arith.addf %152, %153 : vector<16x32xf32>
      %c0_60 = arith.constant 0 : index
      %c0_61 = arith.constant 0 : index
      %c0_62 = arith.constant 0 : index
      %155 = vector.load %arg8[%c0_60, %c0_61, %c0_62] : memref<1x32x64xf32, #tpu.memory_space<vmem>>, vector<1x32x64xf32>
      %156 = vector.shape_cast %155 : vector<1x32x64xf32> to vector<32x64xf32>
      %c0_63 = arith.constant 0 : index
      %c0_64 = arith.constant 0 : index
      %c0_65 = arith.constant 0 : index
      %157 = vector.load %arg9[%c0_63, %c0_64, %c0_65] : memref<1x64x32xf32, #tpu.memory_space<vmem>>, vector<1x64x32xf32>
      %158 = vector.shape_cast %157 : vector<1x64x32xf32> to vector<64x32xf32>
      %cst_66 = arith.constant dense<0.000000e+00> : vector<16x64xf32>
      %159 = tpu.matmul %154, %156, %cst_66 {dimension_numbers = #tpu.dot_dimension_numbers<[1], [0], [0], [1], [0, 0, 1, 1], [], []>} : vector<16x32xf32>, vector<32x64xf32>, vector<16x64xf32> -> vector<16x64xf32>
      %160 = vector.broadcast %7 : vector<1x64xf32> to vector<16x64xf32>
      %161 = arith.addf %159, %160 : vector<16x64xf32>
      %cst_67 = arith.constant 0.000000e+00 : f32
      %162 = vector.broadcast %cst_67 : f32 to vector<16x64xf32>
      %163 = arith.maximumf %161, %162 : vector<16x64xf32>
      %cst_68 = arith.constant dense<0.000000e+00> : vector<16x32xf32>
      %164 = tpu.matmul %163, %158, %cst_68 {dimension_numbers = #tpu.dot_dimension_numbers<[1], [0], [0], [1], [0, 0, 1, 1], [], []>} : vector<16x64xf32>, vector<64x32xf32>, vector<16x32xf32> -> vector<16x32xf32>
      %165 = vector.broadcast %9 : vector<1x32xf32> to vector<16x32xf32>
      %166 = arith.addf %164, %165 : vector<16x32xf32>
      %167 = arith.addf %166, %154 : vector<16x32xf32>
      %cst_69 = arith.constant dense<0.000000e+00> : vector<16xf32>
      %168 = vector.multi_reduction <add>, %167, %cst_69 [1] : vector<16x32xf32> to vector<16xf32>
      %169 = vector.shape_cast %168 : vector<16xf32> to vector<16x1xf32>
      %cst_70 = arith.constant 3.200000e+01 : f32
      %170 = vector.broadcast %cst_70 : f32 to vector<16x1xf32>
      %171 = arith.divf %169, %170 : vector<16x1xf32>
      %172 = vector.broadcast %171 : vector<16x1xf32> to vector<16x32xf32>
      %173 = arith.subf %167, %172 : vector<16x32xf32>
      %174 = arith.mulf %173, %173 : vector<16x32xf32>
      %cst_71 = arith.constant dense<0.000000e+00> : vector<16xf32>
      %175 = vector.multi_reduction <add>, %174, %cst_71 [1] : vector<16x32xf32> to vector<16xf32>
      %176 = vector.shape_cast %175 : vector<16xf32> to vector<16x1xf32>
      %cst_72 = arith.constant 3.200000e+01 : f32
      %177 = vector.broadcast %cst_72 : f32 to vector<16x1xf32>
      %178 = arith.divf %176, %177 : vector<16x1xf32>
      %cst_73 = arith.constant 9.99999974E-6 : f32
      %179 = vector.broadcast %cst_73 : f32 to vector<16x1xf32>
      %180 = arith.addf %178, %179 : vector<16x1xf32>
      %181 = math.rsqrt %180 : vector<16x1xf32>
      %182 = vector.broadcast %181 : vector<16x1xf32> to vector<16x32xf32>
      %183 = arith.mulf %173, %182 : vector<16x32xf32>
      %184 = vector.broadcast %11 : vector<1x32xf32> to vector<16x32xf32>
      %185 = arith.mulf %183, %184 : vector<16x32xf32>
      %186 = vector.broadcast %13 : vector<1x32xf32> to vector<16x32xf32>
      %187 = arith.addf %185, %186 : vector<16x32xf32>
      %c1_i32 = arith.constant 1 : i32
      %188 = arith.cmpi slt, %arg0, %c1_i32 : i32
      %189 = arith.extui %188 : i1 to i32
      %c0_i32_74 = arith.constant 0 : i32
      %190 = arith.cmpi ne, %189, %c0_i32_74 : i32
      scf.if %190 {
        %c0_77 = arith.constant 0 : index
        %c0_78 = arith.constant 0 : index
        %194 = vector.load %arg13[%c0_77, %c0_78] : memref<16x32xf32, #tpu.memory_space<vmem>>, vector<16x32xf32>
        tpu.vector_store %arg13[%c0_77, %c0_78], %187 {strides = array<i32>} : memref<16x32xf32, #tpu.memory_space<vmem>>, vector<16x32xf32>,
      } else {
      }
      %c1_i32_75 = arith.constant 1 : i32
      %191 = arith.cmpi eq, %arg0, %c1_i32_75 : i32
      %192 = arith.extui %191 : i1 to i32
      %c0_i32_76 = arith.constant 0 : i32
      %193 = arith.cmpi ne, %192, %c0_i32_76 : i32
      scf.if %193 {
        %c0_77 = arith.constant 0 : index
        %c0_78 = arith.constant 0 : index
        %194 = vector.load %arg11[%c0_77, %c0_78] : memref<4x32xf32, #tpu.memory_space<vmem>>, vector<1x32xf32>
        %c1_79 = arith.constant 1 : index
        %c0_80 = arith.constant 0 : index
        %195 = vector.load %arg11[%c1_79, %c0_80] : memref<4x32xf32, #tpu.memory_space<vmem>>, vector<1x32xf32>
        %cst_81 = arith.constant dense<0.000000e+00> : vector<16xf32>
        %196 = vector.multi_reduction <add>, %187, %cst_81 [1] : vector<16x32xf32> to vector<16xf32>
        %197 = vector.shape_cast %196 : vector<16xf32> to vector<16x1xf32>
        %cst_82 = arith.constant 3.200000e+01 : f32
        %198 = vector.broadcast %cst_82 : f32 to vector<16x1xf32>
        %199 = arith.divf %197, %198 : vector<16x1xf32>
        %200 = vector.broadcast %199 : vector<16x1xf32> to vector<16x32xf32>
        %201 = arith.subf %187, %200 : vector<16x32xf32>
        %202 = arith.mulf %201, %201 : vector<16x32xf32>
        %cst_83 = arith.constant dense<0.000000e+00> : vector<16xf32>
        %203 = vector.multi_reduction <add>, %202, %cst_83 [1] : vector<16x32xf32> to vector<16xf32>
        %204 = vector.shape_cast %203 : vector<16xf32> to vector<16x1xf32>
        %cst_84 = arith.constant 3.200000e+01 : f32
        %205 = vector.broadcast %cst_84 : f32 to vector<16x1xf32>
        %206 = arith.divf %204, %205 : vector<16x1xf32>
        %cst_85 = arith.constant 9.99999974E-6 : f32
        %207 = vector.broadcast %cst_85 : f32 to vector<16x1xf32>
        %208 = arith.addf %206, %207 : vector<16x1xf32>
        %209 = math.rsqrt %208 : vector<16x1xf32>
        %210 = vector.broadcast %209 : vector<16x1xf32> to vector<16x32xf32>
        %211 = arith.mulf %201, %210 : vector<16x32xf32>
        %212 = vector.broadcast %194 : vector<1x32xf32> to vector<16x32xf32>
        %213 = arith.mulf %211, %212 : vector<16x32xf32>
        %214 = vector.broadcast %195 : vector<1x32xf32> to vector<16x32xf32>
        %215 = arith.addf %213, %214 : vector<16x32xf32>
        %c0_86 = arith.constant 0 : index
        %c0_87 = arith.constant 0 : index
        %216 = vector.load %arg13[%c0_86, %c0_87] : memref<16x32xf32, #tpu.memory_space<vmem>>, vector<16x32xf32>
        tpu.vector_store %arg13[%c0_86, %c0_87], %215 {strides = array<i32>} : memref<16x32xf32, #tpu.memory_space<vmem>>, vector<16x32xf32>,
      } else {
      }
    } else {
    }
    %c2_i32_16 = arith.constant 2 : i32
    %20 = arith.cmpi sge, %arg0, %c2_i32_16 : i32
    %21 = arith.extui %20 : i1 to i32
    %c0_i32_17 = arith.constant 0 : i32
    %22 = arith.cmpi ne, %21, %c0_i32_17 : i32
    scf.if %22 {
      %c2_i32_18 = arith.constant 2 : i32
      %23 = arith.cmpi eq, %arg0, %c2_i32_18 : i32
      %24 = arith.extui %23 : i1 to i32
      %c0_i32_19 = arith.constant 0 : i32
      %25 = arith.cmpi ne, %24, %c0_i32_19 : i32
      scf.if %25 {
        %c0_135 = arith.constant 0 : index
        %c0_136 = arith.constant 0 : index
        %335 = vector.load %arg2[%c0_135, %c0_136] : memref<16x32xf32, #tpu.memory_space<vmem>>, vector<16x32xf32>
        %c0_137 = arith.constant 0 : index
        %c0_138 = arith.constant 0 : index
        %336 = vector.load %arg14[%c0_137, %c0_138] : memref<16x32xf32, #tpu.memory_space<vmem>>, vector<16x32xf32>
        tpu.vector_store %arg14[%c0_137, %c0_138], %335 {strides = array<i32>} : memref<16x32xf32, #tpu.memory_space<vmem>>, vector<16x32xf32>,
      } else {
      }
      %c0_20 = arith.constant 0 : index
      %c0_21 = arith.constant 0 : index
      %26 = vector.load %arg14[%c0_20, %c0_21] : memref<16x32xf32, #tpu.memory_space<vmem>>, vector<16x32xf32>
      %c0_22 = arith.constant 0 : index
      %c0_23 = arith.constant 0 : index
      %27 = vector.load %arg13[%c0_22, %c0_23] : memref<16x32xf32, #tpu.memory_space<vmem>>, vector<16x32xf32>
      %28 = tpu.iota {dimensions = array<i32: 0>} : vector<16x16xi32>
      %29 = tpu.iota {dimensions = array<i32: 1>} : vector<16x16xi32>
      %false = arith.constant false
      %30 = vector.broadcast %false : i1 to vector<16x16xi1>
      %c0_i32_24 = arith.constant 0 : i32
      %31 = vector.broadcast %c0_i32_24 : i32 to vector<16x16xi32>
      %32 = arith.cmpi sge, %28, %31 : vector<16x16xi32>
      %c8_i32 = arith.constant 8 : i32
      %33 = vector.broadcast %c8_i32 : i32 to vector<16x16xi32>
      %34 = arith.cmpi slt, %28, %33 : vector<16x16xi32>
      %35 = arith.andi %32, %34 : vector<16x16xi1>
      %c0_i32_25 = arith.constant 0 : i32
      %36 = vector.broadcast %c0_i32_25 : i32 to vector<16x16xi32>
      %37 = arith.cmpi sge, %29, %36 : vector<16x16xi32>
      %c8_i32_26 = arith.constant 8 : i32
      %38 = vector.broadcast %c8_i32_26 : i32 to vector<16x16xi32>
      %39 = arith.cmpi slt, %29, %38 : vector<16x16xi32>
      %40 = arith.andi %37, %39 : vector<16x16xi1>
      %41 = arith.andi %35, %40 : vector<16x16xi1>
      %42 = arith.ori %30, %41 : vector<16x16xi1>
      %c8_i32_27 = arith.constant 8 : i32
      %43 = vector.broadcast %c8_i32_27 : i32 to vector<16x16xi32>
      %44 = arith.cmpi sge, %28, %43 : vector<16x16xi32>
      %c16_i32 = arith.constant 16 : i32
      %45 = vector.broadcast %c16_i32 : i32 to vector<16x16xi32>
      %46 = arith.cmpi slt, %28, %45 : vector<16x16xi32>
      %47 = arith.andi %44, %46 : vector<16x16xi1>
      %c8_i32_28 = arith.constant 8 : i32
      %48 = vector.broadcast %c8_i32_28 : i32 to vector<16x16xi32>
      %49 = arith.cmpi sge, %29, %48 : vector<16x16xi32>
      %c16_i32_29 = arith.constant 16 : i32
      %50 = vector.broadcast %c16_i32_29 : i32 to vector<16x16xi32>
      %51 = arith.cmpi slt, %29, %50 : vector<16x16xi32>
      %52 = arith.andi %49, %51 : vector<16x16xi1>
      %53 = arith.andi %47, %52 : vector<16x16xi1>
      %54 = arith.ori %42, %53 : vector<16x16xi1>
      %cst = arith.constant 0.000000e+00 : f32
      %cst_30 = arith.constant -1.000000e+30 : f32
      %55 = vector.broadcast %cst : f32 to vector<16x16xf32>
      %56 = vector.broadcast %cst_30 : f32 to vector<16x16xf32>
      %57 = arith.select %54, %55, %56 : vector<16x16xi1>, vector<16x16xf32>
      %58 = tpu.iota {dimensions = array<i32: 0>} : vector<16x16xi32>
      %59 = tpu.iota {dimensions = array<i32: 1>} : vector<16x16xi32>
      %false_31 = arith.constant false
      %60 = vector.broadcast %false_31 : i1 to vector<16x16xi1>
      %c0_i32_32 = arith.constant 0 : i32
      %61 = vector.broadcast %c0_i32_32 : i32 to vector<16x16xi32>
      %62 = arith.cmpi sge, %58, %61 : vector<16x16xi32>
      %c8_i32_33 = arith.constant 8 : i32
      %63 = vector.broadcast %c8_i32_33 : i32 to vector<16x16xi32>
      %64 = arith.cmpi slt, %58, %63 : vector<16x16xi32>
      %65 = arith.andi %62, %64 : vector<16x16xi1>
      %c0_i32_34 = arith.constant 0 : i32
      %66 = vector.broadcast %c0_i32_34 : i32 to vector<16x16xi32>
      %67 = arith.cmpi sge, %59, %66 : vector<16x16xi32>
      %c8_i32_35 = arith.constant 8 : i32
      %68 = vector.broadcast %c8_i32_35 : i32 to vector<16x16xi32>
      %69 = arith.cmpi slt, %59, %68 : vector<16x16xi32>
      %70 = arith.andi %67, %69 : vector<16x16xi1>
      %71 = arith.andi %65, %70 : vector<16x16xi1>
      %72 = arith.ori %60, %71 : vector<16x16xi1>
      %c8_i32_36 = arith.constant 8 : i32
      %73 = vector.broadcast %c8_i32_36 : i32 to vector<16x16xi32>
      %74 = arith.cmpi sge, %58, %73 : vector<16x16xi32>
      %c16_i32_37 = arith.constant 16 : i32
      %75 = vector.broadcast %c16_i32_37 : i32 to vector<16x16xi32>
      %76 = arith.cmpi slt, %58, %75 : vector<16x16xi32>
      %77 = arith.andi %74, %76 : vector<16x16xi1>
      %c8_i32_38 = arith.constant 8 : i32
      %78 = vector.broadcast %c8_i32_38 : i32 to vector<16x16xi32>
      %79 = arith.cmpi sge, %59, %78 : vector<16x16xi32>
      %c16_i32_39 = arith.constant 16 : i32
      %80 = vector.broadcast %c16_i32_39 : i32 to vector<16x16xi32>
      %81 = arith.cmpi slt, %59, %80 : vector<16x16xi32>
      %82 = arith.andi %79, %81 : vector<16x16xi1>
      %83 = arith.andi %77, %82 : vector<16x16xi1>
      %84 = arith.ori %72, %83 : vector<16x16xi1>
      %cst_40 = arith.constant 0.000000e+00 : f32
      %cst_41 = arith.constant -1.000000e+30 : f32
      %85 = vector.broadcast %cst_40 : f32 to vector<16x16xf32>
      %86 = vector.broadcast %cst_41 : f32 to vector<16x16xf32>
      %87 = arith.select %84, %85, %86 : vector<16x16xi1>, vector<16x16xf32>
      %c0_42 = arith.constant 0 : index
      %c0_43 = arith.constant 0 : index
      %c0_44 = arith.constant 0 : index
      %88 = vector.load %arg3[%c0_42, %c0_43, %c0_44] : memref<1x32x96xf32, #tpu.memory_space<vmem>>, vector<1x32x96xf32>
      %89 = vector.shape_cast %88 : vector<1x32x96xf32> to vector<32x96xf32>
      %cst_45 = arith.constant dense<0.000000e+00> : vector<16x96xf32>
      %90 = tpu.matmul %26, %89, %cst_45 {dimension_numbers = #tpu.dot_dimension_numbers<[1], [0], [0], [1], [0, 0, 1, 1], [], []>} : vector<16x32xf32>, vector<32x96xf32>, vector<16x96xf32> -> vector<16x96xf32>
      %91 = vector.extract_strided_slice %90 {offsets = [0, 0], sizes = [16, 32], strides = [1, 1]} : vector<16x96xf32> to vector<16x32xf32>
      %92 = vector.extract_strided_slice %90 {offsets = [0, 32], sizes = [16, 32], strides = [1, 1]} : vector<16x96xf32> to vector<16x32xf32>
      %93 = vector.extract_strided_slice %90 {offsets = [0, 64], sizes = [16, 32], strides = [1, 1]} : vector<16x96xf32> to vector<16x32xf32>
      %c0_46 = arith.constant 0 : index
      %c0_47 = arith.constant 0 : index
      %c0_48 = arith.constant 0 : index
      %94 = vector.load %arg4[%c0_46, %c0_47, %c0_48] : memref<1x32x32xf32, #tpu.memory_space<vmem>>, vector<1x32x32xf32>
      %95 = vector.shape_cast %94 : vector<1x32x32xf32> to vector<32x32xf32>
      %96 = vector.extract_strided_slice %91 {offsets = [0, 0], sizes = [16, 8], strides = [1, 1]} : vector<16x32xf32> to vector<16x8xf32>
      %97 = vector.extract_strided_slice %92 {offsets = [0, 0], sizes = [16, 8], strides = [1, 1]} : vector<16x32xf32> to vector<16x8xf32>
      %98 = vector.extract_strided_slice %93 {offsets = [0, 0], sizes = [16, 8], strides = [1, 1]} : vector<16x32xf32> to vector<16x8xf32>
      %cst_49 = arith.constant dense<0.000000e+00> : vector<16x16xf32>
      %99 = tpu.matmul %96, %97, %cst_49 {dimension_numbers = #tpu.dot_dimension_numbers<[1], [1], [0], [0], [0, 0, 1, 0], [], []>} : vector<16x8xf32>, vector<16x8xf32>, vector<16x16xf32> -> vector<16x16xf32>
      %cst_50 = arith.constant 0.353553385 : f32
      %100 = vector.broadcast %cst_50 : f32 to vector<16x16xf32>
      %101 = arith.mulf %99, %100 : vector<16x16xf32>
      %102 = arith.addf %101, %57 : vector<16x16xf32>
      %cst_51 = arith.constant dense<0xFF800000> : vector<16xf32>
      %103 = vector.multi_reduction <maximumf>, %102, %cst_51 [1] : vector<16x16xf32> to vector<16xf32>
      %104 = vector.shape_cast %103 : vector<16xf32> to vector<16x1xf32>
      %105 = vector.broadcast %104 : vector<16x1xf32> to vector<16x16xf32>
      %106 = arith.subf %102, %105 : vector<16x16xf32>
      %107 = math.exp %106 : vector<16x16xf32>
      %cst_52 = arith.constant dense<0.000000e+00> : vector<16xf32>
      %108 = vector.multi_reduction <add>, %107, %cst_52 [1] : vector<16x16xf32> to vector<16xf32>
      %109 = vector.shape_cast %108 : vector<16xf32> to vector<16x1xf32>
      %110 = vector.broadcast %109 : vector<16x1xf32> to vector<16x16xf32>
      %111 = arith.divf %107, %110 : vector<16x16xf32>
      %cst_53 = arith.constant dense<0.000000e+00> : vector<16x8xf32>
      %112 = tpu.matmul %111, %98, %cst_53 {dimension_numbers = #tpu.dot_dimension_numbers<[1], [0], [0], [1], [0, 0, 1, 1], [], []>} : vector<16x16xf32>, vector<16x8xf32>, vector<16x8xf32> -> vector<16x8xf32>
      %113 = vector.extract_strided_slice %91 {offsets = [0, 8], sizes = [16, 8], strides = [1, 1]} : vector<16x32xf32> to vector<16x8xf32>
      %114 = vector.extract_strided_slice %92 {offsets = [0, 8], sizes = [16, 8], strides = [1, 1]} : vector<16x32xf32> to vector<16x8xf32>
      %115 = vector.extract_strided_slice %93 {offsets = [0, 8], sizes = [16, 8], strides = [1, 1]} : vector<16x32xf32> to vector<16x8xf32>
      %cst_54 = arith.constant dense<0.000000e+00> : vector<16x16xf32>
      %116 = tpu.matmul %113, %114, %cst_54 {dimension_numbers = #tpu.dot_dimension_numbers<[1], [1], [0], [0], [0, 0, 1, 0], [], []>} : vector<16x8xf32>, vector<16x8xf32>, vector<16x16xf32> -> vector<16x16xf32>
      %cst_55 = arith.constant 0.353553385 : f32
      %117 = vector.broadcast %cst_55 : f32 to vector<16x16xf32>
      %118 = arith.mulf %116, %117 : vector<16x16xf32>
      %119 = arith.addf %118, %57 : vector<16x16xf32>
      %cst_56 = arith.constant dense<0xFF800000> : vector<16xf32>
      %120 = vector.multi_reduction <maximumf>, %119, %cst_56 [1] : vector<16x16xf32> to vector<16xf32>
      %121 = vector.shape_cast %120 : vector<16xf32> to vector<16x1xf32>
      %122 = vector.broadcast %121 : vector<16x1xf32> to vector<16x16xf32>
      %123 = arith.subf %119, %122 : vector<16x16xf32>
      %124 = math.exp %123 : vector<16x16xf32>
      %cst_57 = arith.constant dense<0.000000e+00> : vector<16xf32>
      %125 = vector.multi_reduction <add>, %124, %cst_57 [1] : vector<16x16xf32> to vector<16xf32>
      %126 = vector.shape_cast %125 : vector<16xf32> to vector<16x1xf32>
      %127 = vector.broadcast %126 : vector<16x1xf32> to vector<16x16xf32>
      %128 = arith.divf %124, %127 : vector<16x16xf32>
      %cst_58 = arith.constant dense<0.000000e+00> : vector<16x8xf32>
      %129 = tpu.matmul %128, %115, %cst_58 {dimension_numbers = #tpu.dot_dimension_numbers<[1], [0], [0], [1], [0, 0, 1, 1], [], []>} : vector<16x16xf32>, vector<16x8xf32>, vector<16x8xf32> -> vector<16x8xf32>
      %130 = vector.extract_strided_slice %91 {offsets = [0, 16], sizes = [16, 8], strides = [1, 1]} : vector<16x32xf32> to vector<16x8xf32>
      %131 = vector.extract_strided_slice %92 {offsets = [0, 16], sizes = [16, 8], strides = [1, 1]} : vector<16x32xf32> to vector<16x8xf32>
      %132 = vector.extract_strided_slice %93 {offsets = [0, 16], sizes = [16, 8], strides = [1, 1]} : vector<16x32xf32> to vector<16x8xf32>
      %cst_59 = arith.constant dense<0.000000e+00> : vector<16x16xf32>
      %133 = tpu.matmul %130, %131, %cst_59 {dimension_numbers = #tpu.dot_dimension_numbers<[1], [1], [0], [0], [0, 0, 1, 0], [], []>} : vector<16x8xf32>, vector<16x8xf32>, vector<16x16xf32> -> vector<16x16xf32>
      %cst_60 = arith.constant 0.353553385 : f32
      %134 = vector.broadcast %cst_60 : f32 to vector<16x16xf32>
      %135 = arith.mulf %133, %134 : vector<16x16xf32>
      %136 = arith.addf %135, %57 : vector<16x16xf32>
      %cst_61 = arith.constant dense<0xFF800000> : vector<16xf32>
      %137 = vector.multi_reduction <maximumf>, %136, %cst_61 [1] : vector<16x16xf32> to vector<16xf32>
      %138 = vector.shape_cast %137 : vector<16xf32> to vector<16x1xf32>
      %139 = vector.broadcast %138 : vector<16x1xf32> to vector<16x16xf32>
      %140 = arith.subf %136, %139 : vector<16x16xf32>
      %141 = math.exp %140 : vector<16x16xf32>
      %cst_62 = arith.constant dense<0.000000e+00> : vector<16xf32>
      %142 = vector.multi_reduction <add>, %141, %cst_62 [1] : vector<16x16xf32> to vector<16xf32>
      %143 = vector.shape_cast %142 : vector<16xf32> to vector<16x1xf32>
      %144 = vector.broadcast %143 : vector<16x1xf32> to vector<16x16xf32>
      %145 = arith.divf %141, %144 : vector<16x16xf32>
      %cst_63 = arith.constant dense<0.000000e+00> : vector<16x8xf32>
      %146 = tpu.matmul %145, %132, %cst_63 {dimension_numbers = #tpu.dot_dimension_numbers<[1], [0], [0], [1], [0, 0, 1, 1], [], []>} : vector<16x16xf32>, vector<16x8xf32>, vector<16x8xf32> -> vector<16x8xf32>
      %147 = vector.extract_strided_slice %91 {offsets = [0, 24], sizes = [16, 8], strides = [1, 1]} : vector<16x32xf32> to vector<16x8xf32>
      %148 = vector.extract_strided_slice %92 {offsets = [0, 24], sizes = [16, 8], strides = [1, 1]} : vector<16x32xf32> to vector<16x8xf32>
      %149 = vector.extract_strided_slice %93 {offsets = [0, 24], sizes = [16, 8], strides = [1, 1]} : vector<16x32xf32> to vector<16x8xf32>
      %cst_64 = arith.constant dense<0.000000e+00> : vector<16x16xf32>
      %150 = tpu.matmul %147, %148, %cst_64 {dimension_numbers = #tpu.dot_dimension_numbers<[1], [1], [0], [0], [0, 0, 1, 0], [], []>} : vector<16x8xf32>, vector<16x8xf32>, vector<16x16xf32> -> vector<16x16xf32>
      %cst_65 = arith.constant 0.353553385 : f32
      %151 = vector.broadcast %cst_65 : f32 to vector<16x16xf32>
      %152 = arith.mulf %150, %151 : vector<16x16xf32>
      %153 = arith.addf %152, %57 : vector<16x16xf32>
      %cst_66 = arith.constant dense<0xFF800000> : vector<16xf32>
      %154 = vector.multi_reduction <maximumf>, %153, %cst_66 [1] : vector<16x16xf32> to vector<16xf32>
      %155 = vector.shape_cast %154 : vector<16xf32> to vector<16x1xf32>
      %156 = vector.broadcast %155 : vector<16x1xf32> to vector<16x16xf32>
      %157 = arith.subf %153, %156 : vector<16x16xf32>
      %158 = math.exp %157 : vector<16x16xf32>
      %cst_67 = arith.constant dense<0.000000e+00> : vector<16xf32>
      %159 = vector.multi_reduction <add>, %158, %cst_67 [1] : vector<16x16xf32> to vector<16xf32>
      %160 = vector.shape_cast %159 : vector<16xf32> to vector<16x1xf32>
      %161 = vector.broadcast %160 : vector<16x1xf32> to vector<16x16xf32>
      %162 = arith.divf %158, %161 : vector<16x16xf32>
      %cst_68 = arith.constant dense<0.000000e+00> : vector<16x8xf32>
      %163 = tpu.matmul %162, %149, %cst_68 {dimension_numbers = #tpu.dot_dimension_numbers<[1], [0], [0], [1], [0, 0, 1, 1], [], []>} : vector<16x16xf32>, vector<16x8xf32>, vector<16x8xf32> -> vector<16x8xf32>
      %164 = tpu.concatenate %112, %129, %146, %163 in 1 : vector<16x8xf32>, vector<16x8xf32>, vector<16x8xf32>, vector<16x8xf32> -> vector<16x32xf32>
      %cst_69 = arith.constant dense<0.000000e+00> : vector<16x32xf32>
      %165 = tpu.matmul %164, %95, %cst_69 {dimension_numbers = #tpu.dot_dimension_numbers<[1], [0], [0], [1], [0, 0, 1, 1], [], []>} : vector<16x32xf32>, vector<32x32xf32>, vector<16x32xf32> -> vector<16x32xf32>
      %166 = vector.broadcast %1 : vector<1x32xf32> to vector<16x32xf32>
      %167 = arith.addf %165, %166 : vector<16x32xf32>
      %168 = arith.addf %167, %26 : vector<16x32xf32>
      %cst_70 = arith.constant dense<0.000000e+00> : vector<16xf32>
      %169 = vector.multi_reduction <add>, %168, %cst_70 [1] : vector<16x32xf32> to vector<16xf32>
      %170 = vector.shape_cast %169 : vector<16xf32> to vector<16x1xf32>
      %cst_71 = arith.constant 3.200000e+01 : f32
      %171 = vector.broadcast %cst_71 : f32 to vector<16x1xf32>
      %172 = arith.divf %170, %171 : vector<16x1xf32>
      %173 = vector.broadcast %172 : vector<16x1xf32> to vector<16x32xf32>
      %174 = arith.subf %168, %173 : vector<16x32xf32>
      %175 = arith.mulf %174, %174 : vector<16x32xf32>
      %cst_72 = arith.constant dense<0.000000e+00> : vector<16xf32>
      %176 = vector.multi_reduction <add>, %175, %cst_72 [1] : vector<16x32xf32> to vector<16xf32>
      %177 = vector.shape_cast %176 : vector<16xf32> to vector<16x1xf32>
      %cst_73 = arith.constant 3.200000e+01 : f32
      %178 = vector.broadcast %cst_73 : f32 to vector<16x1xf32>
      %179 = arith.divf %177, %178 : vector<16x1xf32>
      %cst_74 = arith.constant 9.99999974E-6 : f32
      %180 = vector.broadcast %cst_74 : f32 to vector<16x1xf32>
      %181 = arith.addf %179, %180 : vector<16x1xf32>
      %182 = math.rsqrt %181 : vector<16x1xf32>
      %183 = vector.broadcast %182 : vector<16x1xf32> to vector<16x32xf32>
      %184 = arith.mulf %174, %183 : vector<16x32xf32>
      %185 = vector.broadcast %3 : vector<1x32xf32> to vector<16x32xf32>
      %186 = arith.mulf %184, %185 : vector<16x32xf32>
      %187 = vector.broadcast %5 : vector<1x32xf32> to vector<16x32xf32>
      %188 = arith.addf %186, %187 : vector<16x32xf32>
      %c0_75 = arith.constant 0 : index
      %c0_76 = arith.constant 0 : index
      %c0_77 = arith.constant 0 : index
      %189 = vector.load %arg5[%c0_75, %c0_76, %c0_77] : memref<1x32x32xf32, #tpu.memory_space<vmem>>, vector<1x32x32xf32>
      %190 = vector.shape_cast %189 : vector<1x32x32xf32> to vector<32x32xf32>
      %cst_78 = arith.constant dense<0.000000e+00> : vector<16x32xf32>
      %191 = tpu.matmul %188, %190, %cst_78 {dimension_numbers = #tpu.dot_dimension_numbers<[1], [0], [0], [1], [0, 0, 1, 1], [], []>} : vector<16x32xf32>, vector<32x32xf32>, vector<16x32xf32> -> vector<16x32xf32>
      %c0_79 = arith.constant 0 : index
      %c0_80 = arith.constant 0 : index
      %c0_81 = arith.constant 0 : index
      %192 = vector.load %arg6[%c0_79, %c0_80, %c0_81] : memref<1x32x64xf32, #tpu.memory_space<vmem>>, vector<1x32x64xf32>
      %193 = vector.shape_cast %192 : vector<1x32x64xf32> to vector<32x64xf32>
      %cst_82 = arith.constant dense<0.000000e+00> : vector<16x64xf32>
      %194 = tpu.matmul %27, %193, %cst_82 {dimension_numbers = #tpu.dot_dimension_numbers<[1], [0], [0], [1], [0, 0, 1, 1], [], []>} : vector<16x32xf32>, vector<32x64xf32>, vector<16x64xf32> -> vector<16x64xf32>
      %195 = vector.extract_strided_slice %194 {offsets = [0, 0], sizes = [16, 32], strides = [1, 1]} : vector<16x64xf32> to vector<16x32xf32>
      %196 = vector.extract_strided_slice %194 {offsets = [0, 32], sizes = [16, 32], strides = [1, 1]} : vector<16x64xf32> to vector<16x32xf32>
      %c0_83 = arith.constant 0 : index
      %c0_84 = arith.constant 0 : index
      %c0_85 = arith.constant 0 : index
      %197 = vector.load %arg7[%c0_83, %c0_84, %c0_85] : memref<1x32x32xf32, #tpu.memory_space<vmem>>, vector<1x32x32xf32>
      %198 = vector.shape_cast %197 : vector<1x32x32xf32> to vector<32x32xf32>
      %c0_86 = arith.constant 0 : index
      %c3 = arith.constant 3 : index
      %c0_87 = arith.constant 0 : index
      %199 = vector.load %arg10[%c0_86, %c3, %c0_87] : memref<1x16x64xf32, #tpu.memory_space<vmem>>, vector<1x1x32xf32>
      %200 = vector.shape_cast %199 : vector<1x1x32xf32> to vector<1x32xf32>
      %201 = vector.extract_strided_slice %191 {offsets = [0, 0], sizes = [16, 8], strides = [1, 1]} : vector<16x32xf32> to vector<16x8xf32>
      %202 = vector.extract_strided_slice %195 {offsets = [0, 0], sizes = [16, 8], strides = [1, 1]} : vector<16x32xf32> to vector<16x8xf32>
      %203 = vector.extract_strided_slice %196 {offsets = [0, 0], sizes = [16, 8], strides = [1, 1]} : vector<16x32xf32> to vector<16x8xf32>
      %cst_88 = arith.constant dense<0.000000e+00> : vector<16x16xf32>
      %204 = tpu.matmul %201, %202, %cst_88 {dimension_numbers = #tpu.dot_dimension_numbers<[1], [1], [0], [0], [0, 0, 1, 0], [], []>} : vector<16x8xf32>, vector<16x8xf32>, vector<16x16xf32> -> vector<16x16xf32>
      %cst_89 = arith.constant 0.353553385 : f32
      %205 = vector.broadcast %cst_89 : f32 to vector<16x16xf32>
      %206 = arith.mulf %204, %205 : vector<16x16xf32>
      %207 = arith.addf %206, %87 : vector<16x16xf32>
      %cst_90 = arith.constant dense<0xFF800000> : vector<16xf32>
      %208 = vector.multi_reduction <maximumf>, %207, %cst_90 [1] : vector<16x16xf32> to vector<16xf32>
      %209 = vector.shape_cast %208 : vector<16xf32> to vector<16x1xf32>
      %210 = vector.broadcast %209 : vector<16x1xf32> to vector<16x16xf32>
      %211 = arith.subf %207, %210 : vector<16x16xf32>
      %212 = math.exp %211 : vector<16x16xf32>
      %cst_91 = arith.constant dense<0.000000e+00> : vector<16xf32>
      %213 = vector.multi_reduction <add>, %212, %cst_91 [1] : vector<16x16xf32> to vector<16xf32>
      %214 = vector.shape_cast %213 : vector<16xf32> to vector<16x1xf32>
      %215 = vector.broadcast %214 : vector<16x1xf32> to vector<16x16xf32>
      %216 = arith.divf %212, %215 : vector<16x16xf32>
      %cst_92 = arith.constant dense<0.000000e+00> : vector<16x8xf32>
      %217 = tpu.matmul %216, %203, %cst_92 {dimension_numbers = #tpu.dot_dimension_numbers<[1], [0], [0], [1], [0, 0, 1, 1], [], []>} : vector<16x16xf32>, vector<16x8xf32>, vector<16x8xf32> -> vector<16x8xf32>
      %218 = vector.extract_strided_slice %191 {offsets = [0, 8], sizes = [16, 8], strides = [1, 1]} : vector<16x32xf32> to vector<16x8xf32>
      %219 = vector.extract_strided_slice %195 {offsets = [0, 8], sizes = [16, 8], strides = [1, 1]} : vector<16x32xf32> to vector<16x8xf32>
      %220 = vector.extract_strided_slice %196 {offsets = [0, 8], sizes = [16, 8], strides = [1, 1]} : vector<16x32xf32> to vector<16x8xf32>
      %cst_93 = arith.constant dense<0.000000e+00> : vector<16x16xf32>
      %221 = tpu.matmul %218, %219, %cst_93 {dimension_numbers = #tpu.dot_dimension_numbers<[1], [1], [0], [0], [0, 0, 1, 0], [], []>} : vector<16x8xf32>, vector<16x8xf32>, vector<16x16xf32> -> vector<16x16xf32>
      %cst_94 = arith.constant 0.353553385 : f32
      %222 = vector.broadcast %cst_94 : f32 to vector<16x16xf32>
      %223 = arith.mulf %221, %222 : vector<16x16xf32>
      %224 = arith.addf %223, %87 : vector<16x16xf32>
      %cst_95 = arith.constant dense<0xFF800000> : vector<16xf32>
      %225 = vector.multi_reduction <maximumf>, %224, %cst_95 [1] : vector<16x16xf32> to vector<16xf32>
      %226 = vector.shape_cast %225 : vector<16xf32> to vector<16x1xf32>
      %227 = vector.broadcast %226 : vector<16x1xf32> to vector<16x16xf32>
      %228 = arith.subf %224, %227 : vector<16x16xf32>
      %229 = math.exp %228 : vector<16x16xf32>
      %cst_96 = arith.constant dense<0.000000e+00> : vector<16xf32>
      %230 = vector.multi_reduction <add>, %229, %cst_96 [1] : vector<16x16xf32> to vector<16xf32>
      %231 = vector.shape_cast %230 : vector<16xf32> to vector<16x1xf32>
      %232 = vector.broadcast %231 : vector<16x1xf32> to vector<16x16xf32>
      %233 = arith.divf %229, %232 : vector<16x16xf32>
      %cst_97 = arith.constant dense<0.000000e+00> : vector<16x8xf32>
      %234 = tpu.matmul %233, %220, %cst_97 {dimension_numbers = #tpu.dot_dimension_numbers<[1], [0], [0], [1], [0, 0, 1, 1], [], []>} : vector<16x16xf32>, vector<16x8xf32>, vector<16x8xf32> -> vector<16x8xf32>
      %235 = vector.extract_strided_slice %191 {offsets = [0, 16], sizes = [16, 8], strides = [1, 1]} : vector<16x32xf32> to vector<16x8xf32>
      %236 = vector.extract_strided_slice %195 {offsets = [0, 16], sizes = [16, 8], strides = [1, 1]} : vector<16x32xf32> to vector<16x8xf32>
      %237 = vector.extract_strided_slice %196 {offsets = [0, 16], sizes = [16, 8], strides = [1, 1]} : vector<16x32xf32> to vector<16x8xf32>
      %cst_98 = arith.constant dense<0.000000e+00> : vector<16x16xf32>
      %238 = tpu.matmul %235, %236, %cst_98 {dimension_numbers = #tpu.dot_dimension_numbers<[1], [1], [0], [0], [0, 0, 1, 0], [], []>} : vector<16x8xf32>, vector<16x8xf32>, vector<16x16xf32> -> vector<16x16xf32>
      %cst_99 = arith.constant 0.353553385 : f32
      %239 = vector.broadcast %cst_99 : f32 to vector<16x16xf32>
      %240 = arith.mulf %238, %239 : vector<16x16xf32>
      %241 = arith.addf %240, %87 : vector<16x16xf32>
      %cst_100 = arith.constant dense<0xFF800000> : vector<16xf32>
      %242 = vector.multi_reduction <maximumf>, %241, %cst_100 [1] : vector<16x16xf32> to vector<16xf32>
      %243 = vector.shape_cast %242 : vector<16xf32> to vector<16x1xf32>
      %244 = vector.broadcast %243 : vector<16x1xf32> to vector<16x16xf32>
      %245 = arith.subf %241, %244 : vector<16x16xf32>
      %246 = math.exp %245 : vector<16x16xf32>
      %cst_101 = arith.constant dense<0.000000e+00> : vector<16xf32>
      %247 = vector.multi_reduction <add>, %246, %cst_101 [1] : vector<16x16xf32> to vector<16xf32>
      %248 = vector.shape_cast %247 : vector<16xf32> to vector<16x1xf32>
      %249 = vector.broadcast %248 : vector<16x1xf32> to vector<16x16xf32>
      %250 = arith.divf %246, %249 : vector<16x16xf32>
      %cst_102 = arith.constant dense<0.000000e+00> : vector<16x8xf32>
      %251 = tpu.matmul %250, %237, %cst_102 {dimension_numbers = #tpu.dot_dimension_numbers<[1], [0], [0], [1], [0, 0, 1, 1], [], []>} : vector<16x16xf32>, vector<16x8xf32>, vector<16x8xf32> -> vector<16x8xf32>
      %252 = vector.extract_strided_slice %191 {offsets = [0, 24], sizes = [16, 8], strides = [1, 1]} : vector<16x32xf32> to vector<16x8xf32>
      %253 = vector.extract_strided_slice %195 {offsets = [0, 24], sizes = [16, 8], strides = [1, 1]} : vector<16x32xf32> to vector<16x8xf32>
      %254 = vector.extract_strided_slice %196 {offsets = [0, 24], sizes = [16, 8], strides = [1, 1]} : vector<16x32xf32> to vector<16x8xf32>
      %cst_103 = arith.constant dense<0.000000e+00> : vector<16x16xf32>
      %255 = tpu.matmul %252, %253, %cst_103 {dimension_numbers = #tpu.dot_dimension_numbers<[1], [1], [0], [0], [0, 0, 1, 0], [], []>} : vector<16x8xf32>, vector<16x8xf32>, vector<16x16xf32> -> vector<16x16xf32>
      %cst_104 = arith.constant 0.353553385 : f32
      %256 = vector.broadcast %cst_104 : f32 to vector<16x16xf32>
      %257 = arith.mulf %255, %256 : vector<16x16xf32>
      %258 = arith.addf %257, %87 : vector<16x16xf32>
      %cst_105 = arith.constant dense<0xFF800000> : vector<16xf32>
      %259 = vector.multi_reduction <maximumf>, %258, %cst_105 [1] : vector<16x16xf32> to vector<16xf32>
      %260 = vector.shape_cast %259 : vector<16xf32> to vector<16x1xf32>
      %261 = vector.broadcast %260 : vector<16x1xf32> to vector<16x16xf32>
      %262 = arith.subf %258, %261 : vector<16x16xf32>
      %263 = math.exp %262 : vector<16x16xf32>
      %cst_106 = arith.constant dense<0.000000e+00> : vector<16xf32>
      %264 = vector.multi_reduction <add>, %263, %cst_106 [1] : vector<16x16xf32> to vector<16xf32>
      %265 = vector.shape_cast %264 : vector<16xf32> to vector<16x1xf32>
      %266 = vector.broadcast %265 : vector<16x1xf32> to vector<16x16xf32>
      %267 = arith.divf %263, %266 : vector<16x16xf32>
      %cst_107 = arith.constant dense<0.000000e+00> : vector<16x8xf32>
      %268 = tpu.matmul %267, %254, %cst_107 {dimension_numbers = #tpu.dot_dimension_numbers<[1], [0], [0], [1], [0, 0, 1, 1], [], []>} : vector<16x16xf32>, vector<16x8xf32>, vector<16x8xf32> -> vector<16x8xf32>
      %269 = tpu.concatenate %217, %234, %251, %268 in 1 : vector<16x8xf32>, vector<16x8xf32>, vector<16x8xf32>, vector<16x8xf32> -> vector<16x32xf32>
      %cst_108 = arith.constant dense<0.000000e+00> : vector<16x32xf32>
      %270 = tpu.matmul %269, %198, %cst_108 {dimension_numbers = #tpu.dot_dimension_numbers<[1], [0], [0], [1], [0, 0, 1, 1], [], []>} : vector<16x32xf32>, vector<32x32xf32>, vector<16x32xf32> -> vector<16x32xf32>
      %271 = vector.broadcast %200 : vector<1x32xf32> to vector<16x32xf32>
      %272 = arith.addf %270, %271 : vector<16x32xf32>
      %273 = arith.addf %272, %188 : vector<16x32xf32>
      %c0_109 = arith.constant 0 : index
      %c4 = arith.constant 4 : index
      %c0_110 = arith.constant 0 : index
      %274 = vector.load %arg10[%c0_109, %c4, %c0_110] : memref<1x16x64xf32, #tpu.memory_space<vmem>>, vector<1x1x32xf32>
      %275 = vector.shape_cast %274 : vector<1x1x32xf32> to vector<1x32xf32>
      %c0_111 = arith.constant 0 : index
      %c5 = arith.constant 5 : index
      %c0_112 = arith.constant 0 : index
      %276 = vector.load %arg10[%c0_111, %c5, %c0_112] : memref<1x16x64xf32, #tpu.memory_space<vmem>>, vector<1x1x32xf32>
      %277 = vector.shape_cast %276 : vector<1x1x32xf32> to vector<1x32xf32>
      %cst_113 = arith.constant dense<0.000000e+00> : vector<16xf32>
      %278 = vector.multi_reduction <add>, %273, %cst_113 [1] : vector<16x32xf32> to vector<16xf32>
      %279 = vector.shape_cast %278 : vector<16xf32> to vector<16x1xf32>
      %cst_114 = arith.constant 3.200000e+01 : f32
      %280 = vector.broadcast %cst_114 : f32 to vector<16x1xf32>
      %281 = arith.divf %279, %280 : vector<16x1xf32>
      %282 = vector.broadcast %281 : vector<16x1xf32> to vector<16x32xf32>
      %283 = arith.subf %273, %282 : vector<16x32xf32>
      %284 = arith.mulf %283, %283 : vector<16x32xf32>
      %cst_115 = arith.constant dense<0.000000e+00> : vector<16xf32>
      %285 = vector.multi_reduction <add>, %284, %cst_115 [1] : vector<16x32xf32> to vector<16xf32>
      %286 = vector.shape_cast %285 : vector<16xf32> to vector<16x1xf32>
      %cst_116 = arith.constant 3.200000e+01 : f32
      %287 = vector.broadcast %cst_116 : f32 to vector<16x1xf32>
      %288 = arith.divf %286, %287 : vector<16x1xf32>
      %cst_117 = arith.constant 9.99999974E-6 : f32
      %289 = vector.broadcast %cst_117 : f32 to vector<16x1xf32>
      %290 = arith.addf %288, %289 : vector<16x1xf32>
      %291 = math.rsqrt %290 : vector<16x1xf32>
      %292 = vector.broadcast %291 : vector<16x1xf32> to vector<16x32xf32>
      %293 = arith.mulf %283, %292 : vector<16x32xf32>
      %294 = vector.broadcast %275 : vector<1x32xf32> to vector<16x32xf32>
      %295 = arith.mulf %293, %294 : vector<16x32xf32>
      %296 = vector.broadcast %277 : vector<1x32xf32> to vector<16x32xf32>
      %297 = arith.addf %295, %296 : vector<16x32xf32>
      %c0_118 = arith.constant 0 : index
      %c0_119 = arith.constant 0 : index
      %c0_120 = arith.constant 0 : index
      %298 = vector.load %arg8[%c0_118, %c0_119, %c0_120] : memref<1x32x64xf32, #tpu.memory_space<vmem>>, vector<1x32x64xf32>
      %299 = vector.shape_cast %298 : vector<1x32x64xf32> to vector<32x64xf32>
      %c0_121 = arith.constant 0 : index
      %c0_122 = arith.constant 0 : index
      %c0_123 = arith.constant 0 : index
      %300 = vector.load %arg9[%c0_121, %c0_122, %c0_123] : memref<1x64x32xf32, #tpu.memory_space<vmem>>, vector<1x64x32xf32>
      %301 = vector.shape_cast %300 : vector<1x64x32xf32> to vector<64x32xf32>
      %cst_124 = arith.constant dense<0.000000e+00> : vector<16x64xf32>
      %302 = tpu.matmul %297, %299, %cst_124 {dimension_numbers = #tpu.dot_dimension_numbers<[1], [0], [0], [1], [0, 0, 1, 1], [], []>} : vector<16x32xf32>, vector<32x64xf32>, vector<16x64xf32> -> vector<16x64xf32>
      %303 = vector.broadcast %7 : vector<1x64xf32> to vector<16x64xf32>
      %304 = arith.addf %302, %303 : vector<16x64xf32>
      %cst_125 = arith.constant 0.000000e+00 : f32
      %305 = vector.broadcast %cst_125 : f32 to vector<16x64xf32>
      %306 = arith.maximumf %304, %305 : vector<16x64xf32>
      %cst_126 = arith.constant dense<0.000000e+00> : vector<16x32xf32>
      %307 = tpu.matmul %306, %301, %cst_126 {dimension_numbers = #tpu.dot_dimension_numbers<[1], [0], [0], [1], [0, 0, 1, 1], [], []>} : vector<16x64xf32>, vector<64x32xf32>, vector<16x32xf32> -> vector<16x32xf32>
      %308 = vector.broadcast %9 : vector<1x32xf32> to vector<16x32xf32>
      %309 = arith.addf %307, %308 : vector<16x32xf32>
      %310 = arith.addf %309, %297 : vector<16x32xf32>
      %cst_127 = arith.constant dense<0.000000e+00> : vector<16xf32>
      %311 = vector.multi_reduction <add>, %310, %cst_127 [1] : vector<16x32xf32> to vector<16xf32>
      %312 = vector.shape_cast %311 : vector<16xf32> to vector<16x1xf32>
      %cst_128 = arith.constant 3.200000e+01 : f32
      %313 = vector.broadcast %cst_128 : f32 to vector<16x1xf32>
      %314 = arith.divf %312, %313 : vector<16x1xf32>
      %315 = vector.broadcast %314 : vector<16x1xf32> to vector<16x32xf32>
      %316 = arith.subf %310, %315 : vector<16x32xf32>
      %317 = arith.mulf %316, %316 : vector<16x32xf32>
      %cst_129 = arith.constant dense<0.000000e+00> : vector<16xf32>
      %318 = vector.multi_reduction <add>, %317, %cst_129 [1] : vector<16x32xf32> to vector<16xf32>
      %319 = vector.shape_cast %318 : vector<16xf32> to vector<16x1xf32>
      %cst_130 = arith.constant 3.200000e+01 : f32
      %320 = vector.broadcast %cst_130 : f32 to vector<16x1xf32>
      %321 = arith.divf %319, %320 : vector<16x1xf32>
      %cst_131 = arith.constant 9.99999974E-6 : f32
      %322 = vector.broadcast %cst_131 : f32 to vector<16x1xf32>
      %323 = arith.addf %321, %322 : vector<16x1xf32>
      %324 = math.rsqrt %323 : vector<16x1xf32>
      %325 = vector.broadcast %324 : vector<16x1xf32> to vector<16x32xf32>
      %326 = arith.mulf %316, %325 : vector<16x32xf32>
      %327 = vector.broadcast %11 : vector<1x32xf32> to vector<16x32xf32>
      %328 = arith.mulf %326, %327 : vector<16x32xf32>
      %329 = vector.broadcast %13 : vector<1x32xf32> to vector<16x32xf32>
      %330 = arith.addf %328, %329 : vector<16x32xf32>
      %c0_132 = arith.constant 0 : index
      %c0_133 = arith.constant 0 : index
      %331 = vector.load %arg14[%c0_132, %c0_133] : memref<16x32xf32, #tpu.memory_space<vmem>>, vector<16x32xf32>
      tpu.vector_store %arg14[%c0_132, %c0_133], %330 {strides = array<i32>} : memref<16x32xf32, #tpu.memory_space<vmem>>, vector<16x32xf32>,
      %c3_i32 = arith.constant 3 : i32
      %332 = arith.cmpi eq, %arg0, %c3_i32 : i32
      %333 = arith.extui %332 : i1 to i32
      %c0_i32_134 = arith.constant 0 : i32
      %334 = arith.cmpi ne, %333, %c0_i32_134 : i32
      scf.if %334 {
        %c2_135 = arith.constant 2 : index
        %c0_136 = arith.constant 0 : index
        %335 = vector.load %arg11[%c2_135, %c0_136] : memref<4x32xf32, #tpu.memory_space<vmem>>, vector<1x32xf32>
        %c3_137 = arith.constant 3 : index
        %c0_138 = arith.constant 0 : index
        %336 = vector.load %arg11[%c3_137, %c0_138] : memref<4x32xf32, #tpu.memory_space<vmem>>, vector<1x32xf32>
        %cst_139 = arith.constant dense<0.000000e+00> : vector<16xf32>
        %337 = vector.multi_reduction <add>, %330, %cst_139 [1] : vector<16x32xf32> to vector<16xf32>
        %338 = vector.shape_cast %337 : vector<16xf32> to vector<16x1xf32>
        %cst_140 = arith.constant 3.200000e+01 : f32
        %339 = vector.broadcast %cst_140 : f32 to vector<16x1xf32>
        %340 = arith.divf %338, %339 : vector<16x1xf32>
        %341 = vector.broadcast %340 : vector<16x1xf32> to vector<16x32xf32>
        %342 = arith.subf %330, %341 : vector<16x32xf32>
        %343 = arith.mulf %342, %342 : vector<16x32xf32>
        %cst_141 = arith.constant dense<0.000000e+00> : vector<16xf32>
        %344 = vector.multi_reduction <add>, %343, %cst_141 [1] : vector<16x32xf32> to vector<16xf32>
        %345 = vector.shape_cast %344 : vector<16xf32> to vector<16x1xf32>
        %cst_142 = arith.constant 3.200000e+01 : f32
        %346 = vector.broadcast %cst_142 : f32 to vector<16x1xf32>
        %347 = arith.divf %345, %346 : vector<16x1xf32>
        %cst_143 = arith.constant 9.99999974E-6 : f32
        %348 = vector.broadcast %cst_143 : f32 to vector<16x1xf32>
        %349 = arith.addf %347, %348 : vector<16x1xf32>
        %350 = math.rsqrt %349 : vector<16x1xf32>
        %351 = vector.broadcast %350 : vector<16x1xf32> to vector<16x32xf32>
        %352 = arith.mulf %342, %351 : vector<16x32xf32>
        %353 = vector.broadcast %335 : vector<1x32xf32> to vector<16x32xf32>
        %354 = arith.mulf %352, %353 : vector<16x32xf32>
        %355 = vector.broadcast %336 : vector<1x32xf32> to vector<16x32xf32>
        %356 = arith.addf %354, %355 : vector<16x32xf32>
        %c0_144 = arith.constant 0 : index
        %c0_145 = arith.constant 0 : index
        %357 = vector.load %arg12[%c0_144, %c0_145] : memref<16x32xf32, #tpu.memory_space<vmem>>, vector<16x32xf32>
        tpu.vector_store %arg12[%c0_144, %c0_145], %356 {strides = array<i32>} : memref<16x32xf32, #tpu.memory_space<vmem>>, vector<16x32xf32>,
      } else {
      }
    } else {
    }
    return
  }
  func.func @transform_0(%arg0: i32) -> (i32, i32) {
    %c0_i32 = arith.constant 0 : i32
    %c0_i32_0 = arith.constant 0 : i32
    %c0_i32_1 = arith.constant 0 : i32
    return %c0_i32, %c0_i32_0 : i32, i32
  }
  func.func @transform_1(%arg0: i32) -> (i32, i32) {
    %c0_i32 = arith.constant 0 : i32
    %c0_i32_0 = arith.constant 0 : i32
    %c0_i32_1 = arith.constant 0 : i32
    return %c0_i32, %c0_i32_0 : i32, i32
  }
  func.func @transform_2(%arg0: i32) -> (i32, i32, i32) {
    %c0_i32 = arith.constant 0 : i32
    %c0_i32_0 = arith.constant 0 : i32
    %c0_i32_1 = arith.constant 0 : i32
    return %arg0, %c0_i32, %c0_i32_0 : i32, i32, i32
  }
  func.func @transform_3(%arg0: i32) -> (i32, i32, i32) {
    %c0_i32 = arith.constant 0 : i32
    %c0_i32_0 = arith.constant 0 : i32
    %c0_i32_1 = arith.constant 0 : i32
    return %arg0, %c0_i32, %c0_i32_0 : i32, i32, i32
  }
  func.func @transform_4(%arg0: i32) -> (i32, i32, i32) {
    %c0_i32 = arith.constant 0 : i32
    %c0_i32_0 = arith.constant 0 : i32
    %c0_i32_1 = arith.constant 0 : i32
    return %arg0, %c0_i32, %c0_i32_0 : i32, i32, i32
  }
  func.func @transform_5(%arg0: i32) -> (i32, i32, i32) {
    %c0_i32 = arith.constant 0 : i32
    %c0_i32_0 = arith.constant 0 : i32
    %c0_i32_1 = arith.constant 0 : i32
    return %arg0, %c0_i32, %c0_i32_0 : i32, i32, i32
  }
  func.func @transform_6(%arg0: i32) -> (i32, i32, i32) {
    %c0_i32 = arith.constant 0 : i32
    %c0_i32_0 = arith.constant 0 : i32
    %c0_i32_1 = arith.constant 0 : i32
    return %arg0, %c0_i32, %c0_i32_0 : i32, i32, i32
  }
  func.func @transform_7(%arg0: i32) -> (i32, i32, i32) {
    %c0_i32 = arith.constant 0 : i32
    %c0_i32_0 = arith.constant 0 : i32
    %c0_i32_1 = arith.constant 0 : i32
    return %arg0, %c0_i32, %c0_i32_0 : i32, i32, i32
  }
  func.func @transform_8(%arg0: i32) -> (i32, i32, i32) {
    %c0_i32 = arith.constant 0 : i32
    %c0_i32_0 = arith.constant 0 : i32
    %c0_i32_1 = arith.constant 0 : i32
    return %arg0, %c0_i32, %c0_i32_0 : i32, i32, i32
  }
  func.func @transform_9(%arg0: i32) -> (i32, i32, i32) {
    %c0_i32 = arith.constant 0 : i32
    %c0_i32_0 = arith.constant 0 : i32
    %c0_i32_1 = arith.constant 0 : i32
    return %arg0, %c0_i32, %c0_i32_0 : i32, i32, i32
  }
  func.func @transform_10(%arg0: i32) -> (i32, i32) {
    %c0_i32 = arith.constant 0 : i32
    %c0_i32_0 = arith.constant 0 : i32
    %c0_i32_1 = arith.constant 0 : i32
    return %c0_i32, %c0_i32_0 : i32, i32
  }
  func.func @transform_11(%arg0: i32) -> (i32, i32) {
    %c0_i32 = arith.constant 0 : i32
    %c0_i32_0 = arith.constant 0 : i32
    %c0_i32_1 = arith.constant 0 : i32
    return %c0_i32, %c0_i32_0 : i32, i32
  }
}

</mosaic_0001>

<bundles_post_ra>
// kernel: tpu_custom_call.1
= control target key start
LH: loop header
LB: loop body
LE: loop exit
PB: predicated region body
PF: predicated region fallthrough
CT: control target
= control target key end

     0   :  { %s7185_s0 = inlined_call_operand.hbm [shape: f32[16,32], index: 0, kind: input, shape index: {}]   ;;  %s7186_s1 = inlined_call_operand.hbm [shape: f32[16,32], index: 1, kind: input, shape index: {}]   ;;  %s7187_s2 = inlined_call_operand.vmem [shape: f32[4,32,96], index: 2, kind: input, shape index: {}]   ;;  %s7188_s3 = inlined_call_operand.vmem [shape: f32[4,32,32], index: 3, kind: input, shape index: {}]   ;;  %s7189_s4 = inlined_call_operand.vmem [shape: f32[4,32,32], index: 4, kind: input, shape index: {}]   ;;  %s7190_s5 = inlined_call_operand.hbm [shape: f32[4,32,64], index: 5, kind: input, shape index: {}]   ;;  %s7191_s6 = inlined_call_operand.hbm [shape: f32[4,32,32], index: 6, kind: input, shape index: {}]   ;;  %s7192_s7 = inlined_call_operand.hbm [shape: f32[4,32,64], index: 7, kind: input, shape index: {}]   ;;  %s7193_s8 = inlined_call_operand.vmem [shape: f32[4,64,32], index: 8, kind: input, shape index: {}]   ;;  %s7194_s9 = inlined_call_operand.hbm [shape: f32[4,16,64], index: 9, kind: input, shape index: {}]   ;;  %s7195_s10 = inlined_call_operand.vmem [shape: f32[4,32], index: 10, kind: input, shape index: {}]   ;;  %s7196_s11 = inlined_call_operand.hbm [shape: f32[16,32], index: 11, kind: output, shape index: {}]  }
   0x1   :  { %7216 = sst [smem:[#allocation20_spill]] %s7185_s0 }
   0x2   :  { %7217 = sst [smem:[#allocation21_spill]] %s7187_s2 }
   0x3   :  { %7218 = sst [smem:[#allocation22_spill]] %s7188_s3 }
   0x4   :  { %7219 = sst [smem:[#allocation23_spill]] %s7189_s4 }
   0x5   :  { %7220 = sst [smem:[#allocation24_spill]] %s7190_s5 }
   0x6   :  { %7221 = sst [smem:[#allocation25_spill]] %s7193_s8 }
   0x7   :  { %7222 = sst [smem:[#allocation26_spill]] %s7195_s10 }
   0x8   :  { %7223 = sst [smem:[#allocation27_spill]] %s7196_s11 }
   0x9   :  { %16 = vsyncpa [#allocation5], 0 }
   0xa   :  { %17 = vsyncpa [#allocation8], 0 }
   0xb   :  { %18 = vsyncpa [#allocation6], 0  ;;  %s6275_s17 = smov 0   ;;  %s6277_s18 = smov 0  }
   0xc   :  { %s6279_s19 = smov 0   ;;  %s6281_s20 = smov 0  }
   0xd LB: > { %s6294_s21 = sadd.s32 4294967295, %s6172_s20   ;;  %s6297_s22 = sadd.s32 1, %s6172_s20   ;;  %s6172_s20 = sphi %s6281_s20, %s7263_s20   ;;  %s6168_s19 = sphi %s6279_s19, %s7267_s19   ;;  %s6164_s18 = sphi %s6277_s18, %s7266_s18   ;;  %s6160_s17 = sphi %s6275_s17, %s7265_s17  }
   0xe   : > { %7224 = sst [smem:[#allocation18_spill]] %s6297_s22  ;;  %s148_s23 = ssub.s32 %s6172_s20, %s6297_s22 }
   0xf   : > { %s151_s24 = sadd.s32 1, %s6168_s19  ;;  %p149_p0 = scmp.eq.s32.totalorder %s148_s23, 0 }
  0x10   : > { %p158_p1 = scmp.ne.s32.totalorder %s6168_s19, %s6164_s18  ;;  %p159_p2 = scmp.eq.s32.totalorder %s6172_s20, 0 }
  0x11   : > { %p164_p3 = scmp.ne.s32.totalorder %s6164_s18, %s6160_s17  ;;  %p7197_p5 = scmp.eq.s32.totalorder %s6294_s21, 0 }
  0x12   : > { %s6307_s25 = scalar_select %p149_p0, %s6168_s19, %s151_s24  }
  0x13   : > { %p6309_p4 = por %p159_p2, %p158_p1  ;;  %p4719_p6 = scmp.ge.s32.totalorder %s6172_s20, 1 }
  0x14   : > { %7225 = sst [smem:[#allocation19_spill]] %s6307_s25  ;;  %p321_p7 = scmp.lt.s32.totalorder %s6172_s20, 5 }
  0x15   : > { %p6318_p8 = por %p7197_p5, %p164_p3  ;;  %s6174_s29 = smov [#allocation4]  }
  0x16   : > { %p6323_p10 = pnand %p4719_p6, %p321_p7  ;;  %s333_s30 = sshll.u32 %s6174_s29, 4  ;;  %s334_s30 = int_to_ptr.vmem [resolvable:$true] %s333_s30 }
  0x17   : > { %s7227_s27 = scalar_select %p6318_p8, 1, 0 }
  0x18   : > { %s7228_s28 = scalar_select %p6323_p10, 1, 0 }
  0x19   : > { %p5589_p11 = pneg %p6323_p10  ;;  %p5611_p13 = scmp.lt.s32.totalorder %s6172_s20, 4 }
  0x1a   : > { %s7231_s0 = sld [smem:[#allocation20_spill]] }
  0x1b   : > { %p6331_p12 = pnand %p5589_p11, %p7197_p5  ;;  %p6340_p0 = pnand %p5611_p13, %p6309_p4 }
  0x1d   : > { %s7229_s12 = scalar_select %p6331_p12, 1, 0 }
  0x1e   : > { %s7230_s15 = scalar_select %p6340_p0, 1, 0 }
  0x1f   : > { %p7210_p2 = pneg %p6331_p12 }
  0x20   : > { %s5924_s23 = scalar_lea.hbm %s7231_s0, 256 }
  0x21   : > { %p5925_p1 = scmp.ne.s32.totalorder %s7231_s0, %s5924_s23  ;;  %p5931_p4 = scmp.lt.u32.totalorder %s5924_s23, %s7231_s0 }
  0x23   : > { %p5927_p3 = pnand %p7210_p2, %p5925_p1 }
  0x25   : > { %p5928_p6 = pneg %p5927_p3 }
  0x27   : > { %p5933_p7 = pnand %p5931_p4, %p5928_p6 }
  0x29   : > { %5936 = shalt.err (!%p5933_p7)
}
  0x2a   : > { %s5937_s14 = scalar_lea.vmem %s334_s30, 256  ;;  %p5945_p5 = scmp.lt.s32.totalorder %s334_s30, %s334_s30 }
  0x2b   : > { %p5938_p11 = scmp.ne.s32.totalorder %s334_s30, %s5937_s14  ;;  %p5946_p8 = scmp.lt.s32.totalorder %s5937_s14, %s5937_s14 }
  0x2d   : > { %p5940_p13 = pnand %p5938_p11, %p7210_p2  ;;  %p5947_p10 = por %p5946_p8, %p5945_p5 }
  0x2f   : > { %p5941_p9 = pneg %p5940_p13 }
  0x31   : > { %p5948_p0 = pnand %p5947_p10, %p5941_p9 }
  0x33   : > { %5951 = shalt.err (!%p5948_p0)
}
  0x34   : > { %s7204_s16 = smov 128   ;;  %s7206_s13 = smov 8  }
  0x35   : > { %5592 = dma.hbm_to_vmem [thread:$0]  (!%p6331_p12), %s7231_s0, 256, %s334_s30, [#allocation5], %s7204_s16, %s7204_s16, %s7206_s13  }
  0x36   : > { %s7232_s24 = sand.u32 1, %s6168_s19   ;;  %s6374_s29 = sshll.u32 %s6172_s20, 9 }
  0x37   : > { %s6371_s14 = sshll.u32 %s7232_s24, 5  ;;  %s7233_s5 = sld [smem:[#allocation24_spill]] }
  0x38   : > { %s391_s11 = scalar_lea.vmem [#allocation9], %s6371_s14  ;;  %s6389_s24 = scalar_lea.hbm %s7191_s6, %s6374_s29 }
  0x39   : > { %s398_s17 = sshll.u32 %s391_s11, 4  ;;  %s7234_s16 = sand.u32 1, %s6172_s20   ;;  %s6383_s17 = int_to_ptr.vmem [resolvable:$true] %s398_s17 }
  0x3a   : > { %s6393_s13 = scalar_lea.sflag [#allocation5], %s7234_s16  ;;  %p7235_p8 = scmp.ne.s32.totalorder %s7230_s15, 0 }
  0x3c   : > { %p6399_p9 = pneg %p7235_p8 }
  0x3d   : > { %s6380_s22 = scalar_lea.hbm %s7233_s5, %s6374_s29  ;;  %s5957_s30 = scalar_lea.hbm %s7233_s5, 2048 }
  0x3e   : > { %s5952_s25 = scalar_lea.hbm %s6380_s22, 512  ;;  %p5958_p1 = scmp.lt.u32.totalorder %s6380_s22, %s7233_s5 }
  0x3f   : > { %p5953_p5 = scmp.ne.s32.totalorder %s6380_s22, %s5952_s25  ;;  %p5959_p3 = scmp.lt.u32.totalorder %s5957_s30, %s5952_s25 }
  0x40   : > { %s7236_s26 = scalar_select %p6399_p9, 1, 0 }
  0x41   : > { %p5955_p10 = pnand %p6399_p9, %p5953_p5  ;;  %p5960_p6 = por %p5959_p3, %p5958_p1 }
  0x42   : > { %p5961_p4 = scmp.lt.u32.totalorder %s5952_s25, %s6380_s22 }
  0x43   : > { %p5956_p0 = pneg %p5955_p10 }
  0x44   : > { %p5962_p7 = por %p5961_p4, %p5960_p6 }
  0x46   : > { %p5963_p11 = pnand %p5962_p7, %p5956_p0 }
  0x48   : > { %5966 = shalt.err (!%p5963_p11)
}
  0x49   : > { %s5967_s16 = scalar_lea.vmem %s6383_s17, 512  ;;  %s6177_s0 = smov [#allocation9]  }
  0x4a   : > { %p5968_p13 = scmp.ne.s32.totalorder %s6383_s17, %s5967_s16  ;;  %s5972_s11 = sshll.u32 %s6177_s0, 4  ;;  %s5973_s11 = int_to_ptr.vmem [resolvable:$false] %s5972_s11 }
  0x4b   : > { %s5974_s10 = scalar_lea.vmem %s5973_s11, 1024  ;;  %p5975_p2 = scmp.lt.s32.totalorder %s6383_s17, %s5973_s11 }
  0x4c   : > { %p5970_p5 = pnand %p5968_p13, %p6399_p9  ;;  %p5976_p12 = scmp.lt.s32.totalorder %s5974_s10, %s5967_s16 }
  0x4e   : > { %p5971_p10 = pneg %p5970_p5  ;;  %p5977_p1 = por %p5976_p12, %p5975_p2 }
  0x50   : > { %p5978_p3 = pnand %p5977_p1, %p5971_p10 }
  0x52   : > { %5981 = shalt.err (!%p5978_p3)
}
  0x53   : > { %s7237_s25 = smov 8   ;;  %s7238_s30 = smov 128  }
  0x54   : > { %5599 = dma.hbm_to_vmem [thread:$0]  (!%p7235_p8), %s6380_s22, 512, %s6383_s17, %s6393_s13, %s7238_s30, %s7238_s30, %s7237_s25  }
  0x55   : > { %s412_s23 = scalar_lea.vmem [#allocation10], %s6371_s14  ;;  %s6433_s10 = scalar_lea.hbm %s7192_s7, %s6374_s29 }
  0x56   : > { %s419_s16 = sshll.u32 %s412_s23, 4  ;;  %s5982_s5 = scalar_lea.hbm %s6389_s24, 512  ;;  %s6427_s16 = int_to_ptr.vmem [resolvable:$true] %s419_s16 }
  0x57   : > { %p5983_p12 = scmp.ne.s32.totalorder %s6389_s24, %s5982_s5  ;;  %s5987_s3 = scalar_lea.hbm %s7191_s6, 2048 }
  0x58   : > { %p5988_p6 = scmp.lt.u32.totalorder %s6389_s24, %s7191_s6  ;;  %p5989_p4 = scmp.lt.u32.totalorder %s5987_s3, %s5982_s5 }
  0x59   : > { %p5985_p2 = pnand %p5983_p12, %p6399_p9  ;;  %p5991_p11 = scmp.lt.u32.totalorder %s5982_s5, %s6389_s24 }
  0x5a   : > { %p5990_p7 = por %p5989_p4, %p5988_p6 }
  0x5b   : > { %p5986_p0 = pneg %p5985_p2 }
  0x5c   : > { %p5992_p13 = por %p5991_p11, %p5990_p7 }
  0x5e   : > { %p5993_p5 = pnand %p5992_p13, %p5986_p0 }
  0x60   : > { %5996 = shalt.err (!%p5993_p5)
}
  0x61   : > { %s5997_s29 = scalar_lea.vmem %s6427_s16, 512  ;;  %s6178_s4 = smov [#allocation10]  }
  0x62   : > { %p5998_p10 = scmp.ne.s32.totalorder %s6427_s16, %s5997_s29  ;;  %s6002_s8 = sshll.u32 %s6178_s4, 4  ;;  %s6003_s8 = int_to_ptr.vmem [resolvable:$false] %s6002_s8 }
  0x63   : > { %s6004_s2 = scalar_lea.vmem %s6003_s8, 1024  ;;  %p6005_p12 = scmp.lt.s32.totalorder %s6427_s16, %s6003_s8 }
  0x64   : > { %p6000_p1 = pnand %p5998_p10, %p6399_p9  ;;  %p6006_p2 = scmp.lt.s32.totalorder %s6004_s2, %s5997_s29 }
  0x66   : > { %p6001_p3 = pneg %p6000_p1  ;;  %p6007_p6 = por %p6006_p2, %p6005_p12 }
  0x68   : > { %p6008_p4 = pnand %p6007_p6, %p6001_p3 }
  0x6a   : > { %6011 = shalt.err (!%p6008_p4)
}
  0x6b   : > { %5602 = dma.hbm_to_vmem [thread:$0]  (!%p7235_p8), %s6389_s24, 512, %s6427_s16, %s6393_s13, %s7238_s30, %s7238_s30, %s7237_s25  }
  0x6c   : > { %s433_s3 = scalar_lea.vmem [#allocation11], %s6371_s14  ;;  %s6179_s17 = smov [#allocation7]  }
  0x6d   : > { %s440_s5 = sshll.u32 %s433_s3, 4  ;;  %s6463_s23 = sshll.u32 %s6179_s17, 4  ;;  %s6461_s5 = int_to_ptr.vmem [resolvable:$true] %s440_s5  ;;  %s347_s23 = int_to_ptr.vmem [resolvable:$true] %s6463_s23 }
  0x6e   : > { %s6012_s0 = scalar_lea.hbm %s6433_s10, 512  ;;  %s6017_s29 = scalar_lea.hbm %s7192_s7, 2048 }
  0x6f   : > { %p6013_p0 = scmp.ne.s32.totalorder %s6433_s10, %s6012_s0  ;;  %p6018_p13 = scmp.lt.u32.totalorder %s6433_s10, %s7192_s7 }
  0x70   : > { %p6019_p5 = scmp.lt.u32.totalorder %s6017_s29, %s6012_s0  ;;  %p6021_p1 = scmp.lt.u32.totalorder %s6012_s0, %s6433_s10 }
  0x71   : > { %p6015_p7 = pnand %p6013_p0, %p6399_p9 }
  0x72   : > { %p6020_p10 = por %p6019_p5, %p6018_p13 }
  0x73   : > { %p6016_p11 = pneg %p6015_p7 }
  0x74   : > { %p6022_p3 = por %p6021_p1, %p6020_p10 }
  0x76   : > { %p6023_p12 = pnand %p6022_p3, %p6016_p11 }
  0x78   : > { %6026 = shalt.err (!%p6023_p12)
}
  0x79   : > { %s6027_s14 = scalar_lea.vmem %s6461_s5, 512  ;;  %s6180_s24 = smov [#allocation11]  }
  0x7a   : > { %p6028_p2 = scmp.ne.s32.totalorder %s6461_s5, %s6027_s14  ;;  %s6032_s16 = sshll.u32 %s6180_s24, 4  ;;  %s6033_s16 = int_to_ptr.vmem [resolvable:$false] %s6032_s16 }
  0x7b   : > { %s6034_s2 = scalar_lea.vmem %s6033_s16, 1024  ;;  %p6035_p0 = scmp.lt.s32.totalorder %s6461_s5, %s6033_s16 }
  0x7c   : > { %p6030_p6 = pnand %p6028_p2, %p6399_p9  ;;  %p6036_p7 = scmp.lt.s32.totalorder %s6034_s2, %s6027_s14 }
  0x7e   : > { %p6031_p4 = pneg %p6030_p6  ;;  %p6037_p13 = por %p6036_p7, %p6035_p0 }
  0x80   : > { %p6038_p5 = pnand %p6037_p13, %p6031_p4 }
  0x82   : > { %6041 = shalt.err (!%p6038_p5)
}
  0x83   : > { %5605 = dma.hbm_to_vmem [thread:$0]  (!%p7235_p8), %s6433_s10, 512, %s6461_s5, %s6393_s13, %s7238_s30, %s7238_s30, %s7237_s25  }
  0x84   : > { %s7239_s3 = sand.u32 1, %s6168_s19   ;;  %s6042_s22 = scalar_lea.hbm %s7186_s1, 256 }
  0x85   : > { %s4732_s17 = sshll.u32 %s7239_s3, 4  ;;  %p6043_p11 = scmp.ne.s32.totalorder %s7186_s1, %s6042_s22 }
  0x86   : > { %p7240_p10 = scmp.ne.s32.totalorder %s7229_s12, 0  ;;  %p6049_p2 = scmp.lt.u32.totalorder %s6042_s22, %s7186_s1 }
  0x88   : > { %p7241_p1 = pneg %p7240_p10 }
  0x8a   : > { %p6045_p3 = pnand %p6043_p11, %p7241_p1 }
  0x8c   : > { %p6046_p12 = pneg %p6045_p3 }
  0x8e   : > { %p6051_p6 = pnand %p6049_p2, %p6046_p12 }
  0x90   : > { %6054 = shalt.err (!%p6051_p6)
}
  0x91   : > { %s6055_s10 = scalar_lea.vmem %s347_s23, 256  ;;  %p7242_p0 = pmov %p7241_p1 }
  0x92   : > { %p6056_p4 = scmp.ne.s32.totalorder %s347_s23, %s6055_s10  ;;  %p6063_p5 = scmp.lt.s32.totalorder %s347_s23, %s347_s23 }
  0x93   : > { %p6064_p8 = scmp.lt.s32.totalorder %s6055_s10, %s6055_s10 }
  0x94   : > { %p6058_p7 = pnand %p6056_p4, %p7242_p0 }
  0x95   : > { %p6065_p9 = por %p6064_p8, %p6063_p5 }
  0x96   : > { %p6059_p13 = pneg %p6058_p7 }
  0x98   : > { %p6066_p1 = pnand %p6065_p9, %p6059_p13 }
  0x9a   : > { %6069 = shalt.err (!%p6066_p1)
}
  0x9b   : > { %5595 = dma.hbm_to_vmem [thread:$0]  (!%p7240_p10), %s7186_s1, 256, %s347_s23, [#allocation8], %s7238_s30, %s7238_s30, %s7237_s25  }
  0x9c   : > { %s4865_s16 = sshll.u32 %s6172_s20, 8  ;;  %s462_s12 = scalar_lea.vmem [#allocation12], %s4732_s17 }
  0x9d   : > { %s6520_s0 = scalar_lea.hbm %s7194_s9, %s4865_s16  ;;  %s469_s11 = sshll.u32 %s462_s12, 4  ;;  %s6522_s11 = int_to_ptr.vmem [resolvable:$true] %s469_s11 }
  0x9e   : > { %s6070_s22 = scalar_lea.hbm %s6520_s0, 256  ;;  %p7243_p9 = scmp.ne.s32.totalorder %s7236_s26, 0 }
  0x9f   : > { %p6071_p8 = scmp.ne.s32.totalorder %s6520_s0, %s6070_s22  ;;  %s6075_s29 = scalar_lea.hbm %s7194_s9, 1024 }
  0xa0   : > { %p6076_p10 = scmp.lt.u32.totalorder %s6520_s0, %s7194_s9  ;;  %p6077_p12 = scmp.lt.u32.totalorder %s6075_s29, %s6070_s22 }
  0xa1   : > { %p6073_p11 = pnand %p6071_p8, %p7243_p9  ;;  %p6079_p6 = scmp.lt.u32.totalorder %s6070_s22, %s6520_s0 }
  0xa2   : > { %p6078_p2 = por %p6077_p12, %p6076_p10 }
  0xa3   : > { %p6074_p3 = pneg %p6073_p11 }
  0xa4   : > { %p6080_p4 = por %p6079_p6, %p6078_p2 }
  0xa6   : > { %p6081_p0 = pnand %p6080_p4, %p6074_p3 }
  0xa8   : > { %6084 = shalt.err (!%p6081_p0)
}
  0xa9   : > { %s6085_s17 = scalar_lea.vmem %s6522_s11, 256  ;;  %s6181_s14 = smov [#allocation12]  }
  0xaa   : > { %p6086_p7 = scmp.ne.s32.totalorder %s6522_s11, %s6085_s17  ;;  %s6090_s10 = sshll.u32 %s6181_s14, 4  ;;  %s6091_s10 = int_to_ptr.vmem [resolvable:$false] %s6090_s10 }
  0xab   : > { %s6092_s5 = scalar_lea.vmem %s6091_s10, 512  ;;  %p6093_p1 = scmp.lt.s32.totalorder %s6522_s11, %s6091_s10 }
  0xac   : > { %p6088_p13 = pnand %p6086_p7, %p7243_p9  ;;  %p6094_p8 = scmp.lt.s32.totalorder %s6092_s5, %s6085_s17 }
  0xae   : > { %p6089_p5 = pneg %p6088_p13  ;;  %p6095_p11 = por %p6094_p8, %p6093_p1 }
  0xb0   : > { %p6096_p10 = pnand %p6095_p11, %p6089_p5 }
  0xb2   : > { %6099 = shalt.err (!%p6096_p10)
}
  0xb3   : > { %p7244_p3 = scmp.ne.s32.totalorder %s7230_s15, 0  ;;  %p7245_p9 = scmp.ne.s32.totalorder %s7228_s28, 0 }
  0xb4   : > { %p7246_p12 = scmp.eq.s32.totalorder (!%p7245_p9), %s6294_s21, 0 }
  0xb5   : > { %5608 = dma.hbm_to_vmem [thread:$0]  (!%p7244_p3), %s6520_s0, 256, %s6522_s11, %s6393_s13, %s7238_s30, %s7238_s30, %s7237_s25  }
  0xb6   : > { %481 = sbr.rel (%p7245_p9) target bundleno = 10982 (0x2ae6), region = 64 }
  0xbd   : > { %6143 = dma.done.wait (%p7246_p12), [#allocation5], 256   ;;  %p7247_p2 = pmov %p7246_p12 }
  0xbf   : > { %6145 = vsyncadd (%p7247_p2), [#allocation5], 4294967040  ;;  %p7248_p6 = pmov %p7247_p2 }
  0xc0   : > { %p7249_p4 = pmov %p7247_p2 }
  0xc1   : > { %6147 = dma.done.wait (%p7248_p6), [#allocation8], 256  }
  0xc2   : > { %6149 = vsyncadd (%p7249_p4), [#allocation8], 4294967040  ;;  %s491_s15 = sand.u32 1, %s6294_s21   ;;  %s493_s13 = sand.u32 1, %s6164_s18  }
  0xc3   : > { %s4738_s26 = sshll.u32 %s493_s13, 5  ;;  %s492_s28 = scalar_lea.sflag [#allocation5], %s491_s15 }
  0xc4   : > { %s6561_s25 = scalar_lea.vmem [#allocation9], %s4738_s26  ;;  %p7250_p0 = scmp.ne.s32.totalorder %s7227_s27, 0 }
  0xc6   : > { %6151 = dma.done.wait (%p7250_p0), %s492_s28, 1792  }
  0xc7   : > { %6153 = vsyncadd (%p7250_p0), %s492_s28, 4294965504  ;;  %s4741_s30 = sshll.u32 %s493_s13, 4  ;;  %p591_p7 = scmp.lt.s32.totalorder %s6294_s21, 3 }
  0xc8   : > { %s6569_s3 = scalar_lea.vmem [#allocation12], %s4741_s30  ;;  %s7251_s12 = sld [smem:[#allocation21_spill]] }
  0xc9   : > { %s592_s24 = scalar_select %p591_p7, %s6294_s21, 3  ;;  %v6572_v0 = vld [vmem:[%s6569_s3] sm:$0x1]  ;;  %v6575_v1 = vld [vmem:[%s6569_s3 + $0x1] sm:$0x1] }
  0xca   : > { %v6578_v2 = vld [vmem:[%s6569_s3 + $0x2] sm:$0x1]  ;;  %s7252_s20 = sld [smem:[#allocation22_spill]]  ;;  %v6591_v3 = vld [vmem:[%s6569_s3 + $0x6] sm:$0x1]  ;;  %s7253_s17 = sld [smem:[#allocation23_spill]] }
  0xcb   : > { %s4866_s16 = sshll.u32 %s592_s24, 5  ;;  %s4869_s2 = sshll.u32 %s592_s24, 6  ;;  %v6594_v4 = vld [vmem:[%s6569_s3 + $0x7] sm:$0x1]  ;;  %v6597_v5 = vld [vmem:[%s6569_s3 + $0x8] sm:$0x1] }
  0xcc   : > { %s7254_s15 = sld [smem:[#allocation25_spill]]  ;;  %v6610_v6 = vld [vmem:[%s6569_s3 + $0x9] sm:$0x1]  ;;  %s6612_s28 = scalar_lea.vmem [#allocation10], %s4738_s26 }
  0xcd   : > { %s6614_s30 = scalar_lea.vmem [#allocation11], %s4738_s26  ;;  %p7255_p13 = scmp.ne.s32.totalorder %s6294_s21, 0 }
  0xce   : > { %s6583_s11 = scalar_lea.vmem %s7251_s12, %s4866_s16  ;;  %v622_v7 = vld [vmem:[#allocation4] sm:$0xff] (!%p7255_p13)  ;;  %vm624_vm0 = vcmask (!%p7255_p13), 261120   ;;  %v623_v8 = vld [vmem:[#allocation4 + $0x8] sm:$0xff] (!%p7255_p13) }
  0xcf   : > { %621 = sbr.rel (%p7255_p13) target bundleno = 214 (0xd6), region = 92  ;;  %625 = vst.msk [vmem:[#allocation2] sm:$0xff] (!%p7255_p13), %vm624_vm0, %v622_v7  ;;  %626 = vst.msk [vmem:[#allocation2 + $0x8] sm:$0xff] (!%p7255_p13), %vm624_vm0, %v623_v8 }
  0xd0   : > { %s6588_s29 = scalar_lea.vmem %s7252_s20, %s4866_s16  ;;  %s6602_s14 = scalar_lea.vmem %s7253_s17, %s4866_s16 }
  0xd2   : > { %s6607_s13 = scalar_lea.vmem %s7254_s15, %s4869_s2 }
  0xd6 PF: > { %p4751_p5 = scmp.ge.s32.totalorder %s6294_s21, 2 }
  0xd7   : > { %v664_v9 = vld [vmem:[%s6583_s11] sm:$0xff] (!%p4751_p5)  ;;  %v665_v10 = vld [vmem:[%s6583_s11 + $0x8] sm:$0xff] (!%p4751_p5)  ;;  %v666_v11 = vld [vmem:[%s6583_s11 + $0x10] sm:$0xff] (!%p4751_p5)  ;;  %vm668_vm1 = vcmask (!%p4751_p5), 261120   ;;  %vm760_vm2 = vcmask (!%p4751_p5), 64512   ;;  %s6182_s26 = smov (!%p4751_p5), 120   ;;  %v636_v31 = vlaneseq (!%p4751_p5) }
  0xd8   : > { %630 = sbr.rel (%p4751_p5) target bundleno = 4168 (0x1048), region = 96  ;;  %v5345_v12 = vpack.c.bf16 (!%p4751_p5), %v665_v10, %v664_v9  ;;  %v667_v13 = vld [vmem:[%s6583_s11 + $0x18] sm:$0xff] (!%p4751_p5)  ;;  %v6623_v14 = vld [vmem:[#allocation2] sm:$0xff] (!%p4751_p5)  ;;  %v6627_v16 = vld [vmem:[#allocation2 + $0x8] sm:$0xff] (!%p4751_p5)  ;;  %s6183_s24 = smov (!%p4751_p5), 96   ;;  %vm848_vm8 = vcmask (!%p4751_p5), 130048  }
  0xd9   : > { %v5349_v15 = vpack.c.bf16 (!%p4751_p5), %v667_v13, %v666_v11  ;;  %5048 = vmatprep.mubr.msk.f32.mxu1 (!%p4751_p5), %vm668_vm1, %v6623_v14  ;;  %s6184_s16 = smov (!%p4751_p5), 88   ;;  %vm6647_vm3 = vmpackc.low (!%p4751_p5), %vm760_vm2, %vm760_vm2  ;;  %v637_v32 = vand.u32 (!%p4751_p5), 127, %v636_v31  ;;  %v6185_v34 = vmov (!%p4751_p5), -1e+30   ;;  %s6186_s2 = smov (!%p4751_p5), 64   ;;  %vm1598_vm9 = vcmask (!%p4751_p5), 195584  }
  0xda   : > { %5346 = vmatprep.subr.bf16.mxu1 (!%p4751_p5), %v5345_v12  ;;  %s6187_s27 = smov (!%p4751_p5), 80   ;;  %s6188_s0 = smov (!%p4751_p5), 56   ;;  %vm1830_vm10 = vcmask (!%p4751_p5), 523264  }
  0xdb   : > { %5348 = vmatpush3.bf16.msra.mxu1 (!%p4751_p5), %v5345_v12  ;;  %vm655_vm4 = vcmp.ge.s32.totalorder (!%p4751_p5), %v637_v32, 8  ;;  %vm656_vm5 = vcmp.lt.s32.totalorder (!%p4751_p5), %v637_v32, 16  ;;  %vm645_vm7 = vcmp.lt.s32.totalorder (!%p4751_p5), %v637_v32, 8  ;;  %s6189_s12 = smov (!%p4751_p5), 112   ;;  %s6190_s22 = smov (!%p4751_p5), 72  }
  0xdc   : > { %5350 = vmatprep.subr.bf16.mxu1 (!%p4751_p5), %v5349_v15  ;;  %vm657_vm6 = vmand (!%p4751_p5), %vm655_vm4, %vm656_vm5  ;;  %v6666_v38 = vsel (!%p4751_p5), %vm645_vm7, 0.0, %v6185_v34  ;;  %s6191_s23 = smov (!%p4751_p5), 104   ;;  %s6192_s20 = smov (!%p4751_p5), 48  }
  0xdd   : > { %v6664_v35 = vsel (!%p4751_p5), %vm657_vm6, 0.0, %v6185_v34  ;;  %s6193_s4 = smov (!%p4751_p5), 8   ;;  %s6194_s8 = smov (!%p4751_p5), 40  }
  0xde   : > { %s6195_s17 = smov (!%p4751_p5), 16   ;;  %s6196_s10 = smov (!%p4751_p5), 24  }
  0xdf   : > { %5352 = vmatpush3.bf16.msra.mxu1 %v5349_v15  ;;  %p4784_p1 = scmp.ge.s32.totalorder %s6294_s21, 1 }
  0xe2   : > { %5049 = vmatmul.mubr.msk.f32.vlgmr.msra.gmra.mrb[0].mxu1 %vm668_vm1, %v6627_v16 }
 0x1b5   : > { %v6631_v17 = vpop.f32.mrb[0].mxu1 }
 0x1b6   : > { %v6633_v18 = vpop.f32.mrb[1].mxu1 }
 0x1b7   : > { %958 = vrot.lane.b32.xlu1 %v6633_v18, %s6182_s26  ;;  %5055 = vmatprep.mubr.msk.f32.mxu1 %vm760_vm2, %v6633_v18  ;;  %v6640_v19 = vpack.i.bf16 %v6631_v17, %v6633_v18 }
 0x1b9   : > { %5686 = vrot.lane.b32.xlu0 %v6640_v19, %s6183_s24 }
 0x1bb   : > { %960 = vrot.lane.b32.xlu1 %v6631_v17, %s6182_s26 }
 0x1bd   : > { %5691 = vrot.lane.b32.xlu0 %v6640_v19, %s6184_s16 }
 0x229   : > { %v959_v29 = vpop.permute.xlu1 %958 }
 0x22b   : > { %v5687_v20 = vpop.permute.xlu0 %5686 }
 0x22c   : > { %v5689_v21 = vunpack.i.h.bf16 %v5687_v20  ;;  %v5688_v22 = vunpack.i.l.bf16 %v5687_v20 }
 0x22d   : > { %v961_v30 = vpop.permute.xlu1 %960 }
 0x22e   : > { %v5353_v24 = vpack.c.bf16 %v5689_v21, %v5688_v22 }
 0x22f   : > { %v5692_v25 = vpop.permute.xlu0 %5691 }
 0x230   : > { %v5694_v26 = vunpack.i.h.bf16 %v5692_v25  ;;  %v5693_v27 = vunpack.i.l.bf16 %v5692_v25  ;;  %5355 = vmatprep.subr.msk.bf16.mxu1 %vm6647_vm3, %v5353_v24 }
 0x231   : > { %5358 = vmatpush3.bf16.xpose.msk.msra.mxu1 %vm6647_vm3, %v5353_v24 }
 0x232   : > { %v5363_v28 = vpack.c.bf16 %v5694_v26, %v5693_v27 }
 0x234   : > { %5365 = vmatprep.subr.msk.bf16.mxu1 %vm6647_vm3, %v5363_v28 }
 0x238   : > { %5056 = vmatmul.mubr.msk.f32.vlgmr.msra.gmra.mrb[2].mxu1 %vm760_vm2, %v6631_v17 }
 0x239   : > { %5368 = vmatpush3.bf16.xpose.msk.msra.mxu1 %vm6647_vm3, %v5363_v28  ;;  %5069 = vmatprep.mubr.msk.f32.mxu1 %vm760_vm2, %v959_v29 }
 0x240   : > { %5070 = vmatmul.mubr.msk.f32.vlgmr.msra.gmra.mrb[4].mxu1 %vm760_vm2, %v961_v30 }
 0x30b   : > { %v5057_v33 = vpop.f32.mrb[2].mxu1 }
 0x30c   : > { %v845_v36 = vmul.f32 0.35355338, %v5057_v33  ;;  %v835_v37 = vpop.f32.mrb[3].mxu1 }
 0x30d   : > { %v844_v39 = vmul.f32 0.35355338, %v835_v37 }
 0x30e   : > { %v847_v40 = vadd.f32 %v845_v36, %v6664_v35 }
 0x30f   : > { %v846_v41 = vadd.f32 %v844_v39, %v6666_v38 }
 0x310   : > { %v852_v42 = vsel %vm848_vm8, %v847_v40, -inf }
 0x311   : > { %853 = vmax.xlane.f32.xlu1 %v852_v42  ;;  %v849_v43 = vsel %vm848_vm8, %v846_v41, -inf }
 0x312   : > { %850 = vmax.xlane.f32.xlu0 %v849_v43 }
 0x313   : > { %v5071_v44 = vpop.f32.mrb[4].mxu1 }
 0x314   : > { %v1040_v45 = vpop.f32.mrb[5].mxu1  ;;  %v1050_v46 = vmul.f32 0.35355338, %v5071_v44 }
 0x315   : > { %v1049_v47 = vmul.f32 0.35355338, %v1040_v45 }
 0x316   : > { %v1052_v50 = vadd.f32 %v1050_v46, %v6664_v35 }
 0x317   : > { %v1051_v48 = vadd.f32 %v1049_v47, %v6666_v38 }
 0x318   : > { %v1056_v51 = vsel %vm848_vm8, %v1052_v50, -inf }
 0x319   : > { %v1053_v49 = vsel %vm848_vm8, %v1051_v48, -inf }
 0x31a   : > { %1054 = vmax.xlane.f32.xlu0 %v1053_v49 }
 0x31e   : > { %1057 = vmax.xlane.f32.xlu0 %v1056_v51 }
 0x322   : > { %5696 = vrot.lane.b32.xlu1 %v6640_v19, %s6186_s2 }
 0x39e   : > { %v854_v52 = vpop.xlane.xlu1 %853 }
 0x39f   : > { %v856_v53 = vsub.f32 %v847_v40, %v854_v52  ;;  %v851_v54 = vpop.xlane.xlu0 %850 }
 0x3a0   : > { %v855_v55 = vsub.f32 %v846_v41, %v851_v54 }
 0x3a1   : > { %v859_v56 = vmul.f32 1.442695, %v856_v53 }
 0x3a2   : > { %v857_v57 = vmul.f32 1.442695, %v855_v55  ;;  %v5697_v58 = vpop.permute.xlu1 %5696 }
 0x3a3   : > { %5725 = vpow2.f32 %v859_v56  ;;  %v5699_v59 = vunpack.i.h.bf16 %v5697_v58  ;;  %v5698_v60 = vunpack.i.l.bf16 %v5697_v58 }
 0x3a4   : > { %5727 = vpow2.f32 %v857_v57 }
 0x3a5   : > { %v5359_v61 = vpack.c.bf16 %v5699_v59, %v5698_v60 }
 0x3a7   : > { %5360 = vmatprep.subr.bf16.mxu0 %v5359_v61  ;;  %v1055_v62 = vpop.xlane.xlu0 %1054 }
 0x3a8   : > { %5362 = vmatpush3.bf16.msra.mxu0 %v5359_v61  ;;  %v1059_v20 = vsub.f32 %v1051_v48, %v1055_v62 }
 0x3aa   : > { %v1061_v21 = vmul.f32 1.442695, %v1059_v20 }
 0x3ab   : > { %v1058_v63 = vpop.xlane.xlu0 %1057 }
 0x3ac   : > { %v1060_v7 = vsub.f32 %v1052_v50, %v1058_v63 }
 0x3ad   : > { %v5726_v8 = vpop.eup %5725 }
 0x3ae   : > { %v5728_v9 = vpop.eup %5727  ;;  %v1063_v10 = vmul.f32 1.442695, %v1060_v7  ;;  %v864_v11 = vsel %vm848_vm8, %v5726_v8, 0.0 }
 0x3af   : > { %865 = vadd.xlane.f32.xlu0 %v864_v11  ;;  %v861_v12 = vsel %vm848_vm8, %v5728_v9, 0.0 }
 0x3b0   : > { %5729 = vpow2.f32 %v1063_v10  ;;  %862 = vadd.xlane.f32.xlu1 %v861_v12 }
 0x3b1   : > { %5731 = vpow2.f32 %v1061_v21 }
 0x3ba   : > { %v5730_v13 = vpop.eup %5729 }
 0x3bb   : > { %v1068_v15 = vsel %vm848_vm8, %v5730_v13, 0.0  ;;  %v5732_v22 = vpop.eup %5731 }
 0x3bc   : > { %1069 = vadd.xlane.f32.xlu0 %v1068_v15  ;;  %v1065_v24 = vsel %vm848_vm8, %v5732_v22, 0.0 }
 0x3c1   : > { %5706 = vrot.lane.b32.xlu1 %v6640_v19, %s6187_s27 }
 0x3d2   : > { %5701 = vrot.lane.b32.xlu0 %v6640_v19, %s6188_s0 }
 0x3d6   : > { %1164 = vrot.lane.b32.xlu0 %v6631_v17, %s6189_s12 }
 0x3e5   : > { %1066 = vadd.xlane.f32.xlu1 %v1065_v24 }
 0x3f6   : > { %1162 = vrot.lane.b32.xlu1 %v6633_v18, %s6189_s12 }
 0x43c   : > { %v866_v25 = vpop.xlane.xlu0 %865 }
 0x43d   : > { %5733 = vrcp.f32 %v866_v25  ;;  %v863_v26 = vpop.xlane.xlu1 %862 }
 0x43e   : > { %5735 = vrcp.f32 %v863_v26 }
 0x441   : > { %v5707_v33 = vpop.permute.xlu1 %5706 }
 0x442   : > { %v5709_v36 = vunpack.i.h.bf16 %v5707_v33  ;;  %v5708_v37 = vunpack.i.l.bf16 %v5707_v33 }
 0x444   : > { %v5373_v42 = vpack.c.bf16 %v5709_v36, %v5708_v37 }
 0x447   : > { %v5734_v27 = vpop.eup %5733 }
 0x448   : > { %v5736_v28 = vpop.eup %5735  ;;  %v870_v32 = vmul.f32 %v5734_v27, %v5726_v8 }
 0x449   : > { %v1070_v29 = vpop.xlane.xlu0 %1069  ;;  %v868_v30 = vmul.f32 %v5736_v28, %v5728_v9 }
 0x44a   : > { %5737 = vrcp.f32 %v1070_v29 }
 0x44b   : > { %5062 = vmatprep.mubr.msk.f32.mxu0 %vm848_vm8, %v868_v30 }
 0x44c   : > { %5063 = vmatmul.mubr.msk.f32.vlgmr.msra.gmra.mrb[0].mxu0 %vm848_vm8, %v870_v32 }
 0x44d   : > { %v5702_v34 = vpop.permute.xlu0 %5701 }
 0x44e   : > { %v5704_v39 = vunpack.i.h.bf16 %v5702_v34  ;;  %v5703_v40 = vunpack.i.l.bf16 %v5702_v34 }
 0x450   : > { %v5369_v41 = vpack.c.bf16 %v5704_v39, %v5703_v40 }
 0x451   : > { %v1165_v49 = vpop.permute.xlu0 %1164 }
 0x452   : > { %5370 = vmatprep.subr.bf16.mxu0 %v5369_v41 }
 0x453   : > { %5372 = vmatpush3.bf16.msra.mxu0 %v5369_v41 }
 0x454   : > { %5375 = vmatprep.subr.msk.bf16.mxu0 %vm6647_vm3, %v5373_v42  ;;  %v5738_v44 = vpop.eup %5737 }
 0x455   : > { %v1074_v47 = vmul.f32 %v5738_v44, %v5730_v13 }
 0x472   : > { %v1067_v43 = vpop.xlane.xlu1 %1066 }
 0x473   : > { %5739 = vrcp.f32 %v1067_v43 }
 0x476   : > { %v1163_v48 = vpop.permute.xlu1 %1162 }
 0x47d   : > { %v5740_v45 = vpop.eup %5739 }
 0x47e   : > { %v1072_v46 = vmul.f32 %v5740_v45, %v5732_v22 }
 0x480   : > { %5076 = vmatprep.mubr.msk.f32.mxu0 %vm848_vm8, %v1072_v46 }
 0x481   : > { %5077 = vmatmul.mubr.msk.f32.vlgmr.msra.gmra.mrb[2].mxu0 %vm848_vm8, %v1074_v47 }
 0x482   : > { %5378 = vmatpush3.bf16.xpose.msk.msra.mxu0 %vm6647_vm3, %v5373_v42  ;;  %5083 = vmatprep.mubr.msk.f32.mxu0 %vm760_vm2, %v1163_v48 }
 0x489   : > { %5084 = vmatmul.mubr.msk.f32.vlgmr.msra.gmra.mrb[4].mxu0 %vm760_vm2, %v1165_v49 }
 0x51f   : > { %v6695_v50 = vpop.f32.mrb[0].mxu0 }
 0x520   : > { %v6697_v51 = vpop.f32.mrb[1].mxu0 }
 0x554   : > { %v6699_v52 = vpop.f32.mrb[2].mxu0 }
 0x555   : > { %v6701_v53 = vpop.f32.mrb[3].mxu0 }
 0x55c   : > { %v5085_v54 = vpop.f32.mrb[4].mxu0 }
 0x55d   : > { %v1254_v55 = vmul.f32 0.35355338, %v5085_v54  ;;  %v1244_v56 = vpop.f32.mrb[5].mxu0 }
 0x55e   : > { %v1253_v57 = vmul.f32 0.35355338, %v1244_v56 }
 0x55f   : > { %v1256_v58 = vadd.f32 %v1254_v55, %v6664_v35 }
 0x560   : > { %v1255_v59 = vadd.f32 %v1253_v57, %v6666_v38 }
 0x561   : > { %v1260_v60 = vsel %vm848_vm8, %v1256_v58, -inf }
 0x562   : > { %1261 = vmax.xlane.f32.xlu0 %v1260_v60  ;;  %v1257_v61 = vsel %vm848_vm8, %v1255_v59, -inf }
 0x563   : > { %1258 = vmax.xlane.f32.xlu1 %v1257_v61 }
 0x5ef   : > { %v1262_v62 = vpop.xlane.xlu0 %1261 }
 0x5f0   : > { %v1264_v63 = vsub.f32 %v1256_v58, %v1262_v62  ;;  %v1259_v7 = vpop.xlane.xlu1 %1258 }
 0x5f1   : > { %v1263_v8 = vsub.f32 %v1255_v59, %v1259_v7 }
 0x5f2   : > { %v1267_v9 = vmul.f32 1.442695, %v1264_v63 }
 0x5f3   : > { %v1265_v10 = vmul.f32 1.442695, %v1263_v8 }
 0x5f4   : > { %5741 = vpow2.f32 %v1267_v9  ;;  %v750_v9 = vld [vmem:[%s6588_s29] sm:$0xff] }
 0x5f5   : > { %5743 = vpow2.f32 %v1265_v10  ;;  %v751_v10 = vld [vmem:[%s6588_s29 + $0x8] sm:$0xff] }
 0x5fe   : > { %v5742_v11 = vpop.eup %5741 }
 0x5ff   : > { %v5744_v12 = vpop.eup %5743  ;;  %v1272_v13 = vsel %vm848_vm8, %v5742_v11, 0.0 }
 0x600   : > { %1273 = vadd.xlane.f32.xlu1 %v1272_v13  ;;  %v1269_v15 = vsel %vm848_vm8, %v5744_v12, 0.0  ;;  %v753_v13 = vld [vmem:[%s6588_s29 + $0x18] sm:$0xff] }
 0x601   : > { %1270 = vadd.xlane.f32.xlu0 %v1269_v15 }
 0x611   : > { %5716 = vrot.lane.b32.xlu1 %v6640_v19, %s6190_s22 }
 0x615   : > { %1366 = vrot.lane.b32.xlu1 %v6633_v18, %s6191_s23 }
 0x617   : > { %5711 = vrot.lane.b32.xlu0 %v6640_v19, %s6192_s20 }
 0x61b   : > { %1368 = vrot.lane.b32.xlu0 %v6631_v17, %s6191_s23 }
 0x68d   : > { %v1274_v20 = vpop.xlane.xlu1 %1273 }
 0x68e   : > { %5745 = vrcp.f32 %v1274_v20  ;;  %v1271_v21 = vpop.xlane.xlu0 %1270 }
 0x68f   : > { %5747 = vrcp.f32 %v1271_v21 }
 0x691   : > { %v5717_v22 = vpop.permute.xlu1 %5716 }
 0x692   : > { %v5712_v24 = vpop.permute.xlu0 %5711  ;;  %v5719_v25 = vunpack.i.h.bf16 %v5717_v22  ;;  %v5718_v26 = vunpack.i.l.bf16 %v5717_v22 }
 0x693   : > { %v5714_v27 = vunpack.i.h.bf16 %v5712_v24  ;;  %v5713_v28 = vunpack.i.l.bf16 %v5712_v24 }
 0x694   : > { %v5383_v30 = vpack.c.bf16 %v5719_v25, %v5718_v26 }
 0x695   : > { %v5379_v29 = vpack.c.bf16 %v5714_v27, %v5713_v28  ;;  %v1367_v34 = vpop.permute.xlu1 %1366 }
 0x696   : > { %v1369_v36 = vpop.permute.xlu0 %1368 }
 0x697   : > { %5380 = vmatprep.subr.bf16.mxu1 %v5379_v29 }
 0x698   : > { %v5746_v32 = vpop.eup %5745  ;;  %5382 = vmatpush3.bf16.msra.mxu1 %v5379_v29 }
 0x699   : > { %v5748_v18 = vpop.eup %5747  ;;  %5385 = vmatprep.subr.msk.bf16.mxu1 %vm6647_vm3, %v5383_v30  ;;  %v1278_v33 = vmul.f32 %v5746_v32, %v5742_v11  ;;  %v752_v11 = vld [vmem:[%s6588_s29 + $0x10] sm:$0xff] }
 0x69a   : > { %v1276_v17 = vmul.f32 %v5748_v18, %v5744_v12  ;;  %v5393_v12 = vpack.c.bf16 %v751_v10, %v750_v9  ;;  %v5397_v15 = vpack.c.bf16 %v753_v13, %v752_v11 }
 0x69c   : > { %5090 = vmatprep.mubr.msk.f32.mxu1 %vm848_vm8, %v1276_v17 }
 0x69d   : > { %5091 = vmatmul.mubr.msk.f32.vlgmr.msra.gmra.mrb[6].mxu1 %vm848_vm8, %v1278_v33 }
 0x69e   : > { %5097 = vmatprep.mubr.msk.f32.mxu1 %vm760_vm2, %v1367_v34  ;;  %v1602_v34 = vshrl.u32 %v636_v31, 7 }
 0x6a1   : > { %5388 = vmatpush3.bf16.xpose.msk.msra.mxu1 %vm6647_vm3, %v5383_v30 }
 0x6a8   : > { %5098 = vmatmul.mubr.msk.f32.vlgmr.msra.gmra.mrb[8].mxu1 %vm760_vm2, %v1369_v36  ;;  %v6745_v36 = vsub.s32 0, %v1602_v34 }
 0x770   : > { %v5092_v37 = vpop.f32.mrb[6].mxu1 }
 0x771   : > { %v1357_v39 = vpop.f32.mrb[7].mxu1 }
 0x77b   : > { %v5099_v40 = vpop.f32.mrb[8].mxu1 }
 0x77c   : > { %v1458_v41 = vmul.f32 0.35355338, %v5099_v40  ;;  %v1448_v42 = vpop.f32.mrb[9].mxu1 }
 0x77d   : > { %v1457_v43 = vmul.f32 0.35355338, %v1448_v42 }
 0x77e   : > { %v1460_v44 = vadd.f32 %v1458_v41, %v6664_v35 }
 0x77f   : > { %v1459_v45 = vadd.f32 %v1457_v43, %v6666_v38 }
 0x780   : > { %v1464_v46 = vsel %vm848_vm8, %v1460_v44, -inf }
 0x781   : > { %1465 = vmax.xlane.f32.xlu0 %v1464_v46  ;;  %v1461_v47 = vsel %vm848_vm8, %v1459_v45, -inf }
 0x782   : > { %1462 = vmax.xlane.f32.xlu1 %v1461_v47 }
 0x80e   : > { %v1466_v23 = vpop.xlane.xlu0 %1465 }
 0x80f   : > { %v1468_v48 = vsub.f32 %v1460_v44, %v1466_v23  ;;  %v1463_v49 = vpop.xlane.xlu1 %1462 }
 0x810   : > { %v1467_v54 = vsub.f32 %v1459_v45, %v1463_v49 }
 0x811   : > { %v1471_v55 = vmul.f32 1.442695, %v1468_v48 }
 0x812   : > { %v1469_v56 = vmul.f32 1.442695, %v1467_v54 }
 0x813   : > { %5749 = vpow2.f32 %v1471_v55  ;;  %v1727_v55 = vld [vmem:[%s6614_s30] sm:$0xff] }
 0x814   : > { %5751 = vpow2.f32 %v1469_v56  ;;  %v1728_v56 = vld [vmem:[%s6614_s30 + $0x8] sm:$0xff] }
 0x81d   : > { %v5750_v57 = vpop.eup %5749 }
 0x81e   : > { %v5752_v58 = vpop.eup %5751  ;;  %v1476_v35 = vsel %vm848_vm8, %v5750_v57, 0.0 }
 0x81f   : > { %1477 = vadd.xlane.f32.xlu1 %v1476_v35  ;;  %v1473_v38 = vsel %vm848_vm8, %v5752_v58, 0.0  ;;  %v1730_v35 = vld [vmem:[%s6614_s30 + $0x18] sm:$0xff] }
 0x820   : > { %1474 = vadd.xlane.f32.xlu0 %v1473_v38 }
 0x830   : > { %1572 = vrot.lane.b32.xlu1 %v6701_v53, %s6193_s4 }
 0x834   : > { %1574 = vrot.lane.b32.xlu1 %v6699_v52, %s6193_s4 }
 0x836   : > { %5721 = vrot.lane.b32.xlu0 %v6640_v19, %s6194_s8 }
 0x838   : > { %1582 = vrot.lane.b32.xlu1 %v5092_v37, %s6195_s17 }
 0x83a   : > { %1580 = vrot.lane.b32.xlu0 %v1357_v39, %s6195_s17 }
 0x8ac   : > { %v1478_v59 = vpop.xlane.xlu1 %1477 }
 0x8ad   : > { %5753 = vrcp.f32 %v1478_v59  ;;  %v1475_v60 = vpop.xlane.xlu0 %1474  ;;  %v1731_v59 = vld [vmem:[%s6607_s13] sm:$0xff] }
 0x8ae   : > { %5755 = vrcp.f32 %v1475_v60  ;;  %v1732_v60 = vld [vmem:[%s6607_s13 + $0x8] sm:$0xff] }
 0x8b0   : > { %v1573_v22 = vpop.permute.xlu1 %1572 }
 0x8b1   : > { %v5722_v61 = vpop.permute.xlu0 %5721  ;;  %v1594_v27 = vsel %vm760_vm2, %v6697_v51, %v1573_v22  ;;  %v1604_v51 = vrot.slane %v6572_v0, %v6745_v36  ;;  %v1724_v22 = vrot.slane %v6578_v2, %v6745_v36 }
 0x8b2   : > { %v5724_v62 = vunpack.i.h.bf16 %v5722_v61  ;;  %v5723_v63 = vunpack.i.l.bf16 %v5722_v61  ;;  %v1733_v61 = vld [vmem:[%s6607_s13 + $0x10] sm:$0xff] }
 0x8b4   : > { %v5389_v53 = vpack.c.bf16 %v5724_v62, %v5723_v63  ;;  %v1575_v24 = vpop.permute.xlu1 %1574  ;;  %v5409_v62 = vpack.c.bf16 %v1732_v60, %v1731_v59  ;;  %v1734_v63 = vld [vmem:[%s6607_s13 + $0x18] sm:$0xff] }
 0x8b5   : > { %v1581_v26 = vpop.permute.xlu0 %1580  ;;  %v1595_v29 = vsel %vm760_vm2, %v6695_v50, %v1575_v24 }
 0x8b6   : > { %5390 = vmatprep.subr.bf16.mxu0 %v5389_v53  ;;  %v1596_v30 = vsel %vm848_vm8, %v1594_v27, %v1581_v26 }
 0x8b7   : > { %v5754_v52 = vpop.eup %5753  ;;  %5392 = vmatpush3.bf16.msra.mxu0 %v5389_v53  ;;  %v5413_v53 = vpack.c.bf16 %v1734_v63, %v1733_v61  ;;  %v1943_v63 = vrot.slane %v6597_v5, %v6745_v36 }
 0x8b8   : > { %v5756_v7 = vpop.eup %5755  ;;  %v1482_v8 = vmul.f32 %v5754_v52, %v5750_v57  ;;  %5394 = vmatprep.subr.bf16.mxu0 %v5393_v12  ;;  %v1583_v25 = vpop.permute.xlu1 %1582  ;;  %v5401_v57 = vpack.c.bf16 %v1728_v56, %v1727_v55  ;;  %v1735_v52 = vld [vmem:[%s6607_s13 + $0x20] sm:$0xff] }
 0x8b9   : > { %v1480_v19 = vmul.f32 %v5756_v7, %v5752_v58  ;;  %v1597_v18 = vsel %vm848_vm8, %v1595_v29, %v1583_v25  ;;  %v1729_v58 = vld [vmem:[%s6614_s30 + $0x10] sm:$0xff]  ;;  %v1736_v7 = vld [vmem:[%s6607_s13 + $0x28] sm:$0xff] }
 0x8ba   : > { %5402 = vmatprep.subr.bf16.mxu1 %v5401_v57  ;;  %v5405_v38 = vpack.c.bf16 %v1730_v35, %v1729_v58 }
 0x8bb   : > { %5104 = vmatprep.mubr.msk.f32.mxu0 %vm848_vm8, %v1480_v19  ;;  %5404 = vmatpush3.bf16.msra.mxu1 %v5401_v57  ;;  %v5417_v19 = vpack.c.bf16 %v1736_v7, %v1735_v52  ;;  %v1949_v7 = vrot.slane %v6610_v6, %v6745_v36 }
 0x8bc   : > { %5105 = vmatmul.mubr.msk.f32.vlgmr.msra.gmra.mrb[6].mxu0 %vm848_vm8, %v1482_v8  ;;  %5406 = vmatprep.subr.bf16.mxu1 %v5405_v38 }
 0x8bd   : > { %5396 = vmatpush3.bf16.msra.mxu0 %v5393_v12 }
 0x8be   : > { %5398 = vmatprep.subr.bf16.mxu0 %v5397_v15 }
 0x8bf   : > { %5408 = vmatpush3.bf16.msra.mxu1 %v5405_v38 }
 0x8c1   : > { %5400 = vmatpush3.bf16.msra.mxu0 %v5397_v15  ;;  %v1718_v15 = vrot.slane %v6575_v1, %v6745_v36 }
 0x8c2   : > { %5410 = vmatprep.subr.bf16.mxu0 %v5409_v62 }
 0x98f   : > { %v5106_v20 = vpop.f32.mrb[6].mxu0 }
 0x990   : > { %1590 = vrot.lane.b32.xlu1 %v5106_v20, %s6196_s10  ;;  %v1561_v21 = vpop.f32.mrb[7].mxu0 }
 0x991   : > { %1588 = vrot.lane.b32.xlu0 %v1561_v21, %s6196_s10 }
 0xa02   : > { %v1591_v28 = vpop.permute.xlu1 %1590 }
 0xa03   : > { %v1589_v32 = vpop.permute.xlu0 %1588  ;;  %v1600_v33 = vsel %vm1598_vm9, %v1597_v18, %v1591_v28 }
 0xa04   : > { %v1599_v17 = vsel %vm1598_vm9, %v1596_v30, %v1589_v32  ;;  %v1737_v30 = vld [vmem:[%s6607_s13 + $0x30] sm:$0xff]  ;;  %v1738_v32 = vld [vmem:[%s6607_s13 + $0x38] sm:$0xff] }
 0xa05   : > { %5115 = vmatprep.mubr.msk.f32.mxu0 %vm668_vm1, %v1599_v17  ;;  %v5421_v18 = vpack.c.bf16 %v1738_v32, %v1737_v30  ;;  %v1742_v17 = vrot.slane %v6591_v3, %v6745_v36 }
 0xa06   : > { %5116 = vmatmul.mubr.msk.f32.vlgmr.msra.gmra.mrb[8].mxu0 %vm668_vm1, %v1600_v33 }
 0xa07   : > { %5412 = vmatpush3.bf16.msra.mxu0 %v5409_v62 }
 0xa08   : > { %5414 = vmatprep.subr.bf16.mxu0 %v5413_v53 }
 0xa0b   : > { %5416 = vmatpush3.bf16.msra.mxu0 %v5413_v53 }
 0xa0c   : > { %5418 = vmatprep.subr.bf16.mxu0 %v5417_v19 }
 0xa0f   : > { %5420 = vmatpush3.bf16.msra.mxu0 %v5417_v19 }
 0xa10   : > { %5422 = vmatprep.subr.bf16.mxu0 %v5421_v18 }
 0xa13   : > { %5424 = vmatpush3.bf16.msra.mxu0 %v5421_v18 }
 0xad9   : > { %v5117_v37 = vpop.f32.mrb[8].mxu0 }
 0xada   : > { %v1683_v50 = vadd.f32 %v5117_v37, %v1604_v51  ;;  %v1677_v39 = vpop.f32.mrb[9].mxu0 }
 0xadb   : > { %v1678_v40 = vadd.f32 %v1677_v39, %v1604_v51 }
 0xadc   : > { %v1687_v41 = vadd.f32 %v1683_v50, %v6627_v16 }
 0xadd   : > { %v1686_v42 = vadd.f32 %v1678_v40, %v6623_v14  ;;  %v1829_v40 = vrot.slane %v6594_v4, %v6745_v36 }
 0xade   : > { %v1691_v43 = vsel %vm668_vm1, %v1687_v41, 0.0 }
 0xadf   : > { %1692 = vadd.xlane.f32.xlu1 %v1691_v43  ;;  %v1688_v31 = vsel %vm668_vm1, %v1686_v42, 0.0 }
 0xae0   : > { %1689 = vadd.xlane.f32.xlu0 %v1688_v31 }
 0xb6c   : > { %v1693_v44 = vpop.xlane.xlu1 %1692 }
 0xb6d   : > { %v1696_v45 = vmul.f32 0.03125, %v1693_v44  ;;  %v1690_v46 = vpop.xlane.xlu0 %1689 }
 0xb6e   : > { %v1695_v47 = vmul.f32 0.03125, %v1690_v46 }
 0xb6f   : > { %v1698_v23 = vsub.f32 %v1687_v41, %v1696_v45 }
 0xb70   : > { %v1697_v48 = vsub.f32 %v1686_v42, %v1695_v47 }
 0xb71   : > { %v1700_v16 = vmul.f32 %v1698_v23, %v1698_v23 }
 0xb72   : > { %v1699_v49 = vmul.f32 %v1697_v48, %v1697_v48 }
 0xb73   : > { %v1704_v54 = vsel %vm668_vm1, %v1700_v16, 0.0 }
 0xb74   : > { %v1701_v14 = vsel %vm668_vm1, %v1699_v49, 0.0 }
 0xb75   : > { %1702 = vadd.xlane.f32.xlu0 %v1701_v14 }
 0xb79   : > { %1705 = vadd.xlane.f32.xlu0 %v1704_v54 }
 0xc02   : > { %v1703_v8 = vpop.xlane.xlu0 %1702 }
 0xc03   : > { %v1707_v9 = vmul.f32 0.03125, %v1703_v8 }
 0xc05   : > { %v1709_v10 = vadd.f32 1e-05, %v1707_v9 }
 0xc06   : > { %v1706_v11 = vpop.xlane.xlu0 %1705 }
 0xc07   : > { %5757 = vrsqrt.f32 %v1709_v10  ;;  %v1708_v12 = vmul.f32 0.03125, %v1706_v11 }
 0xc09   : > { %v1710_v13 = vadd.f32 1e-05, %v1708_v12 }
 0xc0b   : > { %5759 = vrsqrt.f32 %v1710_v13 }
 0xc11   : > { %v5758_v20 = vpop.eup %5757 }
 0xc12   : > { %v1713_v21 = vmul.f32 %v5758_v20, %v1697_v48 }
 0xc14   : > { %v1719_v24 = vmul.f32 %v1718_v15, %v1713_v21 }
 0xc15   : > { %v5760_v25 = vpop.eup %5759 }
 0xc16   : > { %v1714_v26 = vmul.f32 %v5760_v25, %v1698_v23  ;;  %v1725_v27 = vadd.f32 %v1724_v22, %v1719_v24 }
 0xc18   : > { %v1720_v28 = vmul.f32 %v1718_v15, %v1714_v26  ;;  %5126 = vmatprep.mubr.msk.f32.mxu1 %vm668_vm1, %v1725_v27 }
 0xc1a   : > { %v1726_v29 = vadd.f32 %v1724_v22, %v1720_v28 }
 0xc1c   : > { %5127 = vmatmul.mubr.msk.f32.vlgmr.msra.gmra.mrb[10].mxu1 %vm668_vm1, %v1726_v29 }
 0xcef   : > { %v5128_v33 = vpop.f32.mrb[10].mxu1 }
 0xcf0   : > { %v1821_v34 = vadd.f32 %v5128_v33, %v1742_v17  ;;  %v1815_v51 = vpop.f32.mrb[11].mxu1 }
 0xcf1   : > { %v1816_v37 = vadd.f32 %v1815_v51, %v1742_v17 }
 0xcf2   : > { %v1825_v39 = vmax.f32 %v1821_v34, 0.0 }
 0xcf3   : > { %v1824_v50 = vmax.f32 %v1816_v37, 0.0 }
 0xcf5   : > { %5145 = vmatprep.mubr.msk.f32.mxu0 %vm1830_vm10, %v1824_v50 }
 0xcf6   : > { %5146 = vmatmul.mubr.msk.f32.vlgmr.msra.gmra.mrb[10].mxu0 %vm1830_vm10, %v1825_v39 }
 0xdc9   : > { %v5147_v41 = vpop.f32.mrb[10].mxu0 }
 0xdca   : > { %v1909_v42 = vadd.f32 %v5147_v41, %v1829_v40  ;;  %v1903_v43 = vpop.f32.mrb[11].mxu0 }
 0xdcb   : > { %v1904_v31 = vadd.f32 %v1903_v43, %v1829_v40 }
 0xdcc   : > { %v1913_v44 = vadd.f32 %v1909_v42, %v1726_v29 }
 0xdcd   : > { %v1912_v45 = vadd.f32 %v1904_v31, %v1725_v27 }
 0xdce   : > { %v1917_v46 = vsel %vm668_vm1, %v1913_v44, 0.0 }
 0xdcf   : > { %1918 = vadd.xlane.f32.xlu0 %v1917_v46  ;;  %v1914_v47 = vsel %vm668_vm1, %v1912_v45, 0.0 }
 0xdd0   : > { %1915 = vadd.xlane.f32.xlu1 %v1914_v47 }
 0xe5c   : > { %v1919_v23 = vpop.xlane.xlu0 %1918 }
 0xe5d   : > { %v1921_v48 = vmul.f32 0.03125, %v1919_v23  ;;  %v1916_v49 = vpop.xlane.xlu1 %1915 }
 0xe5e   : > { %v1920_v14 = vmul.f32 0.03125, %v1916_v49 }
 0xe5f   : > { %v1923_v16 = vsub.f32 %v1913_v44, %v1921_v48 }
 0xe60   : > { %v1922_v54 = vsub.f32 %v1912_v45, %v1920_v14 }
 0xe61   : > { %v1925_v55 = vmul.f32 %v1923_v16, %v1923_v16 }
 0xe62   : > { %v1924_v56 = vmul.f32 %v1922_v54, %v1922_v54 }
 0xe63   : > { %v1929_v57 = vsel %vm668_vm1, %v1925_v55, 0.0 }
 0xe64   : > { %1930 = vadd.xlane.f32.xlu0 %v1929_v57  ;;  %v1926_v58 = vsel %vm668_vm1, %v1924_v56, 0.0 }
 0xe65   : > { %1927 = vadd.xlane.f32.xlu1 %v1926_v58 }
 0xef1   : > { %v1931_v35 = vpop.xlane.xlu0 %1930 }
 0xef2   : > { %v1933_v38 = vmul.f32 0.03125, %v1931_v35  ;;  %v1928_v59 = vpop.xlane.xlu1 %1927 }
 0xef3   : > { %v1932_v60 = vmul.f32 0.03125, %v1928_v59 }
 0xef4   : > { %v1935_v61 = vadd.f32 1e-05, %v1933_v38 }
 0xef5   : > { %v1934_v62 = vadd.f32 1e-05, %v1932_v60 }
 0xef6   : > { %5761 = vrsqrt.f32 %v1935_v61 }
 0xef7   : > { %5763 = vrsqrt.f32 %v1934_v62 }
 0xf00   : > { %v5762_v53 = vpop.eup %5761  ;;  %1955 = sbr.rel (%p4784_p1) target bundleno = 3849 (0xf09), region = 100 }
 0xf01   : > { %v5764_v52 = vpop.eup %5763  ;;  %v1939_v19 = vmul.f32 %v5762_v53, %v1923_v16 }
 0xf02   : > { %v1938_v8 = vmul.f32 %v5764_v52, %v1922_v54 }
 0xf03   : > { %v1945_v9 = vmul.f32 %v1943_v63, %v1939_v19 }
 0xf04   : > { %v1944_v10 = vmul.f32 %v1943_v63, %v1938_v8 }
 0xf05   : > { %v1951_v11 = vadd.f32 %v1949_v7, %v1945_v9 }
 0xf06   : > { %v1950_v12 = vadd.f32 %v1949_v7, %v1944_v10 }
 0xf07   : > { %1957 = vst.msk [vmem:[#allocation2 + $0x8] sm:$0xff] %vm668_vm1, %v1951_v11 }
 0xf08   : > { %1956 = vst.msk [vmem:[#allocation2] sm:$0xff] %vm668_vm1, %v1950_v12 }
 0xf09 PF: > { %p4785_p8 = scmp.ne.s32.totalorder %s6294_s21, 1 }
 0xf0a   : > { %v1964_v13 = vsel (!%p4785_p8), %vm668_vm1, %v1950_v12, 0.0  ;;  %v1967_v36 = vsel (!%p4785_p8), %vm668_vm1, %v1951_v11, 0.0  ;;  %s7258_s26 = sld [smem:[#allocation26_spill]] (!%p4785_p8) }
 0xf0b   : > { %1961 = sbr.rel (%p4785_p8) target bundleno = 4168 (0x1048), region = 104  ;;  %1965 = vadd.xlane.f32.xlu0 (!%p4785_p8), %v1964_v13 }
 0xf0f   : > { %1968 = vadd.xlane.f32.xlu0 (!%p4785_p8), %v1967_v36 }
 0xf10   : > { %v4786_v37 = vld [vmem:[%s7258_s26] ss:$0 sm:$0xff] (!%p4785_p8)  ;;  %v4787_v39 = vld [vmem:[%s7258_s26 + $0x1] ss:$0 sm:$0xff] (!%p4785_p8) }
 0xf98   : > { %v1966_v15 = vpop.xlane.xlu0 %1965 }
 0xf99   : > { %v1970_v20 = vmul.f32 0.03125, %v1966_v15 }
 0xf9b   : > { %v1972_v21 = vsub.f32 %v1950_v12, %v1970_v20 }
 0xf9c   : > { %v1969_v22 = vpop.xlane.xlu0 %1968 }
 0xf9d   : > { %v1971_v24 = vmul.f32 0.03125, %v1969_v22  ;;  %v1974_v25 = vmul.f32 %v1972_v21, %v1972_v21 }
 0xf9f   : > { %v1973_v26 = vsub.f32 %v1951_v11, %v1971_v24  ;;  %v1976_v27 = vsel %vm668_vm1, %v1974_v25, 0.0 }
 0xfa0   : > { %1977 = vadd.xlane.f32.xlu1 %v1976_v27 }
 0xfa1   : > { %v1975_v28 = vmul.f32 %v1973_v26, %v1973_v26 }
 0xfa3   : > { %v1979_v29 = vsel %vm668_vm1, %v1975_v28, 0.0 }
 0xfa4   : > { %1980 = vadd.xlane.f32.xlu1 %v1979_v29 }
0x102d   : > { %v1978_v30 = vpop.xlane.xlu1 %1977 }
0x102e   : > { %v1982_v32 = vmul.f32 0.03125, %v1978_v30 }
0x1030   : > { %v1984_v18 = vadd.f32 1e-05, %v1982_v32 }
0x1031   : > { %v1981_v17 = vpop.xlane.xlu1 %1980 }
0x1032   : > { %5765 = vrsqrt.f32 %v1984_v18  ;;  %v1983_v33 = vmul.f32 0.03125, %v1981_v17 }
0x1034   : > { %v1985_v34 = vadd.f32 1e-05, %v1983_v33 }
0x1036   : > { %5767 = vrsqrt.f32 %v1985_v34 }
0x103c   : > { %v5766_v51 = vpop.eup %5765 }
0x103d   : > { %v1988_v50 = vmul.f32 %v5766_v51, %v1972_v21 }
0x103f   : > { %v1994_v40 = vmul.f32 %v4786_v37, %v1988_v50 }
0x1040   : > { %v5768_v41 = vpop.eup %5767 }
0x1041   : > { %v2000_v42 = vadd.f32 %v4787_v39, %v1994_v40  ;;  %v1989_v43 = vmul.f32 %v5768_v41, %v1973_v26 }
0x1043   : > { %2002 = vst.msk [vmem:[#allocation2] sm:$0xff] %vm668_vm1, %v2000_v42  ;;  %v1995_v31 = vmul.f32 %v4786_v37, %v1989_v43 }
0x1045   : > { %v2001_v44 = vadd.f32 %v4787_v39, %v1995_v31 }
0x1047   : > { %2003 = vst.msk [vmem:[#allocation2 + $0x8] sm:$0xff] %vm668_vm1, %v2001_v44 }
0x1048 PF: > { %p4788_p11 = scmp.lt.s32.totalorder %s6294_s21, 2 }
0x1049   : > { %p4789_p10 = scmp.ne.s32.totalorder (!%p4788_p11), %s6294_s21, 2 }
0x104a   : > { %2007 = sbr.rel (%p4788_p11) target bundleno = 10950 (0x2ac6), region = 108 }
0x1051   : > { %2011 = sbr.rel (%p4789_p10) target bundleno = 4184 (0x1058), region = 112  ;;  %v2012_v45 = vld [vmem:[#allocation7] sm:$0xff] (!%p4789_p10)  ;;  %vm2014_vm11 = vcmask (!%p4789_p10), 261120   ;;  %v2013_v46 = vld [vmem:[#allocation7 + $0x8] sm:$0xff] (!%p4789_p10) }
0x1052   : > { %2015 = vst.msk [vmem:[#allocation3] sm:$0xff] (!%p4789_p10), %vm2014_vm11, %v2012_v45  ;;  %2016 = vst.msk [vmem:[#allocation3 + $0x8] sm:$0xff] (!%p4789_p10), %vm2014_vm11, %v2013_v46 }
0x1058 PF: > { %v2052_v47 = vld [vmem:[%s6583_s11] sm:$0xff]  ;;  %v2053_v23 = vld [vmem:[%s6583_s11 + $0x8] sm:$0xff]  ;;  %v2054_v48 = vld [vmem:[%s6583_s11 + $0x10] sm:$0xff]  ;;  %vm2056_vm12 = vcmask 261120   ;;  %vm2148_vm13 = vcmask 64512   ;;  %s6198_s2 = smov 96   ;;  %v2024_v8 = vlaneseq }
0x1059   : > { %v5425_v49 = vpack.c.bf16 %v2053_v23, %v2052_v47  ;;  %v2055_v14 = vld [vmem:[%s6583_s11 + $0x18] sm:$0xff]  ;;  %v6807_v16 = vld [vmem:[#allocation3] sm:$0xff]  ;;  %s6197_s11 = smov 120   ;;  %s6199_s27 = smov 88   ;;  %vm6835_vm14 = vmpackc.low %vm2148_vm13, %vm2148_vm13  ;;  %v6200_v11 = vmov -1e+30  }
0x105a   : > { %v5429_v54 = vpack.c.bf16 %v2055_v14, %v2054_v48  ;;  %5156 = vmatprep.mubr.msk.f32.mxu1 %vm2056_vm12, %v6807_v16  ;;  %v6811_v55 = vld [vmem:[#allocation3 + $0x8] sm:$0xff]  ;;  %v2025_v9 = vand.u32 127, %v2024_v8  ;;  %vm2236_vm3 = vcmask 130048   ;;  %s6201_s0 = smov 64   ;;  %s6202_s12 = smov 80   ;;  %vm2986_vm4 = vcmask 195584  }
0x105b   : > { %5426 = vmatprep.subr.bf16.mxu1 %v5425_v49  ;;  %s6203_s22 = smov 56   ;;  %s6204_s23 = smov 112   ;;  %vm4362_vm5 = vcmask 523264  }
0x105c   : > { %5428 = vmatpush3.bf16.msra.mxu1 %v5425_v49  ;;  %vm2043_vm15 = vcmp.ge.s32.totalorder %v2025_v9, 8  ;;  %vm2044_vm0 = vcmp.lt.s32.totalorder %v2025_v9, 16  ;;  %vm2033_vm2 = vcmp.lt.s32.totalorder %v2025_v9, 8  ;;  %s6205_s20 = smov 72   ;;  %s6206_s4 = smov 104  }
0x105d   : > { %5430 = vmatprep.subr.bf16.mxu1 %v5429_v54  ;;  %vm2045_vm1 = vmand %vm2043_vm15, %vm2044_vm0  ;;  %v6854_v15 = vsel %vm2033_vm2, 0.0, %v6200_v11  ;;  %s6207_s8 = smov 48   ;;  %s6208_s17 = smov 8  }
0x105e   : > { %v6852_v12 = vsel %vm2045_vm1, 0.0, %v6200_v11  ;;  %s6209_s10 = smov 40   ;;  %s6210_s5 = smov 16  }
0x105f   : > { %s6211_s15 = smov 24   ;;  %p4855_p3 = scmp.ne.s32.totalorder %s6294_s21, 3 }
0x1060   : > { %5432 = vmatpush3.bf16.msra.mxu1 %v5429_v54 }
0x1063   : > { %5157 = vmatmul.mubr.msk.f32.vlgmr.msra.gmra.mrb[0].mxu1 %vm2056_vm12, %v6811_v55 }
0x1136   : > { %v6815_v56 = vpop.f32.mrb[0].mxu1 }
0x1137   : > { %v6817_v57 = vpop.f32.mrb[1].mxu1 }
0x1138   : > { %2346 = vrot.lane.b32.xlu1 %v6817_v57, %s6197_s11  ;;  %5163 = vmatprep.mubr.msk.f32.mxu1 %vm2148_vm13, %v6817_v57  ;;  %v6825_v58 = vpack.i.bf16 %v6815_v56, %v6817_v57 }
0x113a   : > { %5770 = vrot.lane.b32.xlu0 %v6825_v58, %s6198_s2 }
0x113c   : > { %2348 = vrot.lane.b32.xlu1 %v6815_v56, %s6197_s11 }
0x113e   : > { %5775 = vrot.lane.b32.xlu0 %v6825_v58, %s6199_s27 }
0x11aa   : > { %v2347_v7 = vpop.permute.xlu1 %2346 }
0x11ac   : > { %v5771_v35 = vpop.permute.xlu0 %5770 }
0x11ad   : > { %v5773_v38 = vunpack.i.h.bf16 %v5771_v35  ;;  %v5772_v59 = vunpack.i.l.bf16 %v5771_v35 }
0x11ae   : > { %v2349_v19 = vpop.permute.xlu1 %2348 }
0x11af   : > { %v5433_v61 = vpack.c.bf16 %v5773_v38, %v5772_v59 }
0x11b0   : > { %v5776_v62 = vpop.permute.xlu0 %5775 }
0x11b1   : > { %v5778_v63 = vunpack.i.h.bf16 %v5776_v62  ;;  %v5777_v53 = vunpack.i.l.bf16 %v5776_v62  ;;  %5435 = vmatprep.subr.msk.bf16.mxu1 %vm6835_vm14, %v5433_v61 }
0x11b2   : > { %5438 = vmatpush3.bf16.xpose.msk.msra.mxu1 %vm6835_vm14, %v5433_v61 }
0x11b3   : > { %v5443_v52 = vpack.c.bf16 %v5778_v63, %v5777_v53 }
0x11b5   : > { %5445 = vmatprep.subr.msk.bf16.mxu1 %vm6835_vm14, %v5443_v52 }
0x11b9   : > { %5164 = vmatmul.mubr.msk.f32.vlgmr.msra.gmra.mrb[2].mxu1 %vm2148_vm13, %v6815_v56 }
0x11ba   : > { %5448 = vmatpush3.bf16.xpose.msk.msra.mxu1 %vm6835_vm14, %v5443_v52  ;;  %5177 = vmatprep.mubr.msk.f32.mxu1 %vm2148_vm13, %v2347_v7 }
0x11c1   : > { %5178 = vmatmul.mubr.msk.f32.vlgmr.msra.gmra.mrb[4].mxu1 %vm2148_vm13, %v2349_v19 }
0x128c   : > { %v5165_v10 = vpop.f32.mrb[2].mxu1 }
0x128d   : > { %v2233_v13 = vmul.f32 0.35355338, %v5165_v10  ;;  %v2223_v36 = vpop.f32.mrb[3].mxu1 }
0x128e   : > { %v2232_v20 = vmul.f32 0.35355338, %v2223_v36 }
0x128f   : > { %v2235_v21 = vadd.f32 %v2233_v13, %v6852_v12 }
0x1290   : > { %v2234_v22 = vadd.f32 %v2232_v20, %v6854_v15 }
0x1291   : > { %v2240_v24 = vsel %vm2236_vm3, %v2235_v21, -inf }
0x1292   : > { %2241 = vmax.xlane.f32.xlu1 %v2240_v24  ;;  %v2237_v25 = vsel %vm2236_vm3, %v2234_v22, -inf }
0x1293   : > { %2238 = vmax.xlane.f32.xlu0 %v2237_v25 }
0x1294   : > { %v5179_v26 = vpop.f32.mrb[4].mxu1 }
0x1295   : > { %v2428_v27 = vpop.f32.mrb[5].mxu1  ;;  %v2438_v28 = vmul.f32 0.35355338, %v5179_v26 }
0x1296   : > { %v2437_v29 = vmul.f32 0.35355338, %v2428_v27 }
0x1297   : > { %v2440_v18 = vadd.f32 %v2438_v28, %v6852_v12 }
0x1298   : > { %v2439_v30 = vadd.f32 %v2437_v29, %v6854_v15 }
0x1299   : > { %v2444_v17 = vsel %vm2236_vm3, %v2440_v18, -inf }
0x129a   : > { %v2441_v32 = vsel %vm2236_vm3, %v2439_v30, -inf }
0x129b   : > { %2442 = vmax.xlane.f32.xlu0 %v2441_v32 }
0x129f   : > { %2445 = vmax.xlane.f32.xlu0 %v2444_v17 }
0x12a3   : > { %5780 = vrot.lane.b32.xlu1 %v6825_v58, %s6201_s0 }
0x131f   : > { %v2242_v33 = vpop.xlane.xlu1 %2241 }
0x1320   : > { %v2244_v34 = vsub.f32 %v2235_v21, %v2242_v33  ;;  %v2239_v51 = vpop.xlane.xlu0 %2238 }
0x1321   : > { %v2243_v37 = vsub.f32 %v2234_v22, %v2239_v51 }
0x1322   : > { %v2247_v50 = vmul.f32 1.442695, %v2244_v34 }
0x1323   : > { %v2245_v39 = vmul.f32 1.442695, %v2243_v37  ;;  %v5781_v40 = vpop.permute.xlu1 %5780 }
0x1324   : > { %5844 = vpow2.f32 %v2247_v50  ;;  %v5783_v41 = vunpack.i.h.bf16 %v5781_v40  ;;  %v5782_v42 = vunpack.i.l.bf16 %v5781_v40 }
0x1325   : > { %5846 = vpow2.f32 %v2245_v39 }
0x1326   : > { %v5439_v43 = vpack.c.bf16 %v5783_v41, %v5782_v42 }
0x1328   : > { %5440 = vmatprep.subr.bf16.mxu0 %v5439_v43  ;;  %v2443_v31 = vpop.xlane.xlu0 %2442 }
0x1329   : > { %5442 = vmatpush3.bf16.msra.mxu0 %v5439_v43  ;;  %v2447_v35 = vsub.f32 %v2439_v30, %v2443_v31 }
0x132b   : > { %v2449_v38 = vmul.f32 1.442695, %v2447_v35 }
0x132c   : > { %v2446_v44 = vpop.xlane.xlu0 %2445 }
0x132d   : > { %v2448_v45 = vsub.f32 %v2440_v18, %v2446_v44 }
0x132e   : > { %v5845_v46 = vpop.eup %5844 }
0x132f   : > { %v5847_v47 = vpop.eup %5846  ;;  %v2451_v23 = vmul.f32 1.442695, %v2448_v45  ;;  %v2252_v48 = vsel %vm2236_vm3, %v5845_v46, 0.0 }
0x1330   : > { %2253 = vadd.xlane.f32.xlu0 %v2252_v48  ;;  %v2249_v49 = vsel %vm2236_vm3, %v5847_v47, 0.0 }
0x1331   : > { %5848 = vpow2.f32 %v2451_v23  ;;  %2250 = vadd.xlane.f32.xlu1 %v2249_v49 }
0x1332   : > { %5850 = vpow2.f32 %v2449_v38 }
0x133b   : > { %v5849_v14 = vpop.eup %5848 }
0x133c   : > { %v2456_v54 = vsel %vm2236_vm3, %v5849_v14, 0.0  ;;  %v5851_v59 = vpop.eup %5850 }
0x133d   : > { %2457 = vadd.xlane.f32.xlu0 %v2456_v54  ;;  %v2453_v61 = vsel %vm2236_vm3, %v5851_v59, 0.0 }
0x1342   : > { %5790 = vrot.lane.b32.xlu1 %v6825_v58, %s6202_s12 }
0x1353   : > { %5785 = vrot.lane.b32.xlu0 %v6825_v58, %s6203_s22 }
0x1357   : > { %2552 = vrot.lane.b32.xlu0 %v6815_v56, %s6204_s23 }
0x1366   : > { %2454 = vadd.xlane.f32.xlu1 %v2453_v61 }
0x1377   : > { %2550 = vrot.lane.b32.xlu1 %v6817_v57, %s6204_s23 }
0x13bd   : > { %v2254_v62 = vpop.xlane.xlu0 %2253 }
0x13be   : > { %5852 = vrcp.f32 %v2254_v62  ;;  %v2251_v63 = vpop.xlane.xlu1 %2250 }
0x13bf   : > { %5854 = vrcp.f32 %v2251_v63 }
0x13c2   : > { %v5791_v10 = vpop.permute.xlu1 %5790 }
0x13c3   : > { %v5793_v13 = vunpack.i.h.bf16 %v5791_v10  ;;  %v5792_v36 = vunpack.i.l.bf16 %v5791_v10 }
0x13c5   : > { %v5453_v24 = vpack.c.bf16 %v5793_v13, %v5792_v36 }
0x13c8   : > { %v5853_v53 = vpop.eup %5852 }
0x13c9   : > { %v5855_v52 = vpop.eup %5854  ;;  %v2258_v9 = vmul.f32 %v5853_v53, %v5845_v46 }
0x13ca   : > { %v2458_v7 = vpop.xlane.xlu0 %2457  ;;  %v2256_v19 = vmul.f32 %v5855_v52, %v5847_v47 }
0x13cb   : > { %5856 = vrcp.f32 %v2458_v7 }
0x13cc   : > { %5170 = vmatprep.mubr.msk.f32.mxu0 %vm2236_vm3, %v2256_v19 }
0x13cd   : > { %5171 = vmatmul.mubr.msk.f32.vlgmr.msra.gmra.mrb[0].mxu0 %vm2236_vm3, %v2258_v9 }
0x13ce   : > { %v5786_v11 = vpop.permute.xlu0 %5785 }
0x13cf   : > { %v5788_v20 = vunpack.i.h.bf16 %v5786_v11  ;;  %v5787_v21 = vunpack.i.l.bf16 %v5786_v11 }
0x13d1   : > { %v5449_v22 = vpack.c.bf16 %v5788_v20, %v5787_v21 }
0x13d2   : > { %v2553_v32 = vpop.permute.xlu0 %2552 }
0x13d3   : > { %5450 = vmatprep.subr.bf16.mxu0 %v5449_v22 }
0x13d4   : > { %5452 = vmatpush3.bf16.msra.mxu0 %v5449_v22 }
0x13d5   : > { %5455 = vmatprep.subr.msk.bf16.mxu0 %vm6835_vm14, %v5453_v24  ;;  %v5857_v26 = vpop.eup %5856 }
0x13d6   : > { %v2462_v29 = vmul.f32 %v5857_v26, %v5849_v14 }
0x13f3   : > { %v2455_v25 = vpop.xlane.xlu1 %2454 }
0x13f4   : > { %5858 = vrcp.f32 %v2455_v25 }
0x13f7   : > { %v2551_v30 = vpop.permute.xlu1 %2550 }
0x13fe   : > { %v5859_v27 = vpop.eup %5858 }
0x13ff   : > { %v2460_v28 = vmul.f32 %v5859_v27, %v5851_v59 }
0x1401   : > { %5184 = vmatprep.mubr.msk.f32.mxu0 %vm2236_vm3, %v2460_v28 }
0x1402   : > { %5185 = vmatmul.mubr.msk.f32.vlgmr.msra.gmra.mrb[2].mxu0 %vm2236_vm3, %v2462_v29 }
0x1403   : > { %5458 = vmatpush3.bf16.xpose.msk.msra.mxu0 %vm6835_vm14, %v5453_v24  ;;  %5191 = vmatprep.mubr.msk.f32.mxu0 %vm2148_vm13, %v2551_v30 }
0x140a   : > { %5192 = vmatmul.mubr.msk.f32.vlgmr.msra.gmra.mrb[4].mxu0 %vm2148_vm13, %v2553_v32 }
0x14a0   : > { %v6886_v18 = vpop.f32.mrb[0].mxu0 }
0x14a1   : > { %v6888_v17 = vpop.f32.mrb[1].mxu0 }
0x14d5   : > { %v6890_v33 = vpop.f32.mrb[2].mxu0 }
0x14d6   : > { %v6892_v34 = vpop.f32.mrb[3].mxu0 }
0x14dd   : > { %v5193_v51 = vpop.f32.mrb[4].mxu0 }
0x14de   : > { %v2642_v37 = vmul.f32 0.35355338, %v5193_v51  ;;  %v2632_v50 = vpop.f32.mrb[5].mxu0 }
0x14df   : > { %v2641_v39 = vmul.f32 0.35355338, %v2632_v50 }
0x14e0   : > { %v2644_v40 = vadd.f32 %v2642_v37, %v6852_v12 }
0x14e1   : > { %v2643_v41 = vadd.f32 %v2641_v39, %v6854_v15 }
0x14e2   : > { %v2648_v42 = vsel %vm2236_vm3, %v2644_v40, -inf }
0x14e3   : > { %2649 = vmax.xlane.f32.xlu0 %v2648_v42  ;;  %v2645_v43 = vsel %vm2236_vm3, %v2643_v41, -inf }
0x14e4   : > { %2646 = vmax.xlane.f32.xlu1 %v2645_v43 }
0x1570   : > { %v2650_v31 = vpop.xlane.xlu0 %2649 }
0x1571   : > { %v2652_v44 = vsub.f32 %v2644_v40, %v2650_v31  ;;  %v2647_v45 = vpop.xlane.xlu1 %2646 }
0x1572   : > { %v2651_v46 = vsub.f32 %v2643_v41, %v2647_v45 }
0x1573   : > { %v2655_v47 = vmul.f32 1.442695, %v2652_v44 }
0x1574   : > { %v2653_v23 = vmul.f32 1.442695, %v2651_v46 }
0x1575   : > { %5860 = vpow2.f32 %v2655_v47 }
0x1576   : > { %5862 = vpow2.f32 %v2653_v23 }
0x157f   : > { %v5861_v48 = vpop.eup %5860 }
0x1580   : > { %v5863_v49 = vpop.eup %5862  ;;  %v2660_v14 = vsel %vm2236_vm3, %v5861_v48, 0.0 }
0x1581   : > { %2661 = vadd.xlane.f32.xlu1 %v2660_v14  ;;  %v2657_v54 = vsel %vm2236_vm3, %v5863_v49, 0.0  ;;  %v2139_v14 = vld [vmem:[%s6588_s29 + $0x8] sm:$0xff] }
0x1582   : > { %2658 = vadd.xlane.f32.xlu0 %v2657_v54  ;;  %v2140_v54 = vld [vmem:[%s6588_s29 + $0x10] sm:$0xff] }
0x1592   : > { %5800 = vrot.lane.b32.xlu1 %v6825_v58, %s6205_s20 }
0x1596   : > { %2754 = vrot.lane.b32.xlu1 %v6817_v57, %s6206_s4 }
0x1598   : > { %5795 = vrot.lane.b32.xlu0 %v6825_v58, %s6207_s8 }
0x159c   : > { %2756 = vrot.lane.b32.xlu0 %v6815_v56, %s6206_s4 }
0x160e   : > { %v2662_v35 = vpop.xlane.xlu1 %2661 }
0x160f   : > { %5864 = vrcp.f32 %v2662_v35  ;;  %v2659_v38 = vpop.xlane.xlu0 %2658 }
0x1610   : > { %5866 = vrcp.f32 %v2659_v38  ;;  %v2141_v38 = vld [vmem:[%s6588_s29 + $0x18] sm:$0xff] }
0x1612   : > { %v5801_v59 = vpop.permute.xlu1 %5800 }
0x1613   : > { %v5796_v61 = vpop.permute.xlu0 %5795  ;;  %v5803_v62 = vunpack.i.h.bf16 %v5801_v59  ;;  %v5802_v63 = vunpack.i.l.bf16 %v5801_v59  ;;  %v5477_v59 = vpack.c.bf16 %v2141_v38, %v2140_v54 }
0x1614   : > { %v5798_v53 = vunpack.i.h.bf16 %v5796_v61  ;;  %v5797_v52 = vunpack.i.l.bf16 %v5796_v61 }
0x1615   : > { %v5463_v19 = vpack.c.bf16 %v5803_v62, %v5802_v63 }
0x1616   : > { %v5459_v7 = vpack.c.bf16 %v5798_v53, %v5797_v52  ;;  %v2755_v11 = vpop.permute.xlu1 %2754 }
0x1617   : > { %v2757_v13 = vpop.permute.xlu0 %2756 }
0x1618   : > { %5460 = vmatprep.subr.bf16.mxu1 %v5459_v7 }
0x1619   : > { %v5865_v57 = vpop.eup %5864  ;;  %5462 = vmatpush3.bf16.msra.mxu1 %v5459_v7 }
0x161a   : > { %v5867_v9 = vpop.eup %5866  ;;  %5465 = vmatprep.subr.msk.bf16.mxu1 %vm6835_vm14, %v5463_v19  ;;  %v2666_v10 = vmul.f32 %v5865_v57, %v5861_v48 }
0x161b   : > { %v2664_v56 = vmul.f32 %v5867_v9, %v5863_v49  ;;  %v2138_v49 = vld [vmem:[%s6588_s29] sm:$0xff]  ;;  %s7261_s29 = sld [smem:[#allocation26_spill]] (!%p4855_p3) }
0x161c   : > { %v5473_v35 = vpack.c.bf16 %v2139_v14, %v2138_v49 }
0x161d   : > { %5198 = vmatprep.mubr.msk.f32.mxu1 %vm2236_vm3, %v2664_v56 }
0x161e   : > { %5199 = vmatmul.mubr.msk.f32.vlgmr.msra.gmra.mrb[6].mxu1 %vm2236_vm3, %v2666_v10 }
0x161f   : > { %5205 = vmatprep.mubr.msk.f32.mxu1 %vm2148_vm13, %v2755_v11 }
0x1622   : > { %5468 = vmatpush3.bf16.xpose.msk.msra.mxu1 %vm6835_vm14, %v5463_v19 }
0x1629   : > { %5206 = vmatmul.mubr.msk.f32.vlgmr.msra.gmra.mrb[8].mxu1 %vm2148_vm13, %v2757_v13 }
0x16f1   : > { %v5200_v36 = vpop.f32.mrb[6].mxu1 }
0x16f2   : > { %v2745_v20 = vpop.f32.mrb[7].mxu1 }
0x16fc   : > { %v5207_v21 = vpop.f32.mrb[8].mxu1 }
0x16fd   : > { %v2846_v22 = vmul.f32 0.35355338, %v5207_v21  ;;  %v2836_v24 = vpop.f32.mrb[9].mxu1 }
0x16fe   : > { %v2845_v25 = vmul.f32 0.35355338, %v2836_v24 }
0x16ff   : > { %v2848_v26 = vadd.f32 %v2846_v22, %v6852_v12 }
0x1700   : > { %v2847_v27 = vadd.f32 %v2845_v25, %v6854_v15 }
0x1701   : > { %v2852_v28 = vsel %vm2236_vm3, %v2848_v26, -inf }
0x1702   : > { %2853 = vmax.xlane.f32.xlu0 %v2852_v28  ;;  %v2849_v29 = vsel %vm2236_vm3, %v2847_v27, -inf }
0x1703   : > { %2850 = vmax.xlane.f32.xlu1 %v2849_v29 }
0x178f   : > { %v2854_v30 = vpop.xlane.xlu0 %2853 }
0x1790   : > { %v2856_v32 = vsub.f32 %v2848_v26, %v2854_v30  ;;  %v2851_v51 = vpop.xlane.xlu1 %2850 }
0x1791   : > { %v2855_v37 = vsub.f32 %v2847_v27, %v2851_v51 }
0x1792   : > { %v2859_v50 = vmul.f32 1.442695, %v2856_v32 }
0x1793   : > { %v2857_v39 = vmul.f32 1.442695, %v2855_v37 }
0x1794   : > { %5868 = vpow2.f32 %v2859_v50 }
0x1795   : > { %5870 = vpow2.f32 %v2857_v39 }
0x179e   : > { %v5869_v40 = vpop.eup %5868 }
0x179f   : > { %v5871_v41 = vpop.eup %5870  ;;  %v2864_v42 = vsel %vm2236_vm3, %v5869_v40, 0.0 }
0x17a0   : > { %2865 = vadd.xlane.f32.xlu1 %v2864_v42  ;;  %v2861_v43 = vsel %vm2236_vm3, %v5871_v41, 0.0 }
0x17a1   : > { %2862 = vadd.xlane.f32.xlu0 %v2861_v43  ;;  %v3202_v43 = vld [vmem:[%s6561_s25 + $0x10] sm:$0xff] }
0x17b1   : > { %2960 = vrot.lane.b32.xlu1 %v6892_v34, %s6208_s17 }
0x17b5   : > { %2962 = vrot.lane.b32.xlu1 %v6890_v33, %s6208_s17 }
0x17b7   : > { %5805 = vrot.lane.b32.xlu0 %v6825_v58, %s6209_s10 }
0x17b9   : > { %2970 = vrot.lane.b32.xlu1 %v5200_v36, %s6210_s5 }
0x17bb   : > { %2968 = vrot.lane.b32.xlu0 %v2745_v20, %s6210_s5  ;;  %v2990_v20 = vshrl.u32 %v2024_v8, 7 }
0x182d   : > { %v2866_v31 = vpop.xlane.xlu1 %2865 }
0x182e   : > { %5872 = vrcp.f32 %v2866_v31  ;;  %v2863_v44 = vpop.xlane.xlu0 %2862  ;;  %v3203_v31 = vld [vmem:[%s6561_s25 + $0x18] sm:$0xff] }
0x182f   : > { %5874 = vrcp.f32 %v2863_v44  ;;  %v5493_v44 = vpack.c.bf16 %v3203_v31, %v3202_v43 }
0x1831   : > { %v2961_v63 = vpop.permute.xlu1 %2960 }
0x1832   : > { %v5806_v45 = vpop.permute.xlu0 %5805  ;;  %v2982_v19 = vsel %vm2148_vm13, %v6888_v17, %v2961_v63  ;;  %v6947_v17 = vsub.s32 0, %v2990_v20 }
0x1833   : > { %v5808_v34 = vunpack.i.h.bf16 %v5806_v45  ;;  %v5807_v46 = vunpack.i.l.bf16 %v5806_v45  ;;  %v2019_v45 = vld [vmem:[#allocation2] sm:$0xff] }
0x1835   : > { %v5469_v33 = vpack.c.bf16 %v5808_v34, %v5807_v46  ;;  %v2963_v53 = vpop.permute.xlu1 %2962  ;;  %v2020_v34 = vld [vmem:[#allocation2 + $0x8] sm:$0xff]  ;;  %v3115_v46 = vld [vmem:[%s6602_s14] sm:$0xff] }
0x1836   : > { %v2969_v7 = vpop.permute.xlu0 %2968  ;;  %v2983_v9 = vsel %vm2148_vm13, %v6886_v18, %v2963_v53  ;;  %v2992_v18 = vrot.slane %v6572_v0, %v6947_v17  ;;  %v3112_v53 = vrot.slane %v6578_v2, %v6947_v17 }
0x1837   : > { %5470 = vmatprep.subr.bf16.mxu0 %v5469_v33  ;;  %v2984_v56 = vsel %vm2236_vm3, %v2982_v19, %v2969_v7 }
0x1838   : > { %v5873_v47 = vpop.eup %5872  ;;  %5472 = vmatpush3.bf16.msra.mxu0 %v5469_v33  ;;  %v3116_v33 = vld [vmem:[%s6602_s14 + $0x8] sm:$0xff] }
0x1839   : > { %v5875_v58 = vpop.eup %5874  ;;  %v2870_v48 = vmul.f32 %v5873_v47, %v5869_v40  ;;  %5474 = vmatprep.subr.bf16.mxu0 %v5473_v35  ;;  %v2971_v52 = vpop.permute.xlu1 %2970  ;;  %v3200_v40 = vld [vmem:[%s6561_s25] sm:$0xff]  ;;  %v5481_v47 = vpack.c.bf16 %v3116_v33, %v3115_v46 }
0x183a   : > { %v2868_v23 = vmul.f32 %v5875_v58, %v5871_v41  ;;  %v2985_v11 = vsel %vm2236_vm3, %v2983_v9, %v2971_v52  ;;  %v3201_v41 = vld [vmem:[%s6561_s25 + $0x8] sm:$0xff]  ;;  %v3117_v58 = vld [vmem:[%s6602_s14 + $0x10] sm:$0xff] }
0x183b   : > { %v5489_v42 = vpack.c.bf16 %v3201_v41, %v3200_v40  ;;  %5482 = vmatprep.subr.bf16.mxu1 %v5481_v47 }
0x183c   : > { %5212 = vmatprep.mubr.msk.f32.mxu0 %vm2236_vm3, %v2868_v23  ;;  %5484 = vmatpush3.bf16.msra.mxu1 %v5481_v47  ;;  %v3118_v23 = vld [vmem:[%s6602_s14 + $0x18] sm:$0xff] }
0x183d   : > { %5213 = vmatmul.mubr.msk.f32.vlgmr.msra.gmra.mrb[6].mxu0 %vm2236_vm3, %v2870_v48  ;;  %v5485_v48 = vpack.c.bf16 %v3118_v23, %v3117_v58 }
0x183e   : > { %5476 = vmatpush3.bf16.msra.mxu0 %v5473_v35 }
0x183f   : > { %5478 = vmatprep.subr.bf16.mxu0 %v5477_v59  ;;  %5486 = vmatprep.subr.bf16.mxu1 %v5485_v48 }
0x1840   : > { %5488 = vmatpush3.bf16.msra.mxu1 %v5485_v48 }
0x1842   : > { %5480 = vmatpush3.bf16.msra.mxu0 %v5477_v59 }
0x1843   : > { %5490 = vmatprep.subr.bf16.mxu0 %v5489_v42 }
0x1910   : > { %v5214_v61 = vpop.f32.mrb[6].mxu0 }
0x1911   : > { %2978 = vrot.lane.b32.xlu1 %v5214_v61, %s6211_s15  ;;  %v2949_v62 = vpop.f32.mrb[7].mxu0  ;;  %v3106_v61 = vrot.slane %v6575_v1, %v6947_v17 }
0x1912   : > { %2976 = vrot.lane.b32.xlu0 %v2949_v62, %s6211_s15 }
0x1983   : > { %v2979_v57 = vpop.permute.xlu1 %2978 }
0x1984   : > { %v2977_v10 = vpop.permute.xlu0 %2976  ;;  %v2988_v36 = vsel %vm2986_vm4, %v2985_v11, %v2979_v57 }
0x1985   : > { %v2987_v13 = vsel %vm2986_vm4, %v2984_v56, %v2977_v10 }
0x1986   : > { %5223 = vmatprep.mubr.msk.f32.mxu0 %vm2056_vm12, %v2987_v13 }
0x1987   : > { %5224 = vmatmul.mubr.msk.f32.vlgmr.msra.gmra.mrb[8].mxu0 %vm2056_vm12, %v2988_v36 }
0x1988   : > { %5492 = vmatpush3.bf16.msra.mxu0 %v5489_v42  ;;  %5245 = vmatprep.mubr.msk.f32.mxu0 %vm2056_vm12, %v2019_v45 }
0x1989   : > { %5494 = vmatprep.subr.bf16.mxu0 %v5493_v44 }
0x198c   : > { %5496 = vmatpush3.bf16.msra.mxu0 %v5493_v44 }
0x198f   : > { %5246 = vmatmul.mubr.msk.f32.vlgmr.msra.gmra.mrb[10].mxu0 %vm2056_vm12, %v2020_v34 }
0x1a5a   : > { %v5225_v21 = vpop.f32.mrb[8].mxu0 }
0x1a5b   : > { %v3071_v22 = vadd.f32 %v5225_v21, %v2992_v18  ;;  %v3065_v24 = vpop.f32.mrb[9].mxu0 }
0x1a5c   : > { %v3066_v25 = vadd.f32 %v3065_v24, %v2992_v18 }
0x1a5d   : > { %v3075_v26 = vadd.f32 %v3071_v22, %v6811_v55 }
0x1a5e   : > { %v3074_v27 = vadd.f32 %v3066_v25, %v6807_v16 }
0x1a5f   : > { %v3079_v28 = vsel %vm2056_vm12, %v3075_v26, 0.0 }
0x1a60   : > { %3080 = vadd.xlane.f32.xlu1 %v3079_v28  ;;  %v3076_v8 = vsel %vm2056_vm12, %v3074_v27, 0.0 }
0x1a61   : > { %3077 = vadd.xlane.f32.xlu0 %v3076_v8 }
0x1a62   : > { %v5247_v1 = vpop.f32.mrb[10].mxu0 }
0x1a63   : > { %v3276_v10 = vpop.f32.mrb[11].mxu0 }
0x1a64   : > { %v6979_v11 = vpack.i.bf16 %v5247_v1, %v3276_v10  ;;  %v5497_v13 = vpack.c.bf16 %v5247_v1, %v3276_v10 }
0x1a66   : > { %5499 = vmatprep.subr.msk.bf16.mxu1 %vm6835_vm14, %v5497_v13 }
0x1a71   : > { %5810 = vrot.lane.b32.xlu1 %v6979_v11, %s6197_s11 }
0x1aed   : > { %v3081_v29 = vpop.xlane.xlu1 %3080 }
0x1aee   : > { %v3084_v30 = vmul.f32 0.03125, %v3081_v29  ;;  %v3078_v0 = vpop.xlane.xlu0 %3077 }
0x1aef   : > { %v3083_v32 = vmul.f32 0.03125, %v3078_v0 }
0x1af0   : > { %v3086_v51 = vsub.f32 %v3075_v26, %v3084_v30 }
0x1af1   : > { %v3085_v37 = vsub.f32 %v3074_v27, %v3083_v32  ;;  %v5811_v2 = vpop.permute.xlu1 %5810 }
0x1af2   : > { %v3088_v16 = vmul.f32 %v3086_v51, %v3086_v51  ;;  %v5813_v36 = vunpack.i.h.bf16 %v5811_v2  ;;  %v5812_v20 = vunpack.i.l.bf16 %v5811_v2 }
0x1af3   : > { %v3087_v50 = vmul.f32 %v3085_v37, %v3085_v37 }
0x1af4   : > { %v3092_v39 = vsel %vm2056_vm12, %v3088_v16, 0.0  ;;  %v5507_v18 = vpack.c.bf16 %v5813_v36, %v5812_v20 }
0x1af5   : > { %v3089_v55 = vsel %vm2056_vm12, %v3087_v50, 0.0 }
0x1af6   : > { %3090 = vadd.xlane.f32.xlu0 %v3089_v55 }
0x1afa   : > { %3093 = vadd.xlane.f32.xlu0 %v3092_v39 }
0x1b83   : > { %v3091_v49 = vpop.xlane.xlu0 %3090 }
0x1b84   : > { %v3095_v14 = vmul.f32 0.03125, %v3091_v49 }
0x1b86   : > { %v3097_v54 = vadd.f32 1e-05, %v3095_v14 }
0x1b87   : > { %v3094_v35 = vpop.xlane.xlu0 %3093 }
0x1b88   : > { %5876 = vrsqrt.f32 %v3097_v54  ;;  %v3096_v38 = vmul.f32 0.03125, %v3094_v35 }
0x1b8a   : > { %v3098_v59 = vadd.f32 1e-05, %v3096_v38 }
0x1b8c   : > { %5878 = vrsqrt.f32 %v3098_v59 }
0x1b92   : > { %v5877_v62 = vpop.eup %5876 }
0x1b93   : > { %v3101_v63 = vmul.f32 %v5877_v62, %v3085_v37 }
0x1b95   : > { %v3107_v52 = vmul.f32 %v3106_v61, %v3101_v63 }
0x1b96   : > { %v5879_v7 = vpop.eup %5878 }
0x1b97   : > { %v3102_v19 = vmul.f32 %v5879_v7, %v3086_v51  ;;  %v6971_v57 = vadd.f32 %v3112_v53, %v3107_v52 }
0x1b99   : > { %v3108_v9 = vmul.f32 %v3106_v61, %v3102_v19  ;;  %5234 = vmatprep.mubr.msk.f32.mxu1 %vm2056_vm12, %v6971_v57 }
0x1b9b   : > { %v6975_v56 = vadd.f32 %v3112_v53, %v3108_v9 }
0x1b9d   : > { %5235 = vmatmul.mubr.msk.f32.vlgmr.msra.gmra.mrb[10].mxu1 %vm2056_vm12, %v6975_v56 }
0x1b9e   : > { %5502 = vmatpush3.bf16.xpose.msk.msra.mxu1 %vm6835_vm14, %v5497_v13 }
0x1b9f   : > { %5509 = vmatprep.subr.msk.bf16.mxu1 %vm6835_vm14, %v5507_v18 }
0x1c70   : > { %v6989_v21 = vpop.f32.mrb[10].mxu1 }
0x1c71   : > { %3492 = vrot.lane.b32.xlu1 %v6989_v21, %s6197_s11  ;;  %v6993_v22 = vpop.f32.mrb[11].mxu1 }
0x1c72   : > { %3490 = vrot.lane.b32.xlu0 %v6993_v22, %s6197_s11  ;;  %5252 = vmatprep.mubr.msk.f32.mxu1 %vm2148_vm13, %v6993_v22 }
0x1c73   : > { %5253 = vmatmul.mubr.msk.f32.vlgmr.msra.gmra.mrb[12].mxu1 %vm2148_vm13, %v6989_v21 }
0x1c74   : > { %5512 = vmatpush3.bf16.xpose.msk.msra.mxu1 %vm6835_vm14, %v5507_v18 }
0x1ce3   : > { %v3493_v25 = vpop.permute.xlu1 %3492 }
0x1ce4   : > { %v3491_v24 = vpop.permute.xlu0 %3490 }
0x1ce5   : > { %5266 = vmatprep.mubr.msk.f32.mxu1 %vm2148_vm13, %v3491_v24 }
0x1ce6   : > { %5267 = vmatmul.mubr.msk.f32.vlgmr.msra.gmra.mrb[14].mxu1 %vm2148_vm13, %v3493_v25 }
0x1d46   : > { %v5254_v26 = vpop.f32.mrb[12].mxu1 }
0x1d47   : > { %v3378_v27 = vmul.f32 0.35355338, %v5254_v26  ;;  %v3368_v28 = vpop.f32.mrb[13].mxu1 }
0x1d48   : > { %v3377_v8 = vmul.f32 0.35355338, %v3368_v28 }
0x1d49   : > { %v3380_v29 = vadd.f32 %v3378_v27, %v6852_v12 }
0x1d4a   : > { %v3379_v30 = vadd.f32 %v3377_v8, %v6854_v15 }
0x1d4b   : > { %v3384_v0 = vsel %vm2236_vm3, %v3380_v29, -inf }
0x1d4c   : > { %3385 = vmax.xlane.f32.xlu0 %v3384_v0  ;;  %v3381_v32 = vsel %vm2236_vm3, %v3379_v30, -inf }
0x1d4d   : > { %3382 = vmax.xlane.f32.xlu1 %v3381_v32 }
0x1db9   : > { %v5268_v51 = vpop.f32.mrb[14].mxu1 }
0x1dba   : > { %v3582_v37 = vmul.f32 0.35355338, %v5268_v51  ;;  %v3572_v50 = vpop.f32.mrb[15].mxu1 }
0x1dbb   : > { %v3581_v55 = vmul.f32 0.35355338, %v3572_v50 }
0x1dbc   : > { %v3584_v16 = vadd.f32 %v3582_v37, %v6852_v12 }
0x1dbd   : > { %v3583_v39 = vadd.f32 %v3581_v55, %v6854_v15 }
0x1dbe   : > { %v3588_v40 = vsel %vm2236_vm3, %v3584_v16, -inf }
0x1dbf   : > { %3589 = vmax.xlane.f32.xlu1 %v3588_v40  ;;  %v3585_v41 = vsel %vm2236_vm3, %v3583_v39, -inf }
0x1dc0   : > { %3586 = vmax.xlane.f32.xlu0 %v3585_v41 }
0x1dd9   : > { %v3386_v42 = vpop.xlane.xlu0 %3385 }
0x1dda   : > { %v3388_v43 = vsub.f32 %v3380_v29, %v3386_v42  ;;  %v3383_v31 = vpop.xlane.xlu1 %3382 }
0x1ddb   : > { %v3387_v44 = vsub.f32 %v3379_v30, %v3383_v31 }
0x1ddc   : > { %v3391_v45 = vmul.f32 1.442695, %v3388_v43 }
0x1ddd   : > { %v3389_v34 = vmul.f32 1.442695, %v3387_v44 }
0x1dde   : > { %5880 = vpow2.f32 %v3391_v45 }
0x1ddf   : > { %5882 = vpow2.f32 %v3389_v34 }
0x1de8   : > { %v5881_v46 = vpop.eup %5880 }
0x1de9   : > { %v5883_v33 = vpop.eup %5882  ;;  %v3396_v47 = vsel %vm2236_vm3, %v5881_v46, 0.0 }
0x1dea   : > { %3397 = vadd.xlane.f32.xlu1 %v3396_v47  ;;  %v3393_v58 = vsel %vm2236_vm3, %v5883_v33, 0.0 }
0x1deb   : > { %3394 = vadd.xlane.f32.xlu0 %v3393_v58 }
0x1e4c   : > { %v3590_v23 = vpop.xlane.xlu1 %3589 }
0x1e4d   : > { %v3592_v48 = vsub.f32 %v3584_v16, %v3590_v23  ;;  %v3587_v49 = vpop.xlane.xlu0 %3586 }
0x1e4e   : > { %v3591_v14 = vsub.f32 %v3583_v39, %v3587_v49 }
0x1e4f   : > { %v3595_v54 = vmul.f32 1.442695, %v3592_v48 }
0x1e50   : > { %v3593_v35 = vmul.f32 1.442695, %v3591_v14 }
0x1e51   : > { %5884 = vpow2.f32 %v3595_v54 }
0x1e52   : > { %5886 = vpow2.f32 %v3593_v35 }
0x1e5b   : > { %v5885_v38 = vpop.eup %5884 }
0x1e5c   : > { %v5887_v59 = vpop.eup %5886  ;;  %v3600_v61 = vsel %vm2236_vm3, %v5885_v38, 0.0 }
0x1e5d   : > { %3601 = vadd.xlane.f32.xlu1 %v3600_v61  ;;  %v3597_v62 = vsel %vm2236_vm3, %v5887_v59, 0.0 }
0x1e5e   : > { %3598 = vadd.xlane.f32.xlu0 %v3597_v62 }
0x1e6e   : > { %5820 = vrot.lane.b32.xlu1 %v6979_v11, %s6199_s27 }
0x1e72   : > { %5825 = vrot.lane.b32.xlu1 %v6979_v11, %s6204_s23 }
0x1e74   : > { %5815 = vrot.lane.b32.xlu0 %v6979_v11, %s6198_s2 }
0x1e76   : > { %3696 = vrot.lane.b32.xlu1 %v6989_v21, %s6204_s23 }
0x1e77   : > { %v3398_v7 = vpop.xlane.xlu1 %3397 }
0x1e78   : > { %3694 = vrot.lane.b32.xlu0 %v6993_v22, %s6204_s23  ;;  %v3395_v63 = vpop.xlane.xlu0 %3394 }
0x1e79   : > { %5888 = vrcp.f32 %v3395_v63 }
0x1e7a   : > { %5890 = vrcp.f32 %v3398_v7 }
0x1e83   : > { %v5889_v53 = vpop.eup %5888 }
0x1e84   : > { %v3400_v52 = vmul.f32 %v5889_v53, %v5883_v33  ;;  %v5891_v25 = vpop.eup %5890 }
0x1e85   : > { %v3402_v29 = vmul.f32 %v5891_v25, %v5881_v46 }
0x1e86   : > { %5259 = vmatprep.mubr.msk.f32.mxu0 %vm2236_vm3, %v3400_v52 }
0x1eea   : > { %v3602_v19 = vpop.xlane.xlu1 %3601 }
0x1eeb   : > { %v3599_v9 = vpop.xlane.xlu0 %3598 }
0x1eec   : > { %5892 = vrcp.f32 %v3599_v9 }
0x1eed   : > { %5894 = vrcp.f32 %v3602_v19 }
0x1eee   : > { %v5821_v1 = vpop.permute.xlu1 %5820 }
0x1eef   : > { %v5816_v10 = vpop.permute.xlu0 %5815  ;;  %v5823_v13 = vunpack.i.h.bf16 %v5821_v1  ;;  %v5822_v2 = vunpack.i.l.bf16 %v5821_v1 }
0x1ef0   : > { %v5818_v36 = vunpack.i.h.bf16 %v5816_v10  ;;  %v5817_v20 = vunpack.i.l.bf16 %v5816_v10 }
0x1ef1   : > { %v5513_v26 = vpack.c.bf16 %v5823_v13, %v5822_v2 }
0x1ef2   : > { %v5503_v18 = vpack.c.bf16 %v5818_v36, %v5817_v20  ;;  %v5826_v24 = vpop.permute.xlu1 %5825 }
0x1ef3   : > { %v5828_v27 = vunpack.i.h.bf16 %v5826_v24  ;;  %v5827_v28 = vunpack.i.l.bf16 %v5826_v24  ;;  %v3695_v37 = vpop.permute.xlu0 %3694 }
0x1ef4   : > { %5504 = vmatprep.subr.bf16.mxu0 %v5503_v18 }
0x1ef5   : > { %5506 = vmatpush3.bf16.msra.mxu0 %v5503_v18  ;;  %v5517_v32 = vpack.c.bf16 %v5828_v27, %v5827_v28 }
0x1ef6   : > { %v5893_v8 = vpop.eup %5892  ;;  %5514 = vmatprep.subr.bf16.mxu0 %v5513_v26  ;;  %v3697_v50 = vpop.permute.xlu1 %3696 }
0x1ef7   : > { %v5895_v30 = vpop.eup %5894  ;;  %v3604_v0 = vmul.f32 %v5893_v8, %v5887_v59 }
0x1ef8   : > { %5260 = vmatmul.mubr.msk.f32.vlgmr.msra.gmra.mrb[12].mxu0 %vm2236_vm3, %v3402_v29  ;;  %v3606_v51 = vmul.f32 %v5895_v30, %v5885_v38 }
0x1ef9   : > { %5516 = vmatpush3.bf16.msra.mxu0 %v5513_v26  ;;  %5273 = vmatprep.mubr.msk.f32.mxu0 %vm2236_vm3, %v3604_v0 }
0x1efa   : > { %5519 = vmatprep.subr.msk.bf16.mxu0 %vm6835_vm14, %v5517_v32 }
0x1efc   : > { %5274 = vmatmul.mubr.msk.f32.vlgmr.msra.gmra.mrb[14].mxu0 %vm2236_vm3, %v3606_v51 }
0x1efd   : > { %5280 = vmatprep.mubr.msk.f32.mxu0 %vm2148_vm13, %v3695_v37 }
0x1f02   : > { %5522 = vmatpush3.bf16.xpose.msk.msra.mxu0 %vm6835_vm14, %v5517_v32 }
0x1f09   : > { %5281 = vmatmul.mubr.msk.f32.vlgmr.msra.gmra.mrb[16].mxu0 %vm2148_vm13, %v3697_v50 }
0x1fcb   : > { %v7037_v55 = vpop.f32.mrb[12].mxu0 }
0x1fcc   : > { %v7039_v16 = vpop.f32.mrb[13].mxu0 }
0x1fcf   : > { %v7041_v39 = vpop.f32.mrb[14].mxu0 }
0x1fd0   : > { %v7043_v40 = vpop.f32.mrb[15].mxu0 }
0x1fdc   : > { %v5282_v41 = vpop.f32.mrb[16].mxu0 }
0x1fdd   : > { %v3786_v42 = vmul.f32 0.35355338, %v5282_v41  ;;  %v3776_v43 = vpop.f32.mrb[17].mxu0 }
0x1fde   : > { %v3785_v31 = vmul.f32 0.35355338, %v3776_v43 }
0x1fdf   : > { %v3788_v44 = vadd.f32 %v3786_v42, %v6852_v12 }
0x1fe0   : > { %v3787_v45 = vadd.f32 %v3785_v31, %v6854_v15 }
0x1fe1   : > { %v3792_v34 = vsel %vm2236_vm3, %v3788_v44, -inf }
0x1fe2   : > { %3793 = vmax.xlane.f32.xlu1 %v3792_v34  ;;  %v3789_v46 = vsel %vm2236_vm3, %v3787_v45, -inf }
0x1fe3   : > { %3790 = vmax.xlane.f32.xlu0 %v3789_v46 }
0x1ff3   : > { %5830 = vrot.lane.b32.xlu1 %v6979_v11, %s6202_s12 }
0x1ff7   : > { %3898 = vrot.lane.b32.xlu1 %v6993_v22, %s6206_s4 }
0x1ffb   : > { %3900 = vrot.lane.b32.xlu1 %v6989_v21, %s6206_s4 }
0x206f   : > { %v3794_v33 = vpop.xlane.xlu1 %3793 }
0x2070   : > { %v3796_v47 = vsub.f32 %v3788_v44, %v3794_v33  ;;  %v3791_v58 = vpop.xlane.xlu0 %3790 }
0x2071   : > { %v3795_v23 = vsub.f32 %v3787_v45, %v3791_v58  ;;  %v3285_v58 = vld [vmem:[%s6612_s28] sm:$0xff] }
0x2072   : > { %v3799_v48 = vmul.f32 1.442695, %v3796_v47 }
0x2073   : > { %v3797_v49 = vmul.f32 1.442695, %v3795_v23  ;;  %v5831_v14 = vpop.permute.xlu1 %5830  ;;  %v3286_v23 = vld [vmem:[%s6612_s28 + $0x8] sm:$0xff] }
0x2074   : > { %5896 = vpow2.f32 %v3799_v48  ;;  %v5833_v54 = vunpack.i.h.bf16 %v5831_v14  ;;  %v5832_v35 = vunpack.i.l.bf16 %v5831_v14  ;;  %v3287_v48 = vld [vmem:[%s6612_s28 + $0x10] sm:$0xff] }
0x2075   : > { %5898 = vpow2.f32 %v3797_v49  ;;  %v5537_v49 = vpack.c.bf16 %v3286_v23, %v3285_v58 }
0x2076   : > { %v5523_v38 = vpack.c.bf16 %v5833_v54, %v5832_v35 }
0x2077   : > { %v3899_v2 = vpop.permute.xlu1 %3898 }
0x2078   : > { %5524 = vmatprep.subr.bf16.mxu1 %v5523_v38 }
0x2079   : > { %5526 = vmatpush3.bf16.msra.mxu1 %v5523_v38 }
0x207b   : > { %v3901_v36 = vpop.permute.xlu1 %3900 }
0x207e   : > { %v5897_v59 = vpop.eup %5896 }
0x207f   : > { %v3804_v22 = vsel %vm2236_vm3, %v5897_v59, 0.0  ;;  %v5899_v61 = vpop.eup %5898 }
0x2080   : > { %3805 = vadd.xlane.f32.xlu0 %v3804_v22  ;;  %v3801_v21 = vsel %vm2236_vm3, %v5899_v61, 0.0 }
0x2084   : > { %3802 = vadd.xlane.f32.xlu0 %v3801_v21 }
0x209a   : > { %5835 = vrot.lane.b32.xlu0 %v6979_v11, %s6206_s4 }
0x210d   : > { %v3806_v62 = vpop.xlane.xlu0 %3805 }
0x210e   : > { %5900 = vrcp.f32 %v3806_v62 }
0x2111   : > { %v3803_v63 = vpop.xlane.xlu0 %3802 }
0x2112   : > { %5902 = vrcp.f32 %v3803_v63 }
0x2115   : > { %v5836_v53 = vpop.permute.xlu0 %5835 }
0x2116   : > { %v5838_v52 = vunpack.i.h.bf16 %v5836_v53  ;;  %v5837_v7 = vunpack.i.l.bf16 %v5836_v53 }
0x2118   : > { %v5527_v19 = vpack.c.bf16 %v5838_v52, %v5837_v7  ;;  %v5901_v9 = vpop.eup %5900 }
0x2119   : > { %v3810_v13 = vmul.f32 %v5901_v9, %v5897_v59 }
0x211a   : > { %5529 = vmatprep.subr.msk.bf16.mxu1 %vm6835_vm14, %v5527_v19 }
0x211c   : > { %v5903_v1 = vpop.eup %5902 }
0x211d   : > { %v3808_v10 = vmul.f32 %v5903_v1, %v5899_v61  ;;  %v4846_v1 = vld [vmem:[%s6569_s3 + $0x3] ss:$0 sm:$0xff] }
0x211f   : > { %5287 = vmatprep.mubr.msk.f32.mxu1 %vm2236_vm3, %v3808_v10 }
0x2120   : > { %5288 = vmatmul.mubr.msk.f32.vlgmr.msra.gmra.mrb[16].mxu1 %vm2236_vm3, %v3810_v13 }
0x2121   : > { %5532 = vmatpush3.bf16.xpose.msk.msra.mxu1 %vm6835_vm14, %v5527_v19  ;;  %5294 = vmatprep.mubr.msk.f32.mxu1 %vm2148_vm13, %v3899_v2 }
0x2128   : > { %5295 = vmatmul.mubr.msk.f32.vlgmr.msra.gmra.mrb[18].mxu1 %vm2148_vm13, %v3901_v36 }
0x21f3   : > { %v5289_v20 = vpop.f32.mrb[16].mxu1 }
0x21f4   : > { %v3889_v18 = vpop.f32.mrb[17].mxu1 }
0x21fb   : > { %v5296_v24 = vpop.f32.mrb[18].mxu1 }
0x21fc   : > { %v3990_v25 = vmul.f32 0.35355338, %v5296_v24  ;;  %v3980_v26 = vpop.f32.mrb[19].mxu1 }
0x21fd   : > { %v3989_v27 = vmul.f32 0.35355338, %v3980_v26 }
0x21fe   : > { %v3992_v28 = vadd.f32 %v3990_v25, %v6852_v12 }
0x21ff   : > { %v3991_v8 = vadd.f32 %v3989_v27, %v6854_v15 }
0x2200   : > { %v3996_v29 = vsel %vm2236_vm3, %v3992_v28, -inf }
0x2201   : > { %3997 = vmax.xlane.f32.xlu1 %v3996_v29  ;;  %v3993_v60 = vsel %vm2236_vm3, %v3991_v8, -inf }
0x2202   : > { %3994 = vmax.xlane.f32.xlu0 %v3993_v60 }
0x2212   : > { %5840 = vrot.lane.b32.xlu1 %v6979_v11, %s6205_s20 }
0x2216   : > { %4106 = vrot.lane.b32.xlu1 %v7041_v39, %s6208_s17 }
0x221a   : > { %4112 = vrot.lane.b32.xlu1 %v3889_v18, %s6210_s5 }
0x228e   : > { %v3998_v30 = vpop.xlane.xlu1 %3997 }
0x228f   : > { %v4000_v0 = vsub.f32 %v3992_v28, %v3998_v30  ;;  %v3995_v32 = vpop.xlane.xlu0 %3994  ;;  %v4259_v30 = vld [vmem:[%s6614_s30] sm:$0xff] }
0x2290   : > { %v3999_v12 = vsub.f32 %v3991_v8, %v3995_v32 }
0x2291   : > { %v4003_v51 = vmul.f32 1.442695, %v4000_v0  ;;  %v4260_v0 = vld [vmem:[%s6614_s30 + $0x8] sm:$0xff] }
0x2292   : > { %v4001_v15 = vmul.f32 1.442695, %v3999_v12  ;;  %v5841_v37 = vpop.permute.xlu1 %5840  ;;  %v5545_v32 = vpack.c.bf16 %v4260_v0, %v4259_v30  ;;  %v4261_v12 = vld [vmem:[%s6614_s30 + $0x10] sm:$0xff] }
0x2293   : > { %v5843_v50 = vunpack.i.h.bf16 %v5841_v37  ;;  %v5842_v41 = vunpack.i.l.bf16 %v5841_v37  ;;  %v4263_v37 = vld [vmem:[%s6607_s13] sm:$0xff] }
0x2294   : > { %5904 = vpow2.f32 %v4001_v15  ;;  %5546 = vmatprep.subr.bf16.mxu1 %v5545_v32 }
0x2295   : > { %v5533_v42 = vpack.c.bf16 %v5843_v50, %v5842_v41  ;;  %5906 = vpow2.f32 %v4003_v51  ;;  %v4262_v51 = vld [vmem:[%s6614_s30 + $0x18] sm:$0xff]  ;;  %5548 = vmatpush3.bf16.msra.mxu1 %v5545_v32  ;;  %v4264_v50 = vld [vmem:[%s6607_s13 + $0x8] sm:$0xff]  ;;  %v4265_v41 = vld [vmem:[%s6607_s13 + $0x10] sm:$0xff] }
0x2296   : > { %v4107_v59 = vpop.permute.xlu1 %4106  ;;  %v5549_v15 = vpack.c.bf16 %v4262_v51, %v4261_v12 }
0x2297   : > { %5534 = vmatprep.subr.bf16.mxu0 %v5533_v42  ;;  %v4127_v63 = vsel %vm2148_vm13, %v7037_v55, %v4107_v59 }
0x2298   : > { %5536 = vmatpush3.bf16.msra.mxu0 %v5533_v42  ;;  %5550 = vmatprep.subr.bf16.mxu1 %v5549_v15  ;;  %v5553_v42 = vpack.c.bf16 %v4264_v50, %v4263_v37 }
0x2299   : > { %5538 = vmatprep.subr.bf16.mxu0 %v5537_v49  ;;  %5552 = vmatpush3.bf16.msra.mxu1 %v5549_v15  ;;  %v4475_v15 = vrot.slane %v6597_v5, %v6947_v17 }
0x229a   : > { %v4113_v61 = vpop.permute.xlu1 %4112 }
0x229e   : > { %v5905_v11 = vpop.eup %5904 }
0x229f   : > { %v4005_v43 = vsel %vm2236_vm3, %v5905_v11, 0.0  ;;  %v5907_v39 = vpop.eup %5906 }
0x22a0   : > { %4006 = vadd.xlane.f32.xlu0 %v4005_v43  ;;  %v4008_v31 = vsel %vm2236_vm3, %v5907_v39, 0.0 }
0x22a4   : > { %4009 = vadd.xlane.f32.xlu0 %v4008_v31  ;;  %v4268_v31 = vld [vmem:[%s6607_s13 + $0x28] sm:$0xff] }
0x22ba   : > { %4104 = vrot.lane.b32.xlu0 %v7043_v40, %s6208_s17  ;;  %v3288_v40 = vld [vmem:[%s6612_s28 + $0x18] sm:$0xff] }
0x22bb   : > { %v5541_v14 = vpack.c.bf16 %v3288_v40, %v3287_v48  ;;  %v4849_v48 = vld [vmem:[%s6569_s3 + $0x4] ss:$0 sm:$0xff] }
0x22be   : > { %4114 = vrot.lane.b32.xlu0 %v5289_v20, %s6210_s5 }
0x232d   : > { %v4007_v44 = vpop.xlane.xlu0 %4006 }
0x232e   : > { %5908 = vrcp.f32 %v4007_v44 }
0x2331   : > { %v4010_v45 = vpop.xlane.xlu0 %4009 }
0x2332   : > { %5910 = vrcp.f32 %v4010_v45 }
0x2335   : > { %v4105_v38 = vpop.permute.xlu0 %4104 }
0x2336   : > { %v4126_v21 = vsel %vm2148_vm13, %v7039_v16, %v4105_v38 }
0x2337   : > { %v4128_v52 = vsel %vm2236_vm3, %v4126_v21, %v4113_v61  ;;  %v4269_v61 = vld [vmem:[%s6607_s13 + $0x30] sm:$0xff]  ;;  %v4270_v21 = vld [vmem:[%s6607_s13 + $0x38] sm:$0xff] }
0x2338   : > { %v5909_v34 = vpop.eup %5908 }
0x2339   : > { %v4012_v46 = vmul.f32 %v5909_v34, %v5905_v11  ;;  %v4115_v22 = vpop.permute.xlu0 %4114  ;;  %v4266_v11 = vld [vmem:[%s6607_s13 + $0x18] sm:$0xff] }
0x233a   : > { %v4129_v7 = vsel %vm2236_vm3, %v4127_v63, %v4115_v22  ;;  %v5557_v43 = vpack.c.bf16 %v4266_v11, %v4265_v41  ;;  %v4274_v63 = vrot.slane %v6591_v3, %v6947_v17  ;;  %v4481_v41 = vrot.slane %v6610_v6, %v6947_v17 }
0x233b   : > { %5301 = vmatprep.mubr.msk.f32.mxu0 %vm2236_vm3, %v4012_v46 }
0x233c   : > { %v5911_v33 = vpop.eup %5910 }
0x233d   : > { %v4014_v47 = vmul.f32 %v5911_v33, %v5907_v39  ;;  %v4267_v39 = vld [vmem:[%s6607_s13 + $0x20] sm:$0xff] }
0x233e   : > { %v5561_v44 = vpack.c.bf16 %v4268_v31, %v4267_v39 }
0x233f   : > { %5302 = vmatmul.mubr.msk.f32.vlgmr.msra.gmra.mrb[18].mxu0 %vm2236_vm3, %v4014_v47 }
0x2340   : > { %5540 = vmatpush3.bf16.msra.mxu0 %v5537_v49 }
0x2341   : > { %5542 = vmatprep.subr.bf16.mxu0 %v5541_v14 }
0x2344   : > { %5544 = vmatpush3.bf16.msra.mxu0 %v5541_v14 }
0x2345   : > { %5554 = vmatprep.subr.bf16.mxu0 %v5553_v42 }
0x2412   : > { %v5303_v54 = vpop.f32.mrb[18].mxu0 }
0x2413   : > { %4122 = vrot.lane.b32.xlu0 %v5303_v54, %s6211_s15  ;;  %v4093_v35 = vpop.f32.mrb[19].mxu0  ;;  %v4850_v54 = vld [vmem:[%s6569_s3 + $0x5] ss:$0 sm:$0xff] }
0x2414   : > { %4120 = vrot.lane.b32.xlu1 %v4093_v35, %s6211_s15 }
0x2485   : > { %v4123_v62 = vpop.permute.xlu0 %4122 }
0x2486   : > { %v4121_v53 = vpop.permute.xlu1 %4120  ;;  %v4131_v9 = vsel %vm2986_vm4, %v4129_v7, %v4123_v62  ;;  %v5565_v62 = vpack.c.bf16 %v4270_v21, %v4269_v61  ;;  %v4856_v61 = vld [vmem:[%s7261_s29 + $0x2] ss:$0 sm:$0xff] (!%p4855_p3) }
0x2487   : > { %v4130_v19 = vsel %vm2986_vm4, %v4128_v52, %v4121_v53 }
0x2488   : > { %5312 = vmatprep.mubr.msk.f32.mxu0 %vm2056_vm12, %v4130_v19 }
0x2489   : > { %5313 = vmatmul.mubr.msk.f32.vlgmr.msra.gmra.mrb[20].mxu0 %vm2056_vm12, %v4131_v9 }
0x248a   : > { %5556 = vmatpush3.bf16.msra.mxu0 %v5553_v42 }
0x248b   : > { %5558 = vmatprep.subr.bf16.mxu0 %v5557_v43 }
0x248e   : > { %5560 = vmatpush3.bf16.msra.mxu0 %v5557_v43 }
0x248f   : > { %5562 = vmatprep.subr.bf16.mxu0 %v5561_v44 }
0x2492   : > { %5564 = vmatpush3.bf16.msra.mxu0 %v5561_v44 }
0x2493   : > { %5566 = vmatprep.subr.bf16.mxu0 %v5565_v62 }
0x2496   : > { %5568 = vmatpush3.bf16.msra.mxu0 %v5565_v62  ;;  %v4857_v62 = vld [vmem:[%s7261_s29 + $0x3] ss:$0 sm:$0xff] (!%p4855_p3) }
0x255c   : > { %v5314_v10 = vpop.f32.mrb[20].mxu0 }
0x255d   : > { %v4214_v16 = vadd.f32 %v5314_v10, %v4846_v1  ;;  %v4208_v13 = vpop.f32.mrb[21].mxu0  ;;  %v4361_v10 = vrot.slane %v6594_v4, %v6947_v17 }
0x255e   : > { %v4209_v2 = vadd.f32 %v4846_v1, %v4208_v13 }
0x255f   : > { %v4218_v55 = vadd.f32 %v4214_v16, %v6975_v56 }
0x2560   : > { %v4217_v36 = vadd.f32 %v4209_v2, %v6971_v57 }
0x2561   : > { %v4224_v20 = vsel %vm2056_vm12, %v4218_v55, 0.0 }
0x2562   : > { %4225 = vadd.xlane.f32.xlu0 %v4224_v20  ;;  %v4221_v18 = vsel %vm2056_vm12, %v4217_v36, 0.0 }
0x2563   : > { %4222 = vadd.xlane.f32.xlu1 %v4221_v18 }
0x25ef   : > { %v4226_v24 = vpop.xlane.xlu0 %4225 }
0x25f0   : > { %v4228_v25 = vmul.f32 0.03125, %v4226_v24  ;;  %v4223_v26 = vpop.xlane.xlu1 %4222 }
0x25f1   : > { %v4227_v27 = vmul.f32 0.03125, %v4223_v26 }
0x25f2   : > { %v4230_v28 = vsub.f32 %v4218_v55, %v4228_v25 }
0x25f3   : > { %v4229_v8 = vsub.f32 %v4217_v36, %v4227_v27 }
0x25f4   : > { %v4232_v29 = vmul.f32 %v4230_v28, %v4230_v28 }
0x25f5   : > { %v4231_v56 = vmul.f32 %v4229_v8, %v4229_v8 }
0x25f6   : > { %v4236_v57 = vsel %vm2056_vm12, %v4232_v29, 0.0 }
0x25f7   : > { %4237 = vadd.xlane.f32.xlu1 %v4236_v57  ;;  %v4233_v60 = vsel %vm2056_vm12, %v4231_v56, 0.0 }
0x25f8   : > { %4234 = vadd.xlane.f32.xlu0 %v4233_v60 }
0x2684   : > { %v4238_v45 = vpop.xlane.xlu1 %4237 }
0x2685   : > { %v4240_v34 = vmul.f32 0.03125, %v4238_v45  ;;  %v4235_v46 = vpop.xlane.xlu0 %4234 }
0x2686   : > { %v4239_v33 = vmul.f32 0.03125, %v4235_v46 }
0x2687   : > { %v4242_v47 = vadd.f32 1e-05, %v4240_v34 }
0x2688   : > { %v4241_v58 = vadd.f32 1e-05, %v4239_v33 }
0x2689   : > { %5912 = vrsqrt.f32 %v4242_v47 }
0x268a   : > { %5914 = vrsqrt.f32 %v4241_v58 }
0x2693   : > { %v5913_v23 = vpop.eup %5912 }
0x2694   : > { %v5915_v49 = vpop.eup %5914  ;;  %v4246_v40 = vmul.f32 %v5913_v23, %v4230_v28 }
0x2695   : > { %v4245_v14 = vmul.f32 %v5915_v49, %v4229_v8 }
0x2696   : > { %v4252_v35 = vmul.f32 %v4849_v48, %v4246_v40 }
0x2697   : > { %v4251_v38 = vmul.f32 %v4849_v48, %v4245_v14 }
0x2698   : > { %v4258_v22 = vadd.f32 %v4850_v54, %v4252_v35 }
0x2699   : > { %v4257_v59 = vadd.f32 %v4850_v54, %v4251_v38 }
0x269b   : > { %5323 = vmatprep.mubr.msk.f32.mxu1 %vm2056_vm12, %v4257_v59 }
0x269c   : > { %5324 = vmatmul.mubr.msk.f32.vlgmr.msra.gmra.mrb[20].mxu1 %vm2056_vm12, %v4258_v22 }
0x276f   : > { %v5325_v53 = vpop.f32.mrb[20].mxu1 }
0x2770   : > { %v4353_v52 = vadd.f32 %v5325_v53, %v4274_v63  ;;  %v4347_v7 = vpop.f32.mrb[21].mxu1 }
0x2771   : > { %v4348_v19 = vadd.f32 %v4347_v7, %v4274_v63 }
0x2772   : > { %v4357_v1 = vmax.f32 %v4353_v52, 0.0 }
0x2773   : > { %v4356_v9 = vmax.f32 %v4348_v19, 0.0 }
0x2775   : > { %5342 = vmatprep.mubr.msk.f32.mxu0 %vm4362_vm5, %v4356_v9 }
0x2776   : > { %5343 = vmatmul.mubr.msk.f32.vlgmr.msra.gmra.mrb[22].mxu0 %vm4362_vm5, %v4357_v1 }
0x2849   : > { %v5344_v16 = vpop.f32.mrb[22].mxu0 }
0x284a   : > { %v4441_v13 = vadd.f32 %v5344_v16, %v4361_v10  ;;  %v4435_v2 = vpop.f32.mrb[23].mxu0 }
0x284b   : > { %v4436_v55 = vadd.f32 %v4435_v2, %v4361_v10 }
0x284c   : > { %v4445_v36 = vadd.f32 %v4441_v13, %v4258_v22 }
0x284d   : > { %v4444_v20 = vadd.f32 %v4436_v55, %v4257_v59 }
0x284e   : > { %v4449_v3 = vsel %vm2056_vm12, %v4445_v36, 0.0 }
0x284f   : > { %4450 = vadd.xlane.f32.xlu1 %v4449_v3  ;;  %v4446_v18 = vsel %vm2056_vm12, %v4444_v20, 0.0 }
0x2850   : > { %4447 = vadd.xlane.f32.xlu0 %v4446_v18 }
0x28dc   : > { %v4451_v24 = vpop.xlane.xlu1 %4450 }
0x28dd   : > { %v4453_v25 = vmul.f32 0.03125, %v4451_v24  ;;  %v4448_v26 = vpop.xlane.xlu0 %4447 }
0x28de   : > { %v4452_v27 = vmul.f32 0.03125, %v4448_v26 }
0x28df   : > { %v4455_v28 = vsub.f32 %v4445_v36, %v4453_v25 }
0x28e0   : > { %v4454_v8 = vsub.f32 %v4444_v20, %v4452_v27 }
0x28e1   : > { %v4457_v29 = vmul.f32 %v4455_v28, %v4455_v28 }
0x28e2   : > { %v4456_v4 = vmul.f32 %v4454_v8, %v4454_v8 }
0x28e3   : > { %v4461_v56 = vsel %vm2056_vm12, %v4457_v29, 0.0 }
0x28e4   : > { %4462 = vadd.xlane.f32.xlu1 %v4461_v56  ;;  %v4458_v57 = vsel %vm2056_vm12, %v4456_v4, 0.0 }
0x28e5   : > { %4459 = vadd.xlane.f32.xlu0 %v4458_v57 }
0x2971   : > { %v4463_v60 = vpop.xlane.xlu1 %4462 }
0x2972   : > { %v4465_v30 = vmul.f32 0.03125, %v4463_v60  ;;  %v4460_v0 = vpop.xlane.xlu0 %4459 }
0x2973   : > { %v4464_v32 = vmul.f32 0.03125, %v4460_v0 }
0x2974   : > { %v4467_v12 = vadd.f32 1e-05, %v4465_v30 }
0x2975   : > { %v4466_v51 = vadd.f32 1e-05, %v4464_v32 }
0x2976   : > { %5916 = vrsqrt.f32 %v4467_v12 }
0x2977   : > { %5918 = vrsqrt.f32 %v4466_v51 }
0x2980   : > { %v5917_v37 = vpop.eup %5916 }
0x2981   : > { %v5919_v50 = vpop.eup %5918  ;;  %v4471_v42 = vmul.f32 %v5917_v37, %v4455_v28 }
0x2982   : > { %v4470_v11 = vmul.f32 %v5919_v50, %v4454_v8  ;;  %4489 = sbr.rel (%p4855_p3) target bundleno = 10950 (0x2ac6), region = 116 }
0x2983   : > { %v4477_v43 = vmul.f32 %v4475_v15, %v4471_v42 }
0x2984   : > { %v4476_v39 = vmul.f32 %v4475_v15, %v4470_v11 }
0x2985   : > { %v4483_v31 = vadd.f32 %v4481_v41, %v4477_v43 }
0x2986   : > { %v4482_v44 = vadd.f32 %v4481_v41, %v4476_v39 }
0x2987   : > { %4485 = vst.msk [vmem:[#allocation3 + $0x8] sm:$0xff] %vm2056_vm12, %v4483_v31  ;;  %v4495_v45 = vsel (!%p4855_p3), %vm2056_vm12, %v4483_v31, 0.0 }
0x2988   : > { %4484 = vst.msk [vmem:[#allocation3] sm:$0xff] %vm2056_vm12, %v4482_v44  ;;  %v4492_v5 = vsel (!%p4855_p3), %vm2056_vm12, %v4482_v44, 0.0 }
0x2989   : > { %4493 = vadd.xlane.f32.xlu0 %v4492_v5 }
0x298d   : > { %4496 = vadd.xlane.f32.xlu0 %v4495_v45 }
0x2a16   : > { %v4494_v6 = vpop.xlane.xlu0 %4493 }
0x2a17   : > { %v4498_v17 = vmul.f32 0.03125, %v4494_v6 }
0x2a19   : > { %v4500_v34 = vsub.f32 %v4482_v44, %v4498_v17 }
0x2a1a   : > { %v4497_v46 = vpop.xlane.xlu0 %4496 }
0x2a1b   : > { %v4499_v33 = vmul.f32 0.03125, %v4497_v46  ;;  %v4502_v47 = vmul.f32 %v4500_v34, %v4500_v34 }
0x2a1d   : > { %v4501_v58 = vsub.f32 %v4483_v31, %v4499_v33  ;;  %v4504_v23 = vsel %vm2056_vm12, %v4502_v47, 0.0 }
0x2a1e   : > { %4505 = vadd.xlane.f32.xlu1 %v4504_v23 }
0x2a1f   : > { %v4503_v48 = vmul.f32 %v4501_v58, %v4501_v58 }
0x2a21   : > { %v4507_v49 = vsel %vm2056_vm12, %v4503_v48, 0.0 }
0x2a22   : > { %4508 = vadd.xlane.f32.xlu1 %v4507_v49 }
0x2aab   : > { %v4506_v40 = vpop.xlane.xlu1 %4505 }
0x2aac   : > { %v4510_v14 = vmul.f32 0.03125, %v4506_v40 }
0x2aae   : > { %v4512_v54 = vadd.f32 1e-05, %v4510_v14 }
0x2aaf   : > { %v4509_v35 = vpop.xlane.xlu1 %4508 }
0x2ab0   : > { %5920 = vrsqrt.f32 %v4512_v54  ;;  %v4511_v38 = vmul.f32 0.03125, %v4509_v35 }
0x2ab2   : > { %v4513_v59 = vadd.f32 1e-05, %v4511_v38 }
0x2ab4   : > { %5922 = vrsqrt.f32 %v4513_v59 }
0x2aba   : > { %v5921_v22 = vpop.eup %5920 }
0x2abb   : > { %v4516_v21 = vmul.f32 %v5921_v22, %v4500_v34 }
0x2abd   : > { %v4522_v63 = vmul.f32 %v4856_v61, %v4516_v21 }
0x2abe   : > { %v5923_v53 = vpop.eup %5922 }
0x2abf   : > { %v4528_v52 = vadd.f32 %v4857_v62, %v4522_v63  ;;  %v4517_v7 = vmul.f32 %v5923_v53, %v4501_v58 }
0x2ac1   : > { %4530 = vst.msk [vmem:[#allocation13] sm:$0xff] %vm2056_vm12, %v4528_v52  ;;  %v4523_v19 = vmul.f32 %v4856_v61, %v4517_v7 }
0x2ac3   : > { %v4529_v9 = vadd.f32 %v4857_v62, %v4523_v19 }
0x2ac5   : > { %4531 = vst.msk [vmem:[#allocation13 + $0x8] sm:$0xff] %vm2056_vm12, %v4529_v9 }
0x2ac6 PF: > { %p5614_p9 = scmp.eq.s32.totalorder %s6294_s21, 3  ;;  %s6212_s28 = smov [#allocation13]  }
0x2ac7   : > { %s4538_s30 = sshll.u32 %s6212_s28, 4  ;;  %s4539_s30 = int_to_ptr.vmem [resolvable:$true] %s4538_s30 }
0x2ac8   : > { %s6100_s26 = scalar_lea.vmem %s4539_s30, 256  ;;  %p6107_p4 = scmp.lt.s32.totalorder %s4539_s30, %s4539_s30 }
0x2ac9   : > { %p6101_p12 = scmp.ne.s32.totalorder %s4539_s30, %s6100_s26  ;;  %p6108_p0 = scmp.lt.s32.totalorder %s6100_s26, %s6100_s26 }
0x2acb   : > { %p6102_p2 = pnand %p6101_p12, %p5614_p9  ;;  %p6109_p7 = por %p6108_p0, %p6107_p4 }
0x2acd   : > { %p6103_p6 = pneg %p6102_p2 }
0x2acf   : > { %p6110_p13 = pnand %p6109_p7, %p6103_p6 }
0x2ad1   : > { %6113 = shalt.err (!%p6110_p13)
}
0x2ad2   : > { %s7262_s11 = sld [smem:[#allocation27_spill]] }
0x2ad8   : > { %s6114_s2 = scalar_lea.hbm %s7262_s11, 256 }
0x2ad9   : > { %p6115_p5 = scmp.ne.s32.totalorder %s7262_s11, %s6114_s2  ;;  %p6120_p11 = scmp.lt.u32.totalorder %s6114_s2, %s7262_s11 }
0x2adb   : > { %p6116_p1 = pnand %p6115_p5, %p5614_p9 }
0x2add   : > { %p6117_p8 = pneg %p6116_p1 }
0x2adf   : > { %p6122_p10 = pnand %p6120_p11, %p6117_p8 }
0x2ae1   : > { %6125 = shalt.err (!%p6122_p10)
}
0x2ae2   : > { %s6213_s23 = smov 128   ;;  %s6214_s20 = smov 8  }
0x2ae3   : > { %5586 = dma.vmem_to_hbm [thread:$0]  (%p5614_p9), %s4539_s30, 256, %s7262_s11, [#allocation6], %s6213_s23, %s6213_s23, %s6214_s20  }
0x2ae4   : > { %6155 = dma.done.wait (%p5614_p9), [#allocation6], 256  }
0x2ae5   : > { %6157 = vsyncadd (%p5614_p9), [#allocation6], 4294967040 }
0x2ae6 PF: > { %s7263_s20 = sld [smem:[#allocation18_spill]]  ;;  %s7264_s10 = sld [smem:[#allocation19_spill]] }
0x2ae7   : > { %s7265_s17 = smov %s6164_s18  ;;  %s7266_s18 = smov %s6168_s19 }
0x2aec   : > { %p21_p3 = scmp.ge.s32.totalorder %s7263_s20, 6   ;;  %s7267_s19 = smov %s7264_s10 }
0x2aee   :  { %23 = sbr.rel (!%p21_p3) target bundleno = 13 (0xd), region = 181 }
0x2af5   :  { %4554 = vsyncpa [#allocation5], 1 }
0x2af6   :  { %4556 = vsyncpa [#allocation5 + $0x1], 1 }
0x2af7   :  { %4557 = vsyncpa [#allocation8], 1 }
0x2af8   :  { %4558 = vsyncpa [#allocation6], 1 }
0x2af9   :  { %4560 = vsyncpa [#allocation6 + $0x1], 1 }

</bundles_post_ra>
